<compile_context>
chip_gen: v7x
topology: tpu7x:2x2x1
jax: 0.10.0
libtpu: 0.0.40
codegen_flags: <defaults>
</compile_context>

<pallas_src>
import jax
import jax.numpy as jnp
from jax.experimental import pallas as pl
from jax.experimental.pallas import tpu as pltpu


# ----------------------------------------------------------------------------
# Fused kernel: whole forward pass for ONE image, intermediates in VMEM
# ----------------------------------------------------------------------------
def _fused_xception_kernel(p1_ref, w1_ref, b1_ref, w2_ref, b2_ref,
                           dww_ref, dwb_ref, pww_ref, pwb_ref,
                           fcw_ref, fcb_ref,
                           out_ref, a1pad_ref, a2pad_ref):
    Hp, Wp, _ = a1pad_ref.shape
    H, W = Hp - 2, Wp - 2                       # post-stem spatial (8 x 8)
    C2 = a2pad_ref.shape[-1]

    # 1-pixel halo handled entirely in VMEM: zero the padded scratches.
    a1pad_ref[...] = jnp.zeros_like(a1pad_ref)
    a2pad_ref[...] = jnp.zeros_like(a2pad_ref)

    # ---- stem conv1: 3x3 stride 2 (+BN-folded bias) + ReLU   [MXU] ----------
    y1 = jnp.dot(p1_ref[0], w1_ref[...], preferred_element_type=jnp.float32)
    y1 = jnp.maximum(y1 + b1_ref[...], 0.0)                 # (H*W, C1) f32
    for h in range(H):                                       # write interior
        a1pad_ref[1 + h, 1:1 + W, :] = y1[h * W:(h + 1) * W, :]

    # ---- conv2: 3x3 stride 1 (+bias) + ReLU, shifted-tap matmuls  [MXU] -----
    w2 = w2_ref[...]                                         # (3,3,C1,C2) bf16
    b2 = b2_ref[...]                                         # (1, C2)     f32
    for h in range(H):
        acc = jnp.zeros((W, C2), jnp.float32)
        for di in range(3):
            for dj in range(3):
                win = a1pad_ref[h + di, dj:dj + W, :]        # (W, C1) f32
                acc = acc + jnp.dot(win.astype(jnp.bfloat16), w2[di, dj],
                                    preferred_element_type=jnp.float32)
        a2pad_ref[1 + h, 1:1 + W, :] = jnp.maximum(acc + b2, 0.0)

    # ---- depthwise 3x3 (+BN-folded bias)   [VPU, f32] -----------------------
    a2p = a2pad_ref[...]                                     # (H+2, W+2, C2)
    kdw = dww_ref[...]                                       # (3, 3, C2)
    dw = jnp.zeros((H, W, C2), jnp.float32)
    for di in range(3):
        for dj in range(3):
            dw = dw + a2p[di:di + H, dj:dj + W, :] * kdw[di, dj:dj + 1, :]
    dw = dw + dwb_ref[...]

    # ---- global average pool, commuted ahead of the linear pointwise conv ---
    inv_hw = 1.0 / float(H * W)
    gap_dw = jnp.sum(jnp.sum(dw, axis=0), axis=0, keepdims=True) * inv_hw
    # residual GAP: padded border is zero, so the full-tile sum == interior sum
    gap_res = jnp.sum(jnp.sum(a2p, axis=0), axis=0, keepdims=True) * inv_hw

    # ---- pointwise 1x1 (+bias); un-activated residual add  [MXU] ------------
    sep = jnp.dot(gap_dw.astype(jnp.bfloat16), pww_ref[...],
                  preferred_element_type=jnp.float32) + pwb_ref[...]
    feat = sep + gap_res                                     # (1, embed_dim)

    # ---- fc: Linear(embed_dim, 768)  [MXU, lane-dense 768-wide store] -------
    out = jnp.dot(feat.astype(jnp.bfloat16), fcw_ref[...],
                  preferred_element_type=jnp.float32) + fcb_ref[...]
    out_ref[0] = out.astype(out_ref.dtype)


# ----------------------------------------------------------------------------
# Boundary-only glue: stride-2 stem patches (3-channel input, tiny)
# ----------------------------------------------------------------------------
def _im2col_stride2_3x3(x):
    N, H, W, C = x.shape
    xp = jnp.pad(x, ((0, 0), (1, 1), (1, 1), (0, 0)))
    Ho = (H + 2 - 3) // 2 + 1
    Wo = (W + 2 - 3) // 2 + 1
    cols = [xp[:, di:di + 2 * Ho:2, dj:dj + 2 * Wo:2, :]
            for di in range(3) for dj in range(3)]
    p = jnp.concatenate(cols, axis=-1)                       # (N, Ho, Wo, 9*C)
    return p.reshape(N, Ho * Wo, 9 * C), Ho, Wo


# ----------------------------------------------------------------------------
# Parameters (deterministic synthetic init) and forward pass
# ----------------------------------------------------------------------------
def init_params(key, in_ch=3, c1=16, c2=32, embed_dim=32, out_dim=768):
    # embed_dim stands in for the 2048-dim Xception feature (scaled down);
    # BatchNorms are folded into conv weights/biases (inference semantics).
    ks = jax.random.split(key, 10)
    s = 0.05
    return {
        "conv1_w": jax.random.normal(ks[0], (3, 3, in_ch, c1), jnp.float32) * s,
        "conv1_b": jax.random.normal(ks[1], (c1,), jnp.float32) * s,
        "conv2_w": jax.random.normal(ks[2], (3, 3, c1, c2), jnp.float32) * s,
        "conv2_b": jax.random.normal(ks[3], (c2,), jnp.float32) * s,
        "dw_w":    jax.random.normal(ks[4], (3, 3, c2), jnp.float32) * s,
        "dw_b":    jax.random.normal(ks[5], (c2,), jnp.float32) * s,
        "pw_w":    jax.random.normal(ks[6], (c2, embed_dim), jnp.float32) * s,
        "pw_b":    jax.random.normal(ks[7], (embed_dim,), jnp.float32) * s,
        # fc: Linear(embed_dim, 768); stored already transposed as (in, out)
        "fc_w":    jax.random.normal(ks[8], (embed_dim, out_dim), jnp.float32) * s,
        "fc_b":    jax.random.normal(ks[9], (out_dim,), jnp.float32) * s,
    }


def xception_feature_extractor_forward(params, x_nchw):
    # PyTorch input is NCHW -> convert to NHWC (channels on the lane axis).
    x = jnp.transpose(x_nchw, (0, 2, 3, 1)).astype(jnp.float32)
    N = x.shape[0]

    p1, Ho, Wo = _im2col_stride2_3x3(x)
    p1 = p1.astype(jnp.bfloat16)                             # MXU operand

    c1 = params["conv1_w"].shape[-1]
    c2 = params["conv2_w"].shape[-1]
    embed = params["pw_w"].shape[-1]
    out_dim = params["fc_w"].shape[-1]

    # bf16 for MXU operands, f32 for biases / VPU-side depthwise taps.
    w1 = params["conv1_w"].reshape(-1, c1).astype(jnp.bfloat16)   # (27, c1)
    b1 = params["conv1_b"].reshape(1, c1)
    w2 = params["conv2_w"].astype(jnp.bfloat16)                   # (3,3,c1,c2)
    b2 = params["conv2_b"].reshape(1, c2)
    dww = params["dw_w"]                                          # (3,3,c2)
    dwb = params["dw_b"].reshape(1, c2)
    pww = params["pw_w"].astype(jnp.bfloat16)                     # (c2, embed)
    pwb = params["pw_b"].reshape(1, embed)
    fcw = params["fc_w"].astype(jnp.bfloat16)                     # (embed, 768)
    fcb = params["fc_b"].reshape(1, out_dim)

    def full(shape):
        return pl.BlockSpec(tuple(shape), lambda n: (0,) * len(shape))

    out = pl.pallas_call(
        _fused_xception_kernel,
        out_shape=jax.ShapeDtypeStruct((N, 1, out_dim), jnp.float32),
        grid_spec=pltpu.PrefetchScalarGridSpec(
            num_scalar_prefetch=0,
            grid=(N,),                                   # one image per step
            in_specs=[
                pl.BlockSpec((1,) + tuple(p1.shape[1:]), lambda n: (n, 0, 0)),
                full(w1.shape), full(b1.shape),
                full(w2.shape), full(b2.shape),
                full(dww.shape), full(dwb.shape),
                full(pww.shape), full(pwb.shape),
                full(fcw.shape), full(fcb.shape),
            ],
            out_specs=pl.BlockSpec((1, 1, out_dim), lambda n: (n, 0, 0)),
            scratch_shapes=[
                pltpu.VMEM((Ho + 2, Wo + 2, c1), jnp.float32),   # padded conv1 out
                pltpu.VMEM((Ho + 2, Wo + 2, c2), jnp.float32),   # padded conv2 out
            ],
        ),
        compiler_params=pltpu.CompilerParams(
            dimension_semantics=("parallel",),           # v7x: 2 TCs share batch
        ),
    )(p1, w1, b1, w2, b2, dww, dwb, pww, pwb, fcw, fcb)

    return out.reshape(N, out_dim)                       # (N, 768)


if __name__ == "__main__":
    key = jax.random.PRNGKey(0)
    pkey, xkey = jax.random.split(key)
    params = init_params(pkey)

    # small NCHW input consistent with an image model: batch=2, C=3, 16x16
    x = jax.random.normal(xkey, (2, 3, 16, 16), dtype=jnp.float32)

    out = jax.jit(xception_feature_extractor_forward)(params, x)
    out = jax.block_until_ready(out)
    assert out.shape == (2, 768), out.shape
    assert out.dtype == jnp.float32
    print("KERNEL_OK")
</pallas_src>

<mosaic_0001>
module attributes {stable_mosaic.version = 11 : i64} {
  func.func @_fused_xception_kernel(%arg0: i32, %arg1: memref<1x64x27xbf16, #tpu.memory_space<vmem>>, %arg2: memref<27x16xbf16, #tpu.memory_space<vmem>>, %arg3: memref<1x16xf32, #tpu.memory_space<vmem>>, %arg4: memref<3x3x16x32xbf16, #tpu.memory_space<vmem>>, %arg5: memref<1x32xf32, #tpu.memory_space<vmem>>, %arg6: memref<3x3x32xf32, #tpu.memory_space<vmem>>, %arg7: memref<1x32xf32, #tpu.memory_space<vmem>>, %arg8: memref<32x32xbf16, #tpu.memory_space<vmem>>, %arg9: memref<1x32xf32, #tpu.memory_space<vmem>>, %arg10: memref<32x768xbf16, #tpu.memory_space<vmem>>, %arg11: memref<1x768xf32, #tpu.memory_space<vmem>>, %arg12: memref<1x1x768xf32, #tpu.memory_space<vmem>>, %arg13: memref<10x10x16xf32, #tpu.memory_space<vmem>>, %arg14: memref<10x10x32xf32, #tpu.memory_space<vmem>>) attributes {dimension_semantics = [#tpu.dimension_semantics<parallel>], iteration_bounds = array<i64: 2>, scalar_prefetch = 0 : i64, scratch_operands = 2 : i64, tpu.core_type = #tpu.core_type<tc>, window_params = [{transform_indices = @transform_0, window_bounds = array<i64: 1, 64, 27>}, {pipeline_mode = #tpu.pipeline_mode<synchronous>, transform_indices = @transform_1, window_bounds = array<i64: 27, 16>}, {pipeline_mode = #tpu.pipeline_mode<synchronous>, transform_indices = @transform_2, window_bounds = array<i64: 1, 16>}, {pipeline_mode = #tpu.pipeline_mode<synchronous>, transform_indices = @transform_3, window_bounds = array<i64: 3, 3, 16, 32>}, {pipeline_mode = #tpu.pipeline_mode<synchronous>, transform_indices = @transform_4, window_bounds = array<i64: 1, 32>}, {pipeline_mode = #tpu.pipeline_mode<synchronous>, transform_indices = @transform_5, window_bounds = array<i64: 3, 3, 32>}, {pipeline_mode = #tpu.pipeline_mode<synchronous>, transform_indices = @transform_6, window_bounds = array<i64: 1, 32>}, {pipeline_mode = #tpu.pipeline_mode<synchronous>, transform_indices = @transform_7, window_bounds = array<i64: 32, 32>}, {pipeline_mode = #tpu.pipeline_mode<synchronous>, transform_indices = @transform_8, window_bounds = array<i64: 1, 32>}, {pipeline_mode = #tpu.pipeline_mode<synchronous>, transform_indices = @transform_9, window_bounds = array<i64: 32, 768>}, {pipeline_mode = #tpu.pipeline_mode<synchronous>, transform_indices = @transform_10, window_bounds = array<i64: 1, 768>}, {transform_indices = @transform_11, window_bounds = array<i64: 1, 1, 768>}]} {
    %cst = arith.constant 0.000000e+00 : f32
    %0 = vector.broadcast %cst : f32 to vector<10x10x16xf32>
    %c0 = arith.constant 0 : index
    %c0_0 = arith.constant 0 : index
    %c0_1 = arith.constant 0 : index
    %1 = vector.load %arg13[%c0, %c0_0, %c0_1] : memref<10x10x16xf32, #tpu.memory_space<vmem>>, vector<10x10x16xf32>
    tpu.vector_store %arg13[%c0, %c0_0, %c0_1], %0 {strides = array<i32>} : memref<10x10x16xf32, #tpu.memory_space<vmem>>, vector<10x10x16xf32>,
    %cst_2 = arith.constant 0.000000e+00 : f32
    %2 = vector.broadcast %cst_2 : f32 to vector<10x10x32xf32>
    %c0_3 = arith.constant 0 : index
    %c0_4 = arith.constant 0 : index
    %c0_5 = arith.constant 0 : index
    %3 = vector.load %arg14[%c0_3, %c0_4, %c0_5] : memref<10x10x32xf32, #tpu.memory_space<vmem>>, vector<10x10x32xf32>
    tpu.vector_store %arg14[%c0_3, %c0_4, %c0_5], %2 {strides = array<i32>} : memref<10x10x32xf32, #tpu.memory_space<vmem>>, vector<10x10x32xf32>,
    %c0_6 = arith.constant 0 : index
    %c0_7 = arith.constant 0 : index
    %c0_8 = arith.constant 0 : index
    %4 = vector.load %arg1[%c0_6, %c0_7, %c0_8] : memref<1x64x27xbf16, #tpu.memory_space<vmem>>, vector<1x64x27xbf16>
    %5 = vector.shape_cast %4 : vector<1x64x27xbf16> to vector<64x27xbf16>
    %c0_9 = arith.constant 0 : index
    %c0_10 = arith.constant 0 : index
    %6 = vector.load %arg2[%c0_9, %c0_10] : memref<27x16xbf16, #tpu.memory_space<vmem>>, vector<27x16xbf16>
    %cst_11 = arith.constant dense<0.000000e+00> : vector<64x16xf32>
    %7 = tpu.matmul %5, %6, %cst_11 {dimension_numbers = #tpu.dot_dimension_numbers<[1], [0], [0], [1], [0, 0, 1, 1], [], []>} : vector<64x27xbf16>, vector<27x16xbf16>, vector<64x16xf32> -> vector<64x16xf32>
    %c0_12 = arith.constant 0 : index
    %c0_13 = arith.constant 0 : index
    %8 = vector.load %arg3[%c0_12, %c0_13] : memref<1x16xf32, #tpu.memory_space<vmem>>, vector<1x16xf32>
    %9 = vector.broadcast %8 : vector<1x16xf32> to vector<64x16xf32>
    %10 = arith.addf %7, %9 : vector<64x16xf32>
    %cst_14 = arith.constant 0.000000e+00 : f32
    %11 = vector.broadcast %cst_14 : f32 to vector<64x16xf32>
    %12 = arith.maximumf %10, %11 : vector<64x16xf32>
    %13 = vector.extract_strided_slice %12 {offsets = [0, 0], sizes = [8, 16], strides = [1, 1]} : vector<64x16xf32> to vector<8x16xf32>
    %c1 = arith.constant 1 : index
    %c1_15 = arith.constant 1 : index
    %c0_16 = arith.constant 0 : index
    %14 = vector.load %arg13[%c1, %c1_15, %c0_16] : memref<10x10x16xf32, #tpu.memory_space<vmem>>, vector<1x8x16xf32>
    %15 = vector.shape_cast %14 : vector<1x8x16xf32> to vector<8x16xf32>
    %16 = vector.shape_cast %13 : vector<8x16xf32> to vector<1x8x16xf32>
    tpu.vector_store %arg13[%c1, %c1_15, %c0_16], %16 {strides = array<i32>} : memref<10x10x16xf32, #tpu.memory_space<vmem>>, vector<1x8x16xf32>,
    %17 = vector.extract_strided_slice %12 {offsets = [8, 0], sizes = [8, 16], strides = [1, 1]} : vector<64x16xf32> to vector<8x16xf32>
    %c2 = arith.constant 2 : index
    %c1_17 = arith.constant 1 : index
    %c0_18 = arith.constant 0 : index
    %18 = vector.load %arg13[%c2, %c1_17, %c0_18] : memref<10x10x16xf32, #tpu.memory_space<vmem>>, vector<1x8x16xf32>
    %19 = vector.shape_cast %18 : vector<1x8x16xf32> to vector<8x16xf32>
    %20 = vector.shape_cast %17 : vector<8x16xf32> to vector<1x8x16xf32>
    tpu.vector_store %arg13[%c2, %c1_17, %c0_18], %20 {strides = array<i32>} : memref<10x10x16xf32, #tpu.memory_space<vmem>>, vector<1x8x16xf32>,
    %21 = vector.extract_strided_slice %12 {offsets = [16, 0], sizes = [8, 16], strides = [1, 1]} : vector<64x16xf32> to vector<8x16xf32>
    %c3 = arith.constant 3 : index
    %c1_19 = arith.constant 1 : index
    %c0_20 = arith.constant 0 : index
    %22 = vector.load %arg13[%c3, %c1_19, %c0_20] : memref<10x10x16xf32, #tpu.memory_space<vmem>>, vector<1x8x16xf32>
    %23 = vector.shape_cast %22 : vector<1x8x16xf32> to vector<8x16xf32>
    %24 = vector.shape_cast %21 : vector<8x16xf32> to vector<1x8x16xf32>
    tpu.vector_store %arg13[%c3, %c1_19, %c0_20], %24 {strides = array<i32>} : memref<10x10x16xf32, #tpu.memory_space<vmem>>, vector<1x8x16xf32>,
    %25 = vector.extract_strided_slice %12 {offsets = [24, 0], sizes = [8, 16], strides = [1, 1]} : vector<64x16xf32> to vector<8x16xf32>
    %c4 = arith.constant 4 : index
    %c1_21 = arith.constant 1 : index
    %c0_22 = arith.constant 0 : index
    %26 = vector.load %arg13[%c4, %c1_21, %c0_22] : memref<10x10x16xf32, #tpu.memory_space<vmem>>, vector<1x8x16xf32>
    %27 = vector.shape_cast %26 : vector<1x8x16xf32> to vector<8x16xf32>
    %28 = vector.shape_cast %25 : vector<8x16xf32> to vector<1x8x16xf32>
    tpu.vector_store %arg13[%c4, %c1_21, %c0_22], %28 {strides = array<i32>} : memref<10x10x16xf32, #tpu.memory_space<vmem>>, vector<1x8x16xf32>,
    %29 = vector.extract_strided_slice %12 {offsets = [32, 0], sizes = [8, 16], strides = [1, 1]} : vector<64x16xf32> to vector<8x16xf32>
    %c5 = arith.constant 5 : index
    %c1_23 = arith.constant 1 : index
    %c0_24 = arith.constant 0 : index
    %30 = vector.load %arg13[%c5, %c1_23, %c0_24] : memref<10x10x16xf32, #tpu.memory_space<vmem>>, vector<1x8x16xf32>
    %31 = vector.shape_cast %30 : vector<1x8x16xf32> to vector<8x16xf32>
    %32 = vector.shape_cast %29 : vector<8x16xf32> to vector<1x8x16xf32>
    tpu.vector_store %arg13[%c5, %c1_23, %c0_24], %32 {strides = array<i32>} : memref<10x10x16xf32, #tpu.memory_space<vmem>>, vector<1x8x16xf32>,
    %33 = vector.extract_strided_slice %12 {offsets = [40, 0], sizes = [8, 16], strides = [1, 1]} : vector<64x16xf32> to vector<8x16xf32>
    %c6 = arith.constant 6 : index
    %c1_25 = arith.constant 1 : index
    %c0_26 = arith.constant 0 : index
    %34 = vector.load %arg13[%c6, %c1_25, %c0_26] : memref<10x10x16xf32, #tpu.memory_space<vmem>>, vector<1x8x16xf32>
    %35 = vector.shape_cast %34 : vector<1x8x16xf32> to vector<8x16xf32>
    %36 = vector.shape_cast %33 : vector<8x16xf32> to vector<1x8x16xf32>
    tpu.vector_store %arg13[%c6, %c1_25, %c0_26], %36 {strides = array<i32>} : memref<10x10x16xf32, #tpu.memory_space<vmem>>, vector<1x8x16xf32>,
    %37 = vector.extract_strided_slice %12 {offsets = [48, 0], sizes = [8, 16], strides = [1, 1]} : vector<64x16xf32> to vector<8x16xf32>
    %c7 = arith.constant 7 : index
    %c1_27 = arith.constant 1 : index
    %c0_28 = arith.constant 0 : index
    %38 = vector.load %arg13[%c7, %c1_27, %c0_28] : memref<10x10x16xf32, #tpu.memory_space<vmem>>, vector<1x8x16xf32>
    %39 = vector.shape_cast %38 : vector<1x8x16xf32> to vector<8x16xf32>
    %40 = vector.shape_cast %37 : vector<8x16xf32> to vector<1x8x16xf32>
    tpu.vector_store %arg13[%c7, %c1_27, %c0_28], %40 {strides = array<i32>} : memref<10x10x16xf32, #tpu.memory_space<vmem>>, vector<1x8x16xf32>,
    %41 = vector.extract_strided_slice %12 {offsets = [56, 0], sizes = [8, 16], strides = [1, 1]} : vector<64x16xf32> to vector<8x16xf32>
    %c8 = arith.constant 8 : index
    %c1_29 = arith.constant 1 : index
    %c0_30 = arith.constant 0 : index
    %42 = vector.load %arg13[%c8, %c1_29, %c0_30] : memref<10x10x16xf32, #tpu.memory_space<vmem>>, vector<1x8x16xf32>
    %43 = vector.shape_cast %42 : vector<1x8x16xf32> to vector<8x16xf32>
    %44 = vector.shape_cast %41 : vector<8x16xf32> to vector<1x8x16xf32>
    tpu.vector_store %arg13[%c8, %c1_29, %c0_30], %44 {strides = array<i32>} : memref<10x10x16xf32, #tpu.memory_space<vmem>>, vector<1x8x16xf32>,
    %c0_31 = arith.constant 0 : index
    %c0_32 = arith.constant 0 : index
    %c0_33 = arith.constant 0 : index
    %c0_34 = arith.constant 0 : index
    %45 = vector.load %arg4[%c0_31, %c0_32, %c0_33, %c0_34] : memref<3x3x16x32xbf16, #tpu.memory_space<vmem>>, vector<3x3x16x32xbf16>
    %c0_35 = arith.constant 0 : index
    %c0_36 = arith.constant 0 : index
    %46 = vector.load %arg5[%c0_35, %c0_36] : memref<1x32xf32, #tpu.memory_space<vmem>>, vector<1x32xf32>
    %cst_37 = arith.constant 0.000000e+00 : f32
    %47 = vector.broadcast %cst_37 : f32 to vector<8x32xf32>
    %c0_38 = arith.constant 0 : index
    %c0_39 = arith.constant 0 : index
    %c0_40 = arith.constant 0 : index
    %48 = vector.load %arg13[%c0_38, %c0_39, %c0_40] : memref<10x10x16xf32, #tpu.memory_space<vmem>>, vector<1x8x16xf32>
    %49 = vector.shape_cast %48 : vector<1x8x16xf32> to vector<8x16xf32>
    %50 = arith.truncf %49 : vector<8x16xf32> to vector<8x16xbf16>
    %51 = vector.extract_strided_slice %45 {offsets = [0, 0, 0, 0], sizes = [1, 1, 16, 32], strides = [1, 1, 1, 1]} : vector<3x3x16x32xbf16> to vector<1x1x16x32xbf16>
    %52 = vector.shape_cast %51 : vector<1x1x16x32xbf16> to vector<16x32xbf16>
    %cst_41 = arith.constant dense<0.000000e+00> : vector<8x32xf32>
    %53 = tpu.matmul %50, %52, %cst_41 {dimension_numbers = #tpu.dot_dimension_numbers<[1], [0], [0], [1], [0, 0, 1, 1], [], []>} : vector<8x16xbf16>, vector<16x32xbf16>, vector<8x32xf32> -> vector<8x32xf32>
    %54 = arith.addf %47, %53 : vector<8x32xf32>
    %c0_42 = arith.constant 0 : index
    %c1_43 = arith.constant 1 : index
    %c0_44 = arith.constant 0 : index
    %55 = vector.load %arg13[%c0_42, %c1_43, %c0_44] : memref<10x10x16xf32, #tpu.memory_space<vmem>>, vector<1x8x16xf32>
    %56 = vector.shape_cast %55 : vector<1x8x16xf32> to vector<8x16xf32>
    %57 = arith.truncf %56 : vector<8x16xf32> to vector<8x16xbf16>
    %58 = vector.extract_strided_slice %45 {offsets = [0, 1, 0, 0], sizes = [1, 1, 16, 32], strides = [1, 1, 1, 1]} : vector<3x3x16x32xbf16> to vector<1x1x16x32xbf16>
    %59 = vector.shape_cast %58 : vector<1x1x16x32xbf16> to vector<16x32xbf16>
    %cst_45 = arith.constant dense<0.000000e+00> : vector<8x32xf32>
    %60 = tpu.matmul %57, %59, %cst_45 {dimension_numbers = #tpu.dot_dimension_numbers<[1], [0], [0], [1], [0, 0, 1, 1], [], []>} : vector<8x16xbf16>, vector<16x32xbf16>, vector<8x32xf32> -> vector<8x32xf32>
    %61 = arith.addf %54, %60 : vector<8x32xf32>
    %c0_46 = arith.constant 0 : index
    %c2_47 = arith.constant 2 : index
    %c0_48 = arith.constant 0 : index
    %62 = vector.load %arg13[%c0_46, %c2_47, %c0_48] : memref<10x10x16xf32, #tpu.memory_space<vmem>>, vector<1x8x16xf32>
    %63 = vector.shape_cast %62 : vector<1x8x16xf32> to vector<8x16xf32>
    %64 = arith.truncf %63 : vector<8x16xf32> to vector<8x16xbf16>
    %65 = vector.extract_strided_slice %45 {offsets = [0, 2, 0, 0], sizes = [1, 1, 16, 32], strides = [1, 1, 1, 1]} : vector<3x3x16x32xbf16> to vector<1x1x16x32xbf16>
    %66 = vector.shape_cast %65 : vector<1x1x16x32xbf16> to vector<16x32xbf16>
    %cst_49 = arith.constant dense<0.000000e+00> : vector<8x32xf32>
    %67 = tpu.matmul %64, %66, %cst_49 {dimension_numbers = #tpu.dot_dimension_numbers<[1], [0], [0], [1], [0, 0, 1, 1], [], []>} : vector<8x16xbf16>, vector<16x32xbf16>, vector<8x32xf32> -> vector<8x32xf32>
    %68 = arith.addf %61, %67 : vector<8x32xf32>
    %c1_50 = arith.constant 1 : index
    %c0_51 = arith.constant 0 : index
    %c0_52 = arith.constant 0 : index
    %69 = vector.load %arg13[%c1_50, %c0_51, %c0_52] : memref<10x10x16xf32, #tpu.memory_space<vmem>>, vector<1x8x16xf32>
    %70 = vector.shape_cast %69 : vector<1x8x16xf32> to vector<8x16xf32>
    %71 = arith.truncf %70 : vector<8x16xf32> to vector<8x16xbf16>
    %72 = vector.extract_strided_slice %45 {offsets = [1, 0, 0, 0], sizes = [1, 1, 16, 32], strides = [1, 1, 1, 1]} : vector<3x3x16x32xbf16> to vector<1x1x16x32xbf16>
    %73 = vector.shape_cast %72 : vector<1x1x16x32xbf16> to vector<16x32xbf16>
    %cst_53 = arith.constant dense<0.000000e+00> : vector<8x32xf32>
    %74 = tpu.matmul %71, %73, %cst_53 {dimension_numbers = #tpu.dot_dimension_numbers<[1], [0], [0], [1], [0, 0, 1, 1], [], []>} : vector<8x16xbf16>, vector<16x32xbf16>, vector<8x32xf32> -> vector<8x32xf32>
    %75 = arith.addf %68, %74 : vector<8x32xf32>
    %c1_54 = arith.constant 1 : index
    %c1_55 = arith.constant 1 : index
    %c0_56 = arith.constant 0 : index
    %76 = vector.load %arg13[%c1_54, %c1_55, %c0_56] : memref<10x10x16xf32, #tpu.memory_space<vmem>>, vector<1x8x16xf32>
    %77 = vector.shape_cast %76 : vector<1x8x16xf32> to vector<8x16xf32>
    %78 = arith.truncf %77 : vector<8x16xf32> to vector<8x16xbf16>
    %79 = vector.extract_strided_slice %45 {offsets = [1, 1, 0, 0], sizes = [1, 1, 16, 32], strides = [1, 1, 1, 1]} : vector<3x3x16x32xbf16> to vector<1x1x16x32xbf16>
    %80 = vector.shape_cast %79 : vector<1x1x16x32xbf16> to vector<16x32xbf16>
    %cst_57 = arith.constant dense<0.000000e+00> : vector<8x32xf32>
    %81 = tpu.matmul %78, %80, %cst_57 {dimension_numbers = #tpu.dot_dimension_numbers<[1], [0], [0], [1], [0, 0, 1, 1], [], []>} : vector<8x16xbf16>, vector<16x32xbf16>, vector<8x32xf32> -> vector<8x32xf32>
    %82 = arith.addf %75, %81 : vector<8x32xf32>
    %c1_58 = arith.constant 1 : index
    %c2_59 = arith.constant 2 : index
    %c0_60 = arith.constant 0 : index
    %83 = vector.load %arg13[%c1_58, %c2_59, %c0_60] : memref<10x10x16xf32, #tpu.memory_space<vmem>>, vector<1x8x16xf32>
    %84 = vector.shape_cast %83 : vector<1x8x16xf32> to vector<8x16xf32>
    %85 = arith.truncf %84 : vector<8x16xf32> to vector<8x16xbf16>
    %86 = vector.extract_strided_slice %45 {offsets = [1, 2, 0, 0], sizes = [1, 1, 16, 32], strides = [1, 1, 1, 1]} : vector<3x3x16x32xbf16> to vector<1x1x16x32xbf16>
    %87 = vector.shape_cast %86 : vector<1x1x16x32xbf16> to vector<16x32xbf16>
    %cst_61 = arith.constant dense<0.000000e+00> : vector<8x32xf32>
    %88 = tpu.matmul %85, %87, %cst_61 {dimension_numbers = #tpu.dot_dimension_numbers<[1], [0], [0], [1], [0, 0, 1, 1], [], []>} : vector<8x16xbf16>, vector<16x32xbf16>, vector<8x32xf32> -> vector<8x32xf32>
    %89 = arith.addf %82, %88 : vector<8x32xf32>
    %c2_62 = arith.constant 2 : index
    %c0_63 = arith.constant 0 : index
    %c0_64 = arith.constant 0 : index
    %90 = vector.load %arg13[%c2_62, %c0_63, %c0_64] : memref<10x10x16xf32, #tpu.memory_space<vmem>>, vector<1x8x16xf32>
    %91 = vector.shape_cast %90 : vector<1x8x16xf32> to vector<8x16xf32>
    %92 = arith.truncf %91 : vector<8x16xf32> to vector<8x16xbf16>
    %93 = vector.extract_strided_slice %45 {offsets = [2, 0, 0, 0], sizes = [1, 1, 16, 32], strides = [1, 1, 1, 1]} : vector<3x3x16x32xbf16> to vector<1x1x16x32xbf16>
    %94 = vector.shape_cast %93 : vector<1x1x16x32xbf16> to vector<16x32xbf16>
    %cst_65 = arith.constant dense<0.000000e+00> : vector<8x32xf32>
    %95 = tpu.matmul %92, %94, %cst_65 {dimension_numbers = #tpu.dot_dimension_numbers<[1], [0], [0], [1], [0, 0, 1, 1], [], []>} : vector<8x16xbf16>, vector<16x32xbf16>, vector<8x32xf32> -> vector<8x32xf32>
    %96 = arith.addf %89, %95 : vector<8x32xf32>
    %c2_66 = arith.constant 2 : index
    %c1_67 = arith.constant 1 : index
    %c0_68 = arith.constant 0 : index
    %97 = vector.load %arg13[%c2_66, %c1_67, %c0_68] : memref<10x10x16xf32, #tpu.memory_space<vmem>>, vector<1x8x16xf32>
    %98 = vector.shape_cast %97 : vector<1x8x16xf32> to vector<8x16xf32>
    %99 = arith.truncf %98 : vector<8x16xf32> to vector<8x16xbf16>
    %100 = vector.extract_strided_slice %45 {offsets = [2, 1, 0, 0], sizes = [1, 1, 16, 32], strides = [1, 1, 1, 1]} : vector<3x3x16x32xbf16> to vector<1x1x16x32xbf16>
    %101 = vector.shape_cast %100 : vector<1x1x16x32xbf16> to vector<16x32xbf16>
    %cst_69 = arith.constant dense<0.000000e+00> : vector<8x32xf32>
    %102 = tpu.matmul %99, %101, %cst_69 {dimension_numbers = #tpu.dot_dimension_numbers<[1], [0], [0], [1], [0, 0, 1, 1], [], []>} : vector<8x16xbf16>, vector<16x32xbf16>, vector<8x32xf32> -> vector<8x32xf32>
    %103 = arith.addf %96, %102 : vector<8x32xf32>
    %c2_70 = arith.constant 2 : index
    %c2_71 = arith.constant 2 : index
    %c0_72 = arith.constant 0 : index
    %104 = vector.load %arg13[%c2_70, %c2_71, %c0_72] : memref<10x10x16xf32, #tpu.memory_space<vmem>>, vector<1x8x16xf32>
    %105 = vector.shape_cast %104 : vector<1x8x16xf32> to vector<8x16xf32>
    %106 = arith.truncf %105 : vector<8x16xf32> to vector<8x16xbf16>
    %107 = vector.extract_strided_slice %45 {offsets = [2, 2, 0, 0], sizes = [1, 1, 16, 32], strides = [1, 1, 1, 1]} : vector<3x3x16x32xbf16> to vector<1x1x16x32xbf16>
    %108 = vector.shape_cast %107 : vector<1x1x16x32xbf16> to vector<16x32xbf16>
    %cst_73 = arith.constant dense<0.000000e+00> : vector<8x32xf32>
    %109 = tpu.matmul %106, %108, %cst_73 {dimension_numbers = #tpu.dot_dimension_numbers<[1], [0], [0], [1], [0, 0, 1, 1], [], []>} : vector<8x16xbf16>, vector<16x32xbf16>, vector<8x32xf32> -> vector<8x32xf32>
    %110 = arith.addf %103, %109 : vector<8x32xf32>
    %111 = vector.broadcast %46 : vector<1x32xf32> to vector<8x32xf32>
    %112 = arith.addf %110, %111 : vector<8x32xf32>
    %cst_74 = arith.constant 0.000000e+00 : f32
    %113 = vector.broadcast %cst_74 : f32 to vector<8x32xf32>
    %114 = arith.maximumf %112, %113 : vector<8x32xf32>
    %c1_75 = arith.constant 1 : index
    %c1_76 = arith.constant 1 : index
    %c0_77 = arith.constant 0 : index
    %115 = vector.load %arg14[%c1_75, %c1_76, %c0_77] : memref<10x10x32xf32, #tpu.memory_space<vmem>>, vector<1x8x32xf32>
    %116 = vector.shape_cast %115 : vector<1x8x32xf32> to vector<8x32xf32>
    %117 = vector.shape_cast %114 : vector<8x32xf32> to vector<1x8x32xf32>
    tpu.vector_store %arg14[%c1_75, %c1_76, %c0_77], %117 {strides = array<i32>} : memref<10x10x32xf32, #tpu.memory_space<vmem>>, vector<1x8x32xf32>,
    %cst_78 = arith.constant 0.000000e+00 : f32
    %118 = vector.broadcast %cst_78 : f32 to vector<8x32xf32>
    %c1_79 = arith.constant 1 : index
    %c0_80 = arith.constant 0 : index
    %c0_81 = arith.constant 0 : index
    %119 = vector.load %arg13[%c1_79, %c0_80, %c0_81] : memref<10x10x16xf32, #tpu.memory_space<vmem>>, vector<1x8x16xf32>
    %120 = vector.shape_cast %119 : vector<1x8x16xf32> to vector<8x16xf32>
    %121 = arith.truncf %120 : vector<8x16xf32> to vector<8x16xbf16>
    %122 = vector.extract_strided_slice %45 {offsets = [0, 0, 0, 0], sizes = [1, 1, 16, 32], strides = [1, 1, 1, 1]} : vector<3x3x16x32xbf16> to vector<1x1x16x32xbf16>
    %123 = vector.shape_cast %122 : vector<1x1x16x32xbf16> to vector<16x32xbf16>
    %cst_82 = arith.constant dense<0.000000e+00> : vector<8x32xf32>
    %124 = tpu.matmul %121, %123, %cst_82 {dimension_numbers = #tpu.dot_dimension_numbers<[1], [0], [0], [1], [0, 0, 1, 1], [], []>} : vector<8x16xbf16>, vector<16x32xbf16>, vector<8x32xf32> -> vector<8x32xf32>
    %125 = arith.addf %118, %124 : vector<8x32xf32>
    %c1_83 = arith.constant 1 : index
    %c1_84 = arith.constant 1 : index
    %c0_85 = arith.constant 0 : index
    %126 = vector.load %arg13[%c1_83, %c1_84, %c0_85] : memref<10x10x16xf32, #tpu.memory_space<vmem>>, vector<1x8x16xf32>
    %127 = vector.shape_cast %126 : vector<1x8x16xf32> to vector<8x16xf32>
    %128 = arith.truncf %127 : vector<8x16xf32> to vector<8x16xbf16>
    %129 = vector.extract_strided_slice %45 {offsets = [0, 1, 0, 0], sizes = [1, 1, 16, 32], strides = [1, 1, 1, 1]} : vector<3x3x16x32xbf16> to vector<1x1x16x32xbf16>
    %130 = vector.shape_cast %129 : vector<1x1x16x32xbf16> to vector<16x32xbf16>
    %cst_86 = arith.constant dense<0.000000e+00> : vector<8x32xf32>
    %131 = tpu.matmul %128, %130, %cst_86 {dimension_numbers = #tpu.dot_dimension_numbers<[1], [0], [0], [1], [0, 0, 1, 1], [], []>} : vector<8x16xbf16>, vector<16x32xbf16>, vector<8x32xf32> -> vector<8x32xf32>
    %132 = arith.addf %125, %131 : vector<8x32xf32>
    %c1_87 = arith.constant 1 : index
    %c2_88 = arith.constant 2 : index
    %c0_89 = arith.constant 0 : index
    %133 = vector.load %arg13[%c1_87, %c2_88, %c0_89] : memref<10x10x16xf32, #tpu.memory_space<vmem>>, vector<1x8x16xf32>
    %134 = vector.shape_cast %133 : vector<1x8x16xf32> to vector<8x16xf32>
    %135 = arith.truncf %134 : vector<8x16xf32> to vector<8x16xbf16>
    %136 = vector.extract_strided_slice %45 {offsets = [0, 2, 0, 0], sizes = [1, 1, 16, 32], strides = [1, 1, 1, 1]} : vector<3x3x16x32xbf16> to vector<1x1x16x32xbf16>
    %137 = vector.shape_cast %136 : vector<1x1x16x32xbf16> to vector<16x32xbf16>
    %cst_90 = arith.constant dense<0.000000e+00> : vector<8x32xf32>
    %138 = tpu.matmul %135, %137, %cst_90 {dimension_numbers = #tpu.dot_dimension_numbers<[1], [0], [0], [1], [0, 0, 1, 1], [], []>} : vector<8x16xbf16>, vector<16x32xbf16>, vector<8x32xf32> -> vector<8x32xf32>
    %139 = arith.addf %132, %138 : vector<8x32xf32>
    %c2_91 = arith.constant 2 : index
    %c0_92 = arith.constant 0 : index
    %c0_93 = arith.constant 0 : index
    %140 = vector.load %arg13[%c2_91, %c0_92, %c0_93] : memref<10x10x16xf32, #tpu.memory_space<vmem>>, vector<1x8x16xf32>
    %141 = vector.shape_cast %140 : vector<1x8x16xf32> to vector<8x16xf32>
    %142 = arith.truncf %141 : vector<8x16xf32> to vector<8x16xbf16>
    %143 = vector.extract_strided_slice %45 {offsets = [1, 0, 0, 0], sizes = [1, 1, 16, 32], strides = [1, 1, 1, 1]} : vector<3x3x16x32xbf16> to vector<1x1x16x32xbf16>
    %144 = vector.shape_cast %143 : vector<1x1x16x32xbf16> to vector<16x32xbf16>
    %cst_94 = arith.constant dense<0.000000e+00> : vector<8x32xf32>
    %145 = tpu.matmul %142, %144, %cst_94 {dimension_numbers = #tpu.dot_dimension_numbers<[1], [0], [0], [1], [0, 0, 1, 1], [], []>} : vector<8x16xbf16>, vector<16x32xbf16>, vector<8x32xf32> -> vector<8x32xf32>
    %146 = arith.addf %139, %145 : vector<8x32xf32>
    %c2_95 = arith.constant 2 : index
    %c1_96 = arith.constant 1 : index
    %c0_97 = arith.constant 0 : index
    %147 = vector.load %arg13[%c2_95, %c1_96, %c0_97] : memref<10x10x16xf32, #tpu.memory_space<vmem>>, vector<1x8x16xf32>
    %148 = vector.shape_cast %147 : vector<1x8x16xf32> to vector<8x16xf32>
    %149 = arith.truncf %148 : vector<8x16xf32> to vector<8x16xbf16>
    %150 = vector.extract_strided_slice %45 {offsets = [1, 1, 0, 0], sizes = [1, 1, 16, 32], strides = [1, 1, 1, 1]} : vector<3x3x16x32xbf16> to vector<1x1x16x32xbf16>
    %151 = vector.shape_cast %150 : vector<1x1x16x32xbf16> to vector<16x32xbf16>
    %cst_98 = arith.constant dense<0.000000e+00> : vector<8x32xf32>
    %152 = tpu.matmul %149, %151, %cst_98 {dimension_numbers = #tpu.dot_dimension_numbers<[1], [0], [0], [1], [0, 0, 1, 1], [], []>} : vector<8x16xbf16>, vector<16x32xbf16>, vector<8x32xf32> -> vector<8x32xf32>
    %153 = arith.addf %146, %152 : vector<8x32xf32>
    %c2_99 = arith.constant 2 : index
    %c2_100 = arith.constant 2 : index
    %c0_101 = arith.constant 0 : index
    %154 = vector.load %arg13[%c2_99, %c2_100, %c0_101] : memref<10x10x16xf32, #tpu.memory_space<vmem>>, vector<1x8x16xf32>
    %155 = vector.shape_cast %154 : vector<1x8x16xf32> to vector<8x16xf32>
    %156 = arith.truncf %155 : vector<8x16xf32> to vector<8x16xbf16>
    %157 = vector.extract_strided_slice %45 {offsets = [1, 2, 0, 0], sizes = [1, 1, 16, 32], strides = [1, 1, 1, 1]} : vector<3x3x16x32xbf16> to vector<1x1x16x32xbf16>
    %158 = vector.shape_cast %157 : vector<1x1x16x32xbf16> to vector<16x32xbf16>
    %cst_102 = arith.constant dense<0.000000e+00> : vector<8x32xf32>
    %159 = tpu.matmul %156, %158, %cst_102 {dimension_numbers = #tpu.dot_dimension_numbers<[1], [0], [0], [1], [0, 0, 1, 1], [], []>} : vector<8x16xbf16>, vector<16x32xbf16>, vector<8x32xf32> -> vector<8x32xf32>
    %160 = arith.addf %153, %159 : vector<8x32xf32>
    %c3_103 = arith.constant 3 : index
    %c0_104 = arith.constant 0 : index
    %c0_105 = arith.constant 0 : index
    %161 = vector.load %arg13[%c3_103, %c0_104, %c0_105] : memref<10x10x16xf32, #tpu.memory_space<vmem>>, vector<1x8x16xf32>
    %162 = vector.shape_cast %161 : vector<1x8x16xf32> to vector<8x16xf32>
    %163 = arith.truncf %162 : vector<8x16xf32> to vector<8x16xbf16>
    %164 = vector.extract_strided_slice %45 {offsets = [2, 0, 0, 0], sizes = [1, 1, 16, 32], strides = [1, 1, 1, 1]} : vector<3x3x16x32xbf16> to vector<1x1x16x32xbf16>
    %165 = vector.shape_cast %164 : vector<1x1x16x32xbf16> to vector<16x32xbf16>
    %cst_106 = arith.constant dense<0.000000e+00> : vector<8x32xf32>
    %166 = tpu.matmul %163, %165, %cst_106 {dimension_numbers = #tpu.dot_dimension_numbers<[1], [0], [0], [1], [0, 0, 1, 1], [], []>} : vector<8x16xbf16>, vector<16x32xbf16>, vector<8x32xf32> -> vector<8x32xf32>
    %167 = arith.addf %160, %166 : vector<8x32xf32>
    %c3_107 = arith.constant 3 : index
    %c1_108 = arith.constant 1 : index
    %c0_109 = arith.constant 0 : index
    %168 = vector.load %arg13[%c3_107, %c1_108, %c0_109] : memref<10x10x16xf32, #tpu.memory_space<vmem>>, vector<1x8x16xf32>
    %169 = vector.shape_cast %168 : vector<1x8x16xf32> to vector<8x16xf32>
    %170 = arith.truncf %169 : vector<8x16xf32> to vector<8x16xbf16>
    %171 = vector.extract_strided_slice %45 {offsets = [2, 1, 0, 0], sizes = [1, 1, 16, 32], strides = [1, 1, 1, 1]} : vector<3x3x16x32xbf16> to vector<1x1x16x32xbf16>
    %172 = vector.shape_cast %171 : vector<1x1x16x32xbf16> to vector<16x32xbf16>
    %cst_110 = arith.constant dense<0.000000e+00> : vector<8x32xf32>
    %173 = tpu.matmul %170, %172, %cst_110 {dimension_numbers = #tpu.dot_dimension_numbers<[1], [0], [0], [1], [0, 0, 1, 1], [], []>} : vector<8x16xbf16>, vector<16x32xbf16>, vector<8x32xf32> -> vector<8x32xf32>
    %174 = arith.addf %167, %173 : vector<8x32xf32>
    %c3_111 = arith.constant 3 : index
    %c2_112 = arith.constant 2 : index
    %c0_113 = arith.constant 0 : index
    %175 = vector.load %arg13[%c3_111, %c2_112, %c0_113] : memref<10x10x16xf32, #tpu.memory_space<vmem>>, vector<1x8x16xf32>
    %176 = vector.shape_cast %175 : vector<1x8x16xf32> to vector<8x16xf32>
    %177 = arith.truncf %176 : vector<8x16xf32> to vector<8x16xbf16>
    %178 = vector.extract_strided_slice %45 {offsets = [2, 2, 0, 0], sizes = [1, 1, 16, 32], strides = [1, 1, 1, 1]} : vector<3x3x16x32xbf16> to vector<1x1x16x32xbf16>
    %179 = vector.shape_cast %178 : vector<1x1x16x32xbf16> to vector<16x32xbf16>
    %cst_114 = arith.constant dense<0.000000e+00> : vector<8x32xf32>
    %180 = tpu.matmul %177, %179, %cst_114 {dimension_numbers = #tpu.dot_dimension_numbers<[1], [0], [0], [1], [0, 0, 1, 1], [], []>} : vector<8x16xbf16>, vector<16x32xbf16>, vector<8x32xf32> -> vector<8x32xf32>
    %181 = arith.addf %174, %180 : vector<8x32xf32>
    %182 = vector.broadcast %46 : vector<1x32xf32> to vector<8x32xf32>
    %183 = arith.addf %181, %182 : vector<8x32xf32>
    %cst_115 = arith.constant 0.000000e+00 : f32
    %184 = vector.broadcast %cst_115 : f32 to vector<8x32xf32>
    %185 = arith.maximumf %183, %184 : vector<8x32xf32>
    %c2_116 = arith.constant 2 : index
    %c1_117 = arith.constant 1 : index
    %c0_118 = arith.constant 0 : index
    %186 = vector.load %arg14[%c2_116, %c1_117, %c0_118] : memref<10x10x32xf32, #tpu.memory_space<vmem>>, vector<1x8x32xf32>
    %187 = vector.shape_cast %186 : vector<1x8x32xf32> to vector<8x32xf32>
    %188 = vector.shape_cast %185 : vector<8x32xf32> to vector<1x8x32xf32>
    tpu.vector_store %arg14[%c2_116, %c1_117, %c0_118], %188 {strides = array<i32>} : memref<10x10x32xf32, #tpu.memory_space<vmem>>, vector<1x8x32xf32>,
    %cst_119 = arith.constant 0.000000e+00 : f32
    %189 = vector.broadcast %cst_119 : f32 to vector<8x32xf32>
    %c2_120 = arith.constant 2 : index
    %c0_121 = arith.constant 0 : index
    %c0_122 = arith.constant 0 : index
    %190 = vector.load %arg13[%c2_120, %c0_121, %c0_122] : memref<10x10x16xf32, #tpu.memory_space<vmem>>, vector<1x8x16xf32>
    %191 = vector.shape_cast %190 : vector<1x8x16xf32> to vector<8x16xf32>
    %192 = arith.truncf %191 : vector<8x16xf32> to vector<8x16xbf16>
    %193 = vector.extract_strided_slice %45 {offsets = [0, 0, 0, 0], sizes = [1, 1, 16, 32], strides = [1, 1, 1, 1]} : vector<3x3x16x32xbf16> to vector<1x1x16x32xbf16>
    %194 = vector.shape_cast %193 : vector<1x1x16x32xbf16> to vector<16x32xbf16>
    %cst_123 = arith.constant dense<0.000000e+00> : vector<8x32xf32>
    %195 = tpu.matmul %192, %194, %cst_123 {dimension_numbers = #tpu.dot_dimension_numbers<[1], [0], [0], [1], [0, 0, 1, 1], [], []>} : vector<8x16xbf16>, vector<16x32xbf16>, vector<8x32xf32> -> vector<8x32xf32>
    %196 = arith.addf %189, %195 : vector<8x32xf32>
    %c2_124 = arith.constant 2 : index
    %c1_125 = arith.constant 1 : index
    %c0_126 = arith.constant 0 : index
    %197 = vector.load %arg13[%c2_124, %c1_125, %c0_126] : memref<10x10x16xf32, #tpu.memory_space<vmem>>, vector<1x8x16xf32>
    %198 = vector.shape_cast %197 : vector<1x8x16xf32> to vector<8x16xf32>
    %199 = arith.truncf %198 : vector<8x16xf32> to vector<8x16xbf16>
    %200 = vector.extract_strided_slice %45 {offsets = [0, 1, 0, 0], sizes = [1, 1, 16, 32], strides = [1, 1, 1, 1]} : vector<3x3x16x32xbf16> to vector<1x1x16x32xbf16>
    %201 = vector.shape_cast %200 : vector<1x1x16x32xbf16> to vector<16x32xbf16>
    %cst_127 = arith.constant dense<0.000000e+00> : vector<8x32xf32>
    %202 = tpu.matmul %199, %201, %cst_127 {dimension_numbers = #tpu.dot_dimension_numbers<[1], [0], [0], [1], [0, 0, 1, 1], [], []>} : vector<8x16xbf16>, vector<16x32xbf16>, vector<8x32xf32> -> vector<8x32xf32>
    %203 = arith.addf %196, %202 : vector<8x32xf32>
    %c2_128 = arith.constant 2 : index
    %c2_129 = arith.constant 2 : index
    %c0_130 = arith.constant 0 : index
    %204 = vector.load %arg13[%c2_128, %c2_129, %c0_130] : memref<10x10x16xf32, #tpu.memory_space<vmem>>, vector<1x8x16xf32>
    %205 = vector.shape_cast %204 : vector<1x8x16xf32> to vector<8x16xf32>
    %206 = arith.truncf %205 : vector<8x16xf32> to vector<8x16xbf16>
    %207 = vector.extract_strided_slice %45 {offsets = [0, 2, 0, 0], sizes = [1, 1, 16, 32], strides = [1, 1, 1, 1]} : vector<3x3x16x32xbf16> to vector<1x1x16x32xbf16>
    %208 = vector.shape_cast %207 : vector<1x1x16x32xbf16> to vector<16x32xbf16>
    %cst_131 = arith.constant dense<0.000000e+00> : vector<8x32xf32>
    %209 = tpu.matmul %206, %208, %cst_131 {dimension_numbers = #tpu.dot_dimension_numbers<[1], [0], [0], [1], [0, 0, 1, 1], [], []>} : vector<8x16xbf16>, vector<16x32xbf16>, vector<8x32xf32> -> vector<8x32xf32>
    %210 = arith.addf %203, %209 : vector<8x32xf32>
    %c3_132 = arith.constant 3 : index
    %c0_133 = arith.constant 0 : index
    %c0_134 = arith.constant 0 : index
    %211 = vector.load %arg13[%c3_132, %c0_133, %c0_134] : memref<10x10x16xf32, #tpu.memory_space<vmem>>, vector<1x8x16xf32>
    %212 = vector.shape_cast %211 : vector<1x8x16xf32> to vector<8x16xf32>
    %213 = arith.truncf %212 : vector<8x16xf32> to vector<8x16xbf16>
    %214 = vector.extract_strided_slice %45 {offsets = [1, 0, 0, 0], sizes = [1, 1, 16, 32], strides = [1, 1, 1, 1]} : vector<3x3x16x32xbf16> to vector<1x1x16x32xbf16>
    %215 = vector.shape_cast %214 : vector<1x1x16x32xbf16> to vector<16x32xbf16>
    %cst_135 = arith.constant dense<0.000000e+00> : vector<8x32xf32>
    %216 = tpu.matmul %213, %215, %cst_135 {dimension_numbers = #tpu.dot_dimension_numbers<[1], [0], [0], [1], [0, 0, 1, 1], [], []>} : vector<8x16xbf16>, vector<16x32xbf16>, vector<8x32xf32> -> vector<8x32xf32>
    %217 = arith.addf %210, %216 : vector<8x32xf32>
    %c3_136 = arith.constant 3 : index
    %c1_137 = arith.constant 1 : index
    %c0_138 = arith.constant 0 : index
    %218 = vector.load %arg13[%c3_136, %c1_137, %c0_138] : memref<10x10x16xf32, #tpu.memory_space<vmem>>, vector<1x8x16xf32>
    %219 = vector.shape_cast %218 : vector<1x8x16xf32> to vector<8x16xf32>
    %220 = arith.truncf %219 : vector<8x16xf32> to vector<8x16xbf16>
    %221 = vector.extract_strided_slice %45 {offsets = [1, 1, 0, 0], sizes = [1, 1, 16, 32], strides = [1, 1, 1, 1]} : vector<3x3x16x32xbf16> to vector<1x1x16x32xbf16>
    %222 = vector.shape_cast %221 : vector<1x1x16x32xbf16> to vector<16x32xbf16>
    %cst_139 = arith.constant dense<0.000000e+00> : vector<8x32xf32>
    %223 = tpu.matmul %220, %222, %cst_139 {dimension_numbers = #tpu.dot_dimension_numbers<[1], [0], [0], [1], [0, 0, 1, 1], [], []>} : vector<8x16xbf16>, vector<16x32xbf16>, vector<8x32xf32> -> vector<8x32xf32>
    %224 = arith.addf %217, %223 : vector<8x32xf32>
    %c3_140 = arith.constant 3 : index
    %c2_141 = arith.constant 2 : index
    %c0_142 = arith.constant 0 : index
    %225 = vector.load %arg13[%c3_140, %c2_141, %c0_142] : memref<10x10x16xf32, #tpu.memory_space<vmem>>, vector<1x8x16xf32>
    %226 = vector.shape_cast %225 : vector<1x8x16xf32> to vector<8x16xf32>
    %227 = arith.truncf %226 : vector<8x16xf32> to vector<8x16xbf16>
    %228 = vector.extract_strided_slice %45 {offsets = [1, 2, 0, 0], sizes = [1, 1, 16, 32], strides = [1, 1, 1, 1]} : vector<3x3x16x32xbf16> to vector<1x1x16x32xbf16>
    %229 = vector.shape_cast %228 : vector<1x1x16x32xbf16> to vector<16x32xbf16>
    %cst_143 = arith.constant dense<0.000000e+00> : vector<8x32xf32>
    %230 = tpu.matmul %227, %229, %cst_143 {dimension_numbers = #tpu.dot_dimension_numbers<[1], [0], [0], [1], [0, 0, 1, 1], [], []>} : vector<8x16xbf16>, vector<16x32xbf16>, vector<8x32xf32> -> vector<8x32xf32>
    %231 = arith.addf %224, %230 : vector<8x32xf32>
    %c4_144 = arith.constant 4 : index
    %c0_145 = arith.constant 0 : index
    %c0_146 = arith.constant 0 : index
    %232 = vector.load %arg13[%c4_144, %c0_145, %c0_146] : memref<10x10x16xf32, #tpu.memory_space<vmem>>, vector<1x8x16xf32>
    %233 = vector.shape_cast %232 : vector<1x8x16xf32> to vector<8x16xf32>
    %234 = arith.truncf %233 : vector<8x16xf32> to vector<8x16xbf16>
    %235 = vector.extract_strided_slice %45 {offsets = [2, 0, 0, 0], sizes = [1, 1, 16, 32], strides = [1, 1, 1, 1]} : vector<3x3x16x32xbf16> to vector<1x1x16x32xbf16>
    %236 = vector.shape_cast %235 : vector<1x1x16x32xbf16> to vector<16x32xbf16>
    %cst_147 = arith.constant dense<0.000000e+00> : vector<8x32xf32>
    %237 = tpu.matmul %234, %236, %cst_147 {dimension_numbers = #tpu.dot_dimension_numbers<[1], [0], [0], [1], [0, 0, 1, 1], [], []>} : vector<8x16xbf16>, vector<16x32xbf16>, vector<8x32xf32> -> vector<8x32xf32>
    %238 = arith.addf %231, %237 : vector<8x32xf32>
    %c4_148 = arith.constant 4 : index
    %c1_149 = arith.constant 1 : index
    %c0_150 = arith.constant 0 : index
    %239 = vector.load %arg13[%c4_148, %c1_149, %c0_150] : memref<10x10x16xf32, #tpu.memory_space<vmem>>, vector<1x8x16xf32>
    %240 = vector.shape_cast %239 : vector<1x8x16xf32> to vector<8x16xf32>
    %241 = arith.truncf %240 : vector<8x16xf32> to vector<8x16xbf16>
    %242 = vector.extract_strided_slice %45 {offsets = [2, 1, 0, 0], sizes = [1, 1, 16, 32], strides = [1, 1, 1, 1]} : vector<3x3x16x32xbf16> to vector<1x1x16x32xbf16>
    %243 = vector.shape_cast %242 : vector<1x1x16x32xbf16> to vector<16x32xbf16>
    %cst_151 = arith.constant dense<0.000000e+00> : vector<8x32xf32>
    %244 = tpu.matmul %241, %243, %cst_151 {dimension_numbers = #tpu.dot_dimension_numbers<[1], [0], [0], [1], [0, 0, 1, 1], [], []>} : vector<8x16xbf16>, vector<16x32xbf16>, vector<8x32xf32> -> vector<8x32xf32>
    %245 = arith.addf %238, %244 : vector<8x32xf32>
    %c4_152 = arith.constant 4 : index
    %c2_153 = arith.constant 2 : index
    %c0_154 = arith.constant 0 : index
    %246 = vector.load %arg13[%c4_152, %c2_153, %c0_154] : memref<10x10x16xf32, #tpu.memory_space<vmem>>, vector<1x8x16xf32>
    %247 = vector.shape_cast %246 : vector<1x8x16xf32> to vector<8x16xf32>
    %248 = arith.truncf %247 : vector<8x16xf32> to vector<8x16xbf16>
    %249 = vector.extract_strided_slice %45 {offsets = [2, 2, 0, 0], sizes = [1, 1, 16, 32], strides = [1, 1, 1, 1]} : vector<3x3x16x32xbf16> to vector<1x1x16x32xbf16>
    %250 = vector.shape_cast %249 : vector<1x1x16x32xbf16> to vector<16x32xbf16>
    %cst_155 = arith.constant dense<0.000000e+00> : vector<8x32xf32>
    %251 = tpu.matmul %248, %250, %cst_155 {dimension_numbers = #tpu.dot_dimension_numbers<[1], [0], [0], [1], [0, 0, 1, 1], [], []>} : vector<8x16xbf16>, vector<16x32xbf16>, vector<8x32xf32> -> vector<8x32xf32>
    %252 = arith.addf %245, %251 : vector<8x32xf32>
    %253 = vector.broadcast %46 : vector<1x32xf32> to vector<8x32xf32>
    %254 = arith.addf %252, %253 : vector<8x32xf32>
    %cst_156 = arith.constant 0.000000e+00 : f32
    %255 = vector.broadcast %cst_156 : f32 to vector<8x32xf32>
    %256 = arith.maximumf %254, %255 : vector<8x32xf32>
    %c3_157 = arith.constant 3 : index
    %c1_158 = arith.constant 1 : index
    %c0_159 = arith.constant 0 : index
    %257 = vector.load %arg14[%c3_157, %c1_158, %c0_159] : memref<10x10x32xf32, #tpu.memory_space<vmem>>, vector<1x8x32xf32>
    %258 = vector.shape_cast %257 : vector<1x8x32xf32> to vector<8x32xf32>
    %259 = vector.shape_cast %256 : vector<8x32xf32> to vector<1x8x32xf32>
    tpu.vector_store %arg14[%c3_157, %c1_158, %c0_159], %259 {strides = array<i32>} : memref<10x10x32xf32, #tpu.memory_space<vmem>>, vector<1x8x32xf32>,
    %cst_160 = arith.constant 0.000000e+00 : f32
    %260 = vector.broadcast %cst_160 : f32 to vector<8x32xf32>
    %c3_161 = arith.constant 3 : index
    %c0_162 = arith.constant 0 : index
    %c0_163 = arith.constant 0 : index
    %261 = vector.load %arg13[%c3_161, %c0_162, %c0_163] : memref<10x10x16xf32, #tpu.memory_space<vmem>>, vector<1x8x16xf32>
    %262 = vector.shape_cast %261 : vector<1x8x16xf32> to vector<8x16xf32>
    %263 = arith.truncf %262 : vector<8x16xf32> to vector<8x16xbf16>
    %264 = vector.extract_strided_slice %45 {offsets = [0, 0, 0, 0], sizes = [1, 1, 16, 32], strides = [1, 1, 1, 1]} : vector<3x3x16x32xbf16> to vector<1x1x16x32xbf16>
    %265 = vector.shape_cast %264 : vector<1x1x16x32xbf16> to vector<16x32xbf16>
    %cst_164 = arith.constant dense<0.000000e+00> : vector<8x32xf32>
    %266 = tpu.matmul %263, %265, %cst_164 {dimension_numbers = #tpu.dot_dimension_numbers<[1], [0], [0], [1], [0, 0, 1, 1], [], []>} : vector<8x16xbf16>, vector<16x32xbf16>, vector<8x32xf32> -> vector<8x32xf32>
    %267 = arith.addf %260, %266 : vector<8x32xf32>
    %c3_165 = arith.constant 3 : index
    %c1_166 = arith.constant 1 : index
    %c0_167 = arith.constant 0 : index
    %268 = vector.load %arg13[%c3_165, %c1_166, %c0_167] : memref<10x10x16xf32, #tpu.memory_space<vmem>>, vector<1x8x16xf32>
    %269 = vector.shape_cast %268 : vector<1x8x16xf32> to vector<8x16xf32>
    %270 = arith.truncf %269 : vector<8x16xf32> to vector<8x16xbf16>
    %271 = vector.extract_strided_slice %45 {offsets = [0, 1, 0, 0], sizes = [1, 1, 16, 32], strides = [1, 1, 1, 1]} : vector<3x3x16x32xbf16> to vector<1x1x16x32xbf16>
    %272 = vector.shape_cast %271 : vector<1x1x16x32xbf16> to vector<16x32xbf16>
    %cst_168 = arith.constant dense<0.000000e+00> : vector<8x32xf32>
    %273 = tpu.matmul %270, %272, %cst_168 {dimension_numbers = #tpu.dot_dimension_numbers<[1], [0], [0], [1], [0, 0, 1, 1], [], []>} : vector<8x16xbf16>, vector<16x32xbf16>, vector<8x32xf32> -> vector<8x32xf32>
    %274 = arith.addf %267, %273 : vector<8x32xf32>
    %c3_169 = arith.constant 3 : index
    %c2_170 = arith.constant 2 : index
    %c0_171 = arith.constant 0 : index
    %275 = vector.load %arg13[%c3_169, %c2_170, %c0_171] : memref<10x10x16xf32, #tpu.memory_space<vmem>>, vector<1x8x16xf32>
    %276 = vector.shape_cast %275 : vector<1x8x16xf32> to vector<8x16xf32>
    %277 = arith.truncf %276 : vector<8x16xf32> to vector<8x16xbf16>
    %278 = vector.extract_strided_slice %45 {offsets = [0, 2, 0, 0], sizes = [1, 1, 16, 32], strides = [1, 1, 1, 1]} : vector<3x3x16x32xbf16> to vector<1x1x16x32xbf16>
    %279 = vector.shape_cast %278 : vector<1x1x16x32xbf16> to vector<16x32xbf16>
    %cst_172 = arith.constant dense<0.000000e+00> : vector<8x32xf32>
    %280 = tpu.matmul %277, %279, %cst_172 {dimension_numbers = #tpu.dot_dimension_numbers<[1], [0], [0], [1], [0, 0, 1, 1], [], []>} : vector<8x16xbf16>, vector<16x32xbf16>, vector<8x32xf32> -> vector<8x32xf32>
    %281 = arith.addf %274, %280 : vector<8x32xf32>
    %c4_173 = arith.constant 4 : index
    %c0_174 = arith.constant 0 : index
    %c0_175 = arith.constant 0 : index
    %282 = vector.load %arg13[%c4_173, %c0_174, %c0_175] : memref<10x10x16xf32, #tpu.memory_space<vmem>>, vector<1x8x16xf32>
    %283 = vector.shape_cast %282 : vector<1x8x16xf32> to vector<8x16xf32>
    %284 = arith.truncf %283 : vector<8x16xf32> to vector<8x16xbf16>
    %285 = vector.extract_strided_slice %45 {offsets = [1, 0, 0, 0], sizes = [1, 1, 16, 32], strides = [1, 1, 1, 1]} : vector<3x3x16x32xbf16> to vector<1x1x16x32xbf16>
    %286 = vector.shape_cast %285 : vector<1x1x16x32xbf16> to vector<16x32xbf16>
    %cst_176 = arith.constant dense<0.000000e+00> : vector<8x32xf32>
    %287 = tpu.matmul %284, %286, %cst_176 {dimension_numbers = #tpu.dot_dimension_numbers<[1], [0], [0], [1], [0, 0, 1, 1], [], []>} : vector<8x16xbf16>, vector<16x32xbf16>, vector<8x32xf32> -> vector<8x32xf32>
    %288 = arith.addf %281, %287 : vector<8x32xf32>
    %c4_177 = arith.constant 4 : index
    %c1_178 = arith.constant 1 : index
    %c0_179 = arith.constant 0 : index
    %289 = vector.load %arg13[%c4_177, %c1_178, %c0_179] : memref<10x10x16xf32, #tpu.memory_space<vmem>>, vector<1x8x16xf32>
    %290 = vector.shape_cast %289 : vector<1x8x16xf32> to vector<8x16xf32>
    %291 = arith.truncf %290 : vector<8x16xf32> to vector<8x16xbf16>
    %292 = vector.extract_strided_slice %45 {offsets = [1, 1, 0, 0], sizes = [1, 1, 16, 32], strides = [1, 1, 1, 1]} : vector<3x3x16x32xbf16> to vector<1x1x16x32xbf16>
    %293 = vector.shape_cast %292 : vector<1x1x16x32xbf16> to vector<16x32xbf16>
    %cst_180 = arith.constant dense<0.000000e+00> : vector<8x32xf32>
    %294 = tpu.matmul %291, %293, %cst_180 {dimension_numbers = #tpu.dot_dimension_numbers<[1], [0], [0], [1], [0, 0, 1, 1], [], []>} : vector<8x16xbf16>, vector<16x32xbf16>, vector<8x32xf32> -> vector<8x32xf32>
    %295 = arith.addf %288, %294 : vector<8x32xf32>
    %c4_181 = arith.constant 4 : index
    %c2_182 = arith.constant 2 : index
    %c0_183 = arith.constant 0 : index
    %296 = vector.load %arg13[%c4_181, %c2_182, %c0_183] : memref<10x10x16xf32, #tpu.memory_space<vmem>>, vector<1x8x16xf32>
    %297 = vector.shape_cast %296 : vector<1x8x16xf32> to vector<8x16xf32>
    %298 = arith.truncf %297 : vector<8x16xf32> to vector<8x16xbf16>
    %299 = vector.extract_strided_slice %45 {offsets = [1, 2, 0, 0], sizes = [1, 1, 16, 32], strides = [1, 1, 1, 1]} : vector<3x3x16x32xbf16> to vector<1x1x16x32xbf16>
    %300 = vector.shape_cast %299 : vector<1x1x16x32xbf16> to vector<16x32xbf16>
    %cst_184 = arith.constant dense<0.000000e+00> : vector<8x32xf32>
    %301 = tpu.matmul %298, %300, %cst_184 {dimension_numbers = #tpu.dot_dimension_numbers<[1], [0], [0], [1], [0, 0, 1, 1], [], []>} : vector<8x16xbf16>, vector<16x32xbf16>, vector<8x32xf32> -> vector<8x32xf32>
    %302 = arith.addf %295, %301 : vector<8x32xf32>
    %c5_185 = arith.constant 5 : index
    %c0_186 = arith.constant 0 : index
    %c0_187 = arith.constant 0 : index
    %303 = vector.load %arg13[%c5_185, %c0_186, %c0_187] : memref<10x10x16xf32, #tpu.memory_space<vmem>>, vector<1x8x16xf32>
    %304 = vector.shape_cast %303 : vector<1x8x16xf32> to vector<8x16xf32>
    %305 = arith.truncf %304 : vector<8x16xf32> to vector<8x16xbf16>
    %306 = vector.extract_strided_slice %45 {offsets = [2, 0, 0, 0], sizes = [1, 1, 16, 32], strides = [1, 1, 1, 1]} : vector<3x3x16x32xbf16> to vector<1x1x16x32xbf16>
    %307 = vector.shape_cast %306 : vector<1x1x16x32xbf16> to vector<16x32xbf16>
    %cst_188 = arith.constant dense<0.000000e+00> : vector<8x32xf32>
    %308 = tpu.matmul %305, %307, %cst_188 {dimension_numbers = #tpu.dot_dimension_numbers<[1], [0], [0], [1], [0, 0, 1, 1], [], []>} : vector<8x16xbf16>, vector<16x32xbf16>, vector<8x32xf32> -> vector<8x32xf32>
    %309 = arith.addf %302, %308 : vector<8x32xf32>
    %c5_189 = arith.constant 5 : index
    %c1_190 = arith.constant 1 : index
    %c0_191 = arith.constant 0 : index
    %310 = vector.load %arg13[%c5_189, %c1_190, %c0_191] : memref<10x10x16xf32, #tpu.memory_space<vmem>>, vector<1x8x16xf32>
    %311 = vector.shape_cast %310 : vector<1x8x16xf32> to vector<8x16xf32>
    %312 = arith.truncf %311 : vector<8x16xf32> to vector<8x16xbf16>
    %313 = vector.extract_strided_slice %45 {offsets = [2, 1, 0, 0], sizes = [1, 1, 16, 32], strides = [1, 1, 1, 1]} : vector<3x3x16x32xbf16> to vector<1x1x16x32xbf16>
    %314 = vector.shape_cast %313 : vector<1x1x16x32xbf16> to vector<16x32xbf16>
    %cst_192 = arith.constant dense<0.000000e+00> : vector<8x32xf32>
    %315 = tpu.matmul %312, %314, %cst_192 {dimension_numbers = #tpu.dot_dimension_numbers<[1], [0], [0], [1], [0, 0, 1, 1], [], []>} : vector<8x16xbf16>, vector<16x32xbf16>, vector<8x32xf32> -> vector<8x32xf32>
    %316 = arith.addf %309, %315 : vector<8x32xf32>
    %c5_193 = arith.constant 5 : index
    %c2_194 = arith.constant 2 : index
    %c0_195 = arith.constant 0 : index
    %317 = vector.load %arg13[%c5_193, %c2_194, %c0_195] : memref<10x10x16xf32, #tpu.memory_space<vmem>>, vector<1x8x16xf32>
    %318 = vector.shape_cast %317 : vector<1x8x16xf32> to vector<8x16xf32>
    %319 = arith.truncf %318 : vector<8x16xf32> to vector<8x16xbf16>
    %320 = vector.extract_strided_slice %45 {offsets = [2, 2, 0, 0], sizes = [1, 1, 16, 32], strides = [1, 1, 1, 1]} : vector<3x3x16x32xbf16> to vector<1x1x16x32xbf16>
    %321 = vector.shape_cast %320 : vector<1x1x16x32xbf16> to vector<16x32xbf16>
    %cst_196 = arith.constant dense<0.000000e+00> : vector<8x32xf32>
    %322 = tpu.matmul %319, %321, %cst_196 {dimension_numbers = #tpu.dot_dimension_numbers<[1], [0], [0], [1], [0, 0, 1, 1], [], []>} : vector<8x16xbf16>, vector<16x32xbf16>, vector<8x32xf32> -> vector<8x32xf32>
    %323 = arith.addf %316, %322 : vector<8x32xf32>
    %324 = vector.broadcast %46 : vector<1x32xf32> to vector<8x32xf32>
    %325 = arith.addf %323, %324 : vector<8x32xf32>
    %cst_197 = arith.constant 0.000000e+00 : f32
    %326 = vector.broadcast %cst_197 : f32 to vector<8x32xf32>
    %327 = arith.maximumf %325, %326 : vector<8x32xf32>
    %c4_198 = arith.constant 4 : index
    %c1_199 = arith.constant 1 : index
    %c0_200 = arith.constant 0 : index
    %328 = vector.load %arg14[%c4_198, %c1_199, %c0_200] : memref<10x10x32xf32, #tpu.memory_space<vmem>>, vector<1x8x32xf32>
    %329 = vector.shape_cast %328 : vector<1x8x32xf32> to vector<8x32xf32>
    %330 = vector.shape_cast %327 : vector<8x32xf32> to vector<1x8x32xf32>
    tpu.vector_store %arg14[%c4_198, %c1_199, %c0_200], %330 {strides = array<i32>} : memref<10x10x32xf32, #tpu.memory_space<vmem>>, vector<1x8x32xf32>,
    %cst_201 = arith.constant 0.000000e+00 : f32
    %331 = vector.broadcast %cst_201 : f32 to vector<8x32xf32>
    %c4_202 = arith.constant 4 : index
    %c0_203 = arith.constant 0 : index
    %c0_204 = arith.constant 0 : index
    %332 = vector.load %arg13[%c4_202, %c0_203, %c0_204] : memref<10x10x16xf32, #tpu.memory_space<vmem>>, vector<1x8x16xf32>
    %333 = vector.shape_cast %332 : vector<1x8x16xf32> to vector<8x16xf32>
    %334 = arith.truncf %333 : vector<8x16xf32> to vector<8x16xbf16>
    %335 = vector.extract_strided_slice %45 {offsets = [0, 0, 0, 0], sizes = [1, 1, 16, 32], strides = [1, 1, 1, 1]} : vector<3x3x16x32xbf16> to vector<1x1x16x32xbf16>
    %336 = vector.shape_cast %335 : vector<1x1x16x32xbf16> to vector<16x32xbf16>
    %cst_205 = arith.constant dense<0.000000e+00> : vector<8x32xf32>
    %337 = tpu.matmul %334, %336, %cst_205 {dimension_numbers = #tpu.dot_dimension_numbers<[1], [0], [0], [1], [0, 0, 1, 1], [], []>} : vector<8x16xbf16>, vector<16x32xbf16>, vector<8x32xf32> -> vector<8x32xf32>
    %338 = arith.addf %331, %337 : vector<8x32xf32>
    %c4_206 = arith.constant 4 : index
    %c1_207 = arith.constant 1 : index
    %c0_208 = arith.constant 0 : index
    %339 = vector.load %arg13[%c4_206, %c1_207, %c0_208] : memref<10x10x16xf32, #tpu.memory_space<vmem>>, vector<1x8x16xf32>
    %340 = vector.shape_cast %339 : vector<1x8x16xf32> to vector<8x16xf32>
    %341 = arith.truncf %340 : vector<8x16xf32> to vector<8x16xbf16>
    %342 = vector.extract_strided_slice %45 {offsets = [0, 1, 0, 0], sizes = [1, 1, 16, 32], strides = [1, 1, 1, 1]} : vector<3x3x16x32xbf16> to vector<1x1x16x32xbf16>
    %343 = vector.shape_cast %342 : vector<1x1x16x32xbf16> to vector<16x32xbf16>
    %cst_209 = arith.constant dense<0.000000e+00> : vector<8x32xf32>
    %344 = tpu.matmul %341, %343, %cst_209 {dimension_numbers = #tpu.dot_dimension_numbers<[1], [0], [0], [1], [0, 0, 1, 1], [], []>} : vector<8x16xbf16>, vector<16x32xbf16>, vector<8x32xf32> -> vector<8x32xf32>
    %345 = arith.addf %338, %344 : vector<8x32xf32>
    %c4_210 = arith.constant 4 : index
    %c2_211 = arith.constant 2 : index
    %c0_212 = arith.constant 0 : index
    %346 = vector.load %arg13[%c4_210, %c2_211, %c0_212] : memref<10x10x16xf32, #tpu.memory_space<vmem>>, vector<1x8x16xf32>
    %347 = vector.shape_cast %346 : vector<1x8x16xf32> to vector<8x16xf32>
    %348 = arith.truncf %347 : vector<8x16xf32> to vector<8x16xbf16>
    %349 = vector.extract_strided_slice %45 {offsets = [0, 2, 0, 0], sizes = [1, 1, 16, 32], strides = [1, 1, 1, 1]} : vector<3x3x16x32xbf16> to vector<1x1x16x32xbf16>
    %350 = vector.shape_cast %349 : vector<1x1x16x32xbf16> to vector<16x32xbf16>
    %cst_213 = arith.constant dense<0.000000e+00> : vector<8x32xf32>
    %351 = tpu.matmul %348, %350, %cst_213 {dimension_numbers = #tpu.dot_dimension_numbers<[1], [0], [0], [1], [0, 0, 1, 1], [], []>} : vector<8x16xbf16>, vector<16x32xbf16>, vector<8x32xf32> -> vector<8x32xf32>
    %352 = arith.addf %345, %351 : vector<8x32xf32>
    %c5_214 = arith.constant 5 : index
    %c0_215 = arith.constant 0 : index
    %c0_216 = arith.constant 0 : index
    %353 = vector.load %arg13[%c5_214, %c0_215, %c0_216] : memref<10x10x16xf32, #tpu.memory_space<vmem>>, vector<1x8x16xf32>
    %354 = vector.shape_cast %353 : vector<1x8x16xf32> to vector<8x16xf32>
    %355 = arith.truncf %354 : vector<8x16xf32> to vector<8x16xbf16>
    %356 = vector.extract_strided_slice %45 {offsets = [1, 0, 0, 0], sizes = [1, 1, 16, 32], strides = [1, 1, 1, 1]} : vector<3x3x16x32xbf16> to vector<1x1x16x32xbf16>
    %357 = vector.shape_cast %356 : vector<1x1x16x32xbf16> to vector<16x32xbf16>
    %cst_217 = arith.constant dense<0.000000e+00> : vector<8x32xf32>
    %358 = tpu.matmul %355, %357, %cst_217 {dimension_numbers = #tpu.dot_dimension_numbers<[1], [0], [0], [1], [0, 0, 1, 1], [], []>} : vector<8x16xbf16>, vector<16x32xbf16>, vector<8x32xf32> -> vector<8x32xf32>
    %359 = arith.addf %352, %358 : vector<8x32xf32>
    %c5_218 = arith.constant 5 : index
    %c1_219 = arith.constant 1 : index
    %c0_220 = arith.constant 0 : index
    %360 = vector.load %arg13[%c5_218, %c1_219, %c0_220] : memref<10x10x16xf32, #tpu.memory_space<vmem>>, vector<1x8x16xf32>
    %361 = vector.shape_cast %360 : vector<1x8x16xf32> to vector<8x16xf32>
    %362 = arith.truncf %361 : vector<8x16xf32> to vector<8x16xbf16>
    %363 = vector.extract_strided_slice %45 {offsets = [1, 1, 0, 0], sizes = [1, 1, 16, 32], strides = [1, 1, 1, 1]} : vector<3x3x16x32xbf16> to vector<1x1x16x32xbf16>
    %364 = vector.shape_cast %363 : vector<1x1x16x32xbf16> to vector<16x32xbf16>
    %cst_221 = arith.constant dense<0.000000e+00> : vector<8x32xf32>
    %365 = tpu.matmul %362, %364, %cst_221 {dimension_numbers = #tpu.dot_dimension_numbers<[1], [0], [0], [1], [0, 0, 1, 1], [], []>} : vector<8x16xbf16>, vector<16x32xbf16>, vector<8x32xf32> -> vector<8x32xf32>
    %366 = arith.addf %359, %365 : vector<8x32xf32>
    %c5_222 = arith.constant 5 : index
    %c2_223 = arith.constant 2 : index
    %c0_224 = arith.constant 0 : index
    %367 = vector.load %arg13[%c5_222, %c2_223, %c0_224] : memref<10x10x16xf32, #tpu.memory_space<vmem>>, vector<1x8x16xf32>
    %368 = vector.shape_cast %367 : vector<1x8x16xf32> to vector<8x16xf32>
    %369 = arith.truncf %368 : vector<8x16xf32> to vector<8x16xbf16>
    %370 = vector.extract_strided_slice %45 {offsets = [1, 2, 0, 0], sizes = [1, 1, 16, 32], strides = [1, 1, 1, 1]} : vector<3x3x16x32xbf16> to vector<1x1x16x32xbf16>
    %371 = vector.shape_cast %370 : vector<1x1x16x32xbf16> to vector<16x32xbf16>
    %cst_225 = arith.constant dense<0.000000e+00> : vector<8x32xf32>
    %372 = tpu.matmul %369, %371, %cst_225 {dimension_numbers = #tpu.dot_dimension_numbers<[1], [0], [0], [1], [0, 0, 1, 1], [], []>} : vector<8x16xbf16>, vector<16x32xbf16>, vector<8x32xf32> -> vector<8x32xf32>
    %373 = arith.addf %366, %372 : vector<8x32xf32>
    %c6_226 = arith.constant 6 : index
    %c0_227 = arith.constant 0 : index
    %c0_228 = arith.constant 0 : index
    %374 = vector.load %arg13[%c6_226, %c0_227, %c0_228] : memref<10x10x16xf32, #tpu.memory_space<vmem>>, vector<1x8x16xf32>
    %375 = vector.shape_cast %374 : vector<1x8x16xf32> to vector<8x16xf32>
    %376 = arith.truncf %375 : vector<8x16xf32> to vector<8x16xbf16>
    %377 = vector.extract_strided_slice %45 {offsets = [2, 0, 0, 0], sizes = [1, 1, 16, 32], strides = [1, 1, 1, 1]} : vector<3x3x16x32xbf16> to vector<1x1x16x32xbf16>
    %378 = vector.shape_cast %377 : vector<1x1x16x32xbf16> to vector<16x32xbf16>
    %cst_229 = arith.constant dense<0.000000e+00> : vector<8x32xf32>
    %379 = tpu.matmul %376, %378, %cst_229 {dimension_numbers = #tpu.dot_dimension_numbers<[1], [0], [0], [1], [0, 0, 1, 1], [], []>} : vector<8x16xbf16>, vector<16x32xbf16>, vector<8x32xf32> -> vector<8x32xf32>
    %380 = arith.addf %373, %379 : vector<8x32xf32>
    %c6_230 = arith.constant 6 : index
    %c1_231 = arith.constant 1 : index
    %c0_232 = arith.constant 0 : index
    %381 = vector.load %arg13[%c6_230, %c1_231, %c0_232] : memref<10x10x16xf32, #tpu.memory_space<vmem>>, vector<1x8x16xf32>
    %382 = vector.shape_cast %381 : vector<1x8x16xf32> to vector<8x16xf32>
    %383 = arith.truncf %382 : vector<8x16xf32> to vector<8x16xbf16>
    %384 = vector.extract_strided_slice %45 {offsets = [2, 1, 0, 0], sizes = [1, 1, 16, 32], strides = [1, 1, 1, 1]} : vector<3x3x16x32xbf16> to vector<1x1x16x32xbf16>
    %385 = vector.shape_cast %384 : vector<1x1x16x32xbf16> to vector<16x32xbf16>
    %cst_233 = arith.constant dense<0.000000e+00> : vector<8x32xf32>
    %386 = tpu.matmul %383, %385, %cst_233 {dimension_numbers = #tpu.dot_dimension_numbers<[1], [0], [0], [1], [0, 0, 1, 1], [], []>} : vector<8x16xbf16>, vector<16x32xbf16>, vector<8x32xf32> -> vector<8x32xf32>
    %387 = arith.addf %380, %386 : vector<8x32xf32>
    %c6_234 = arith.constant 6 : index
    %c2_235 = arith.constant 2 : index
    %c0_236 = arith.constant 0 : index
    %388 = vector.load %arg13[%c6_234, %c2_235, %c0_236] : memref<10x10x16xf32, #tpu.memory_space<vmem>>, vector<1x8x16xf32>
    %389 = vector.shape_cast %388 : vector<1x8x16xf32> to vector<8x16xf32>
    %390 = arith.truncf %389 : vector<8x16xf32> to vector<8x16xbf16>
    %391 = vector.extract_strided_slice %45 {offsets = [2, 2, 0, 0], sizes = [1, 1, 16, 32], strides = [1, 1, 1, 1]} : vector<3x3x16x32xbf16> to vector<1x1x16x32xbf16>
    %392 = vector.shape_cast %391 : vector<1x1x16x32xbf16> to vector<16x32xbf16>
    %cst_237 = arith.constant dense<0.000000e+00> : vector<8x32xf32>
    %393 = tpu.matmul %390, %392, %cst_237 {dimension_numbers = #tpu.dot_dimension_numbers<[1], [0], [0], [1], [0, 0, 1, 1], [], []>} : vector<8x16xbf16>, vector<16x32xbf16>, vector<8x32xf32> -> vector<8x32xf32>
    %394 = arith.addf %387, %393 : vector<8x32xf32>
    %395 = vector.broadcast %46 : vector<1x32xf32> to vector<8x32xf32>
    %396 = arith.addf %394, %395 : vector<8x32xf32>
    %cst_238 = arith.constant 0.000000e+00 : f32
    %397 = vector.broadcast %cst_238 : f32 to vector<8x32xf32>
    %398 = arith.maximumf %396, %397 : vector<8x32xf32>
    %c5_239 = arith.constant 5 : index
    %c1_240 = arith.constant 1 : index
    %c0_241 = arith.constant 0 : index
    %399 = vector.load %arg14[%c5_239, %c1_240, %c0_241] : memref<10x10x32xf32, #tpu.memory_space<vmem>>, vector<1x8x32xf32>
    %400 = vector.shape_cast %399 : vector<1x8x32xf32> to vector<8x32xf32>
    %401 = vector.shape_cast %398 : vector<8x32xf32> to vector<1x8x32xf32>
    tpu.vector_store %arg14[%c5_239, %c1_240, %c0_241], %401 {strides = array<i32>} : memref<10x10x32xf32, #tpu.memory_space<vmem>>, vector<1x8x32xf32>,
    %cst_242 = arith.constant 0.000000e+00 : f32
    %402 = vector.broadcast %cst_242 : f32 to vector<8x32xf32>
    %c5_243 = arith.constant 5 : index
    %c0_244 = arith.constant 0 : index
    %c0_245 = arith.constant 0 : index
    %403 = vector.load %arg13[%c5_243, %c0_244, %c0_245] : memref<10x10x16xf32, #tpu.memory_space<vmem>>, vector<1x8x16xf32>
    %404 = vector.shape_cast %403 : vector<1x8x16xf32> to vector<8x16xf32>
    %405 = arith.truncf %404 : vector<8x16xf32> to vector<8x16xbf16>
    %406 = vector.extract_strided_slice %45 {offsets = [0, 0, 0, 0], sizes = [1, 1, 16, 32], strides = [1, 1, 1, 1]} : vector<3x3x16x32xbf16> to vector<1x1x16x32xbf16>
    %407 = vector.shape_cast %406 : vector<1x1x16x32xbf16> to vector<16x32xbf16>
    %cst_246 = arith.constant dense<0.000000e+00> : vector<8x32xf32>
    %408 = tpu.matmul %405, %407, %cst_246 {dimension_numbers = #tpu.dot_dimension_numbers<[1], [0], [0], [1], [0, 0, 1, 1], [], []>} : vector<8x16xbf16>, vector<16x32xbf16>, vector<8x32xf32> -> vector<8x32xf32>
    %409 = arith.addf %402, %408 : vector<8x32xf32>
    %c5_247 = arith.constant 5 : index
    %c1_248 = arith.constant 1 : index
    %c0_249 = arith.constant 0 : index
    %410 = vector.load %arg13[%c5_247, %c1_248, %c0_249] : memref<10x10x16xf32, #tpu.memory_space<vmem>>, vector<1x8x16xf32>
    %411 = vector.shape_cast %410 : vector<1x8x16xf32> to vector<8x16xf32>
    %412 = arith.truncf %411 : vector<8x16xf32> to vector<8x16xbf16>
    %413 = vector.extract_strided_slice %45 {offsets = [0, 1, 0, 0], sizes = [1, 1, 16, 32], strides = [1, 1, 1, 1]} : vector<3x3x16x32xbf16> to vector<1x1x16x32xbf16>
    %414 = vector.shape_cast %413 : vector<1x1x16x32xbf16> to vector<16x32xbf16>
    %cst_250 = arith.constant dense<0.000000e+00> : vector<8x32xf32>
    %415 = tpu.matmul %412, %414, %cst_250 {dimension_numbers = #tpu.dot_dimension_numbers<[1], [0], [0], [1], [0, 0, 1, 1], [], []>} : vector<8x16xbf16>, vector<16x32xbf16>, vector<8x32xf32> -> vector<8x32xf32>
    %416 = arith.addf %409, %415 : vector<8x32xf32>
    %c5_251 = arith.constant 5 : index
    %c2_252 = arith.constant 2 : index
    %c0_253 = arith.constant 0 : index
    %417 = vector.load %arg13[%c5_251, %c2_252, %c0_253] : memref<10x10x16xf32, #tpu.memory_space<vmem>>, vector<1x8x16xf32>
    %418 = vector.shape_cast %417 : vector<1x8x16xf32> to vector<8x16xf32>
    %419 = arith.truncf %418 : vector<8x16xf32> to vector<8x16xbf16>
    %420 = vector.extract_strided_slice %45 {offsets = [0, 2, 0, 0], sizes = [1, 1, 16, 32], strides = [1, 1, 1, 1]} : vector<3x3x16x32xbf16> to vector<1x1x16x32xbf16>
    %421 = vector.shape_cast %420 : vector<1x1x16x32xbf16> to vector<16x32xbf16>
    %cst_254 = arith.constant dense<0.000000e+00> : vector<8x32xf32>
    %422 = tpu.matmul %419, %421, %cst_254 {dimension_numbers = #tpu.dot_dimension_numbers<[1], [0], [0], [1], [0, 0, 1, 1], [], []>} : vector<8x16xbf16>, vector<16x32xbf16>, vector<8x32xf32> -> vector<8x32xf32>
    %423 = arith.addf %416, %422 : vector<8x32xf32>
    %c6_255 = arith.constant 6 : index
    %c0_256 = arith.constant 0 : index
    %c0_257 = arith.constant 0 : index
    %424 = vector.load %arg13[%c6_255, %c0_256, %c0_257] : memref<10x10x16xf32, #tpu.memory_space<vmem>>, vector<1x8x16xf32>
    %425 = vector.shape_cast %424 : vector<1x8x16xf32> to vector<8x16xf32>
    %426 = arith.truncf %425 : vector<8x16xf32> to vector<8x16xbf16>
    %427 = vector.extract_strided_slice %45 {offsets = [1, 0, 0, 0], sizes = [1, 1, 16, 32], strides = [1, 1, 1, 1]} : vector<3x3x16x32xbf16> to vector<1x1x16x32xbf16>
    %428 = vector.shape_cast %427 : vector<1x1x16x32xbf16> to vector<16x32xbf16>
    %cst_258 = arith.constant dense<0.000000e+00> : vector<8x32xf32>
    %429 = tpu.matmul %426, %428, %cst_258 {dimension_numbers = #tpu.dot_dimension_numbers<[1], [0], [0], [1], [0, 0, 1, 1], [], []>} : vector<8x16xbf16>, vector<16x32xbf16>, vector<8x32xf32> -> vector<8x32xf32>
    %430 = arith.addf %423, %429 : vector<8x32xf32>
    %c6_259 = arith.constant 6 : index
    %c1_260 = arith.constant 1 : index
    %c0_261 = arith.constant 0 : index
    %431 = vector.load %arg13[%c6_259, %c1_260, %c0_261] : memref<10x10x16xf32, #tpu.memory_space<vmem>>, vector<1x8x16xf32>
    %432 = vector.shape_cast %431 : vector<1x8x16xf32> to vector<8x16xf32>
    %433 = arith.truncf %432 : vector<8x16xf32> to vector<8x16xbf16>
    %434 = vector.extract_strided_slice %45 {offsets = [1, 1, 0, 0], sizes = [1, 1, 16, 32], strides = [1, 1, 1, 1]} : vector<3x3x16x32xbf16> to vector<1x1x16x32xbf16>
    %435 = vector.shape_cast %434 : vector<1x1x16x32xbf16> to vector<16x32xbf16>
    %cst_262 = arith.constant dense<0.000000e+00> : vector<8x32xf32>
    %436 = tpu.matmul %433, %435, %cst_262 {dimension_numbers = #tpu.dot_dimension_numbers<[1], [0], [0], [1], [0, 0, 1, 1], [], []>} : vector<8x16xbf16>, vector<16x32xbf16>, vector<8x32xf32> -> vector<8x32xf32>
    %437 = arith.addf %430, %436 : vector<8x32xf32>
    %c6_263 = arith.constant 6 : index
    %c2_264 = arith.constant 2 : index
    %c0_265 = arith.constant 0 : index
    %438 = vector.load %arg13[%c6_263, %c2_264, %c0_265] : memref<10x10x16xf32, #tpu.memory_space<vmem>>, vector<1x8x16xf32>
    %439 = vector.shape_cast %438 : vector<1x8x16xf32> to vector<8x16xf32>
    %440 = arith.truncf %439 : vector<8x16xf32> to vector<8x16xbf16>
    %441 = vector.extract_strided_slice %45 {offsets = [1, 2, 0, 0], sizes = [1, 1, 16, 32], strides = [1, 1, 1, 1]} : vector<3x3x16x32xbf16> to vector<1x1x16x32xbf16>
    %442 = vector.shape_cast %441 : vector<1x1x16x32xbf16> to vector<16x32xbf16>
    %cst_266 = arith.constant dense<0.000000e+00> : vector<8x32xf32>
    %443 = tpu.matmul %440, %442, %cst_266 {dimension_numbers = #tpu.dot_dimension_numbers<[1], [0], [0], [1], [0, 0, 1, 1], [], []>} : vector<8x16xbf16>, vector<16x32xbf16>, vector<8x32xf32> -> vector<8x32xf32>
    %444 = arith.addf %437, %443 : vector<8x32xf32>
    %c7_267 = arith.constant 7 : index
    %c0_268 = arith.constant 0 : index
    %c0_269 = arith.constant 0 : index
    %445 = vector.load %arg13[%c7_267, %c0_268, %c0_269] : memref<10x10x16xf32, #tpu.memory_space<vmem>>, vector<1x8x16xf32>
    %446 = vector.shape_cast %445 : vector<1x8x16xf32> to vector<8x16xf32>
    %447 = arith.truncf %446 : vector<8x16xf32> to vector<8x16xbf16>
    %448 = vector.extract_strided_slice %45 {offsets = [2, 0, 0, 0], sizes = [1, 1, 16, 32], strides = [1, 1, 1, 1]} : vector<3x3x16x32xbf16> to vector<1x1x16x32xbf16>
    %449 = vector.shape_cast %448 : vector<1x1x16x32xbf16> to vector<16x32xbf16>
    %cst_270 = arith.constant dense<0.000000e+00> : vector<8x32xf32>
    %450 = tpu.matmul %447, %449, %cst_270 {dimension_numbers = #tpu.dot_dimension_numbers<[1], [0], [0], [1], [0, 0, 1, 1], [], []>} : vector<8x16xbf16>, vector<16x32xbf16>, vector<8x32xf32> -> vector<8x32xf32>
    %451 = arith.addf %444, %450 : vector<8x32xf32>
    %c7_271 = arith.constant 7 : index
    %c1_272 = arith.constant 1 : index
    %c0_273 = arith.constant 0 : index
    %452 = vector.load %arg13[%c7_271, %c1_272, %c0_273] : memref<10x10x16xf32, #tpu.memory_space<vmem>>, vector<1x8x16xf32>
    %453 = vector.shape_cast %452 : vector<1x8x16xf32> to vector<8x16xf32>
    %454 = arith.truncf %453 : vector<8x16xf32> to vector<8x16xbf16>
    %455 = vector.extract_strided_slice %45 {offsets = [2, 1, 0, 0], sizes = [1, 1, 16, 32], strides = [1, 1, 1, 1]} : vector<3x3x16x32xbf16> to vector<1x1x16x32xbf16>
    %456 = vector.shape_cast %455 : vector<1x1x16x32xbf16> to vector<16x32xbf16>
    %cst_274 = arith.constant dense<0.000000e+00> : vector<8x32xf32>
    %457 = tpu.matmul %454, %456, %cst_274 {dimension_numbers = #tpu.dot_dimension_numbers<[1], [0], [0], [1], [0, 0, 1, 1], [], []>} : vector<8x16xbf16>, vector<16x32xbf16>, vector<8x32xf32> -> vector<8x32xf32>
    %458 = arith.addf %451, %457 : vector<8x32xf32>
    %c7_275 = arith.constant 7 : index
    %c2_276 = arith.constant 2 : index
    %c0_277 = arith.constant 0 : index
    %459 = vector.load %arg13[%c7_275, %c2_276, %c0_277] : memref<10x10x16xf32, #tpu.memory_space<vmem>>, vector<1x8x16xf32>
    %460 = vector.shape_cast %459 : vector<1x8x16xf32> to vector<8x16xf32>
    %461 = arith.truncf %460 : vector<8x16xf32> to vector<8x16xbf16>
    %462 = vector.extract_strided_slice %45 {offsets = [2, 2, 0, 0], sizes = [1, 1, 16, 32], strides = [1, 1, 1, 1]} : vector<3x3x16x32xbf16> to vector<1x1x16x32xbf16>
    %463 = vector.shape_cast %462 : vector<1x1x16x32xbf16> to vector<16x32xbf16>
    %cst_278 = arith.constant dense<0.000000e+00> : vector<8x32xf32>
    %464 = tpu.matmul %461, %463, %cst_278 {dimension_numbers = #tpu.dot_dimension_numbers<[1], [0], [0], [1], [0, 0, 1, 1], [], []>} : vector<8x16xbf16>, vector<16x32xbf16>, vector<8x32xf32> -> vector<8x32xf32>
    %465 = arith.addf %458, %464 : vector<8x32xf32>
    %466 = vector.broadcast %46 : vector<1x32xf32> to vector<8x32xf32>
    %467 = arith.addf %465, %466 : vector<8x32xf32>
    %cst_279 = arith.constant 0.000000e+00 : f32
    %468 = vector.broadcast %cst_279 : f32 to vector<8x32xf32>
    %469 = arith.maximumf %467, %468 : vector<8x32xf32>
    %c6_280 = arith.constant 6 : index
    %c1_281 = arith.constant 1 : index
    %c0_282 = arith.constant 0 : index
    %470 = vector.load %arg14[%c6_280, %c1_281, %c0_282] : memref<10x10x32xf32, #tpu.memory_space<vmem>>, vector<1x8x32xf32>
    %471 = vector.shape_cast %470 : vector<1x8x32xf32> to vector<8x32xf32>
    %472 = vector.shape_cast %469 : vector<8x32xf32> to vector<1x8x32xf32>
    tpu.vector_store %arg14[%c6_280, %c1_281, %c0_282], %472 {strides = array<i32>} : memref<10x10x32xf32, #tpu.memory_space<vmem>>, vector<1x8x32xf32>,
    %cst_283 = arith.constant 0.000000e+00 : f32
    %473 = vector.broadcast %cst_283 : f32 to vector<8x32xf32>
    %c6_284 = arith.constant 6 : index
    %c0_285 = arith.constant 0 : index
    %c0_286 = arith.constant 0 : index
    %474 = vector.load %arg13[%c6_284, %c0_285, %c0_286] : memref<10x10x16xf32, #tpu.memory_space<vmem>>, vector<1x8x16xf32>
    %475 = vector.shape_cast %474 : vector<1x8x16xf32> to vector<8x16xf32>
    %476 = arith.truncf %475 : vector<8x16xf32> to vector<8x16xbf16>
    %477 = vector.extract_strided_slice %45 {offsets = [0, 0, 0, 0], sizes = [1, 1, 16, 32], strides = [1, 1, 1, 1]} : vector<3x3x16x32xbf16> to vector<1x1x16x32xbf16>
    %478 = vector.shape_cast %477 : vector<1x1x16x32xbf16> to vector<16x32xbf16>
    %cst_287 = arith.constant dense<0.000000e+00> : vector<8x32xf32>
    %479 = tpu.matmul %476, %478, %cst_287 {dimension_numbers = #tpu.dot_dimension_numbers<[1], [0], [0], [1], [0, 0, 1, 1], [], []>} : vector<8x16xbf16>, vector<16x32xbf16>, vector<8x32xf32> -> vector<8x32xf32>
    %480 = arith.addf %473, %479 : vector<8x32xf32>
    %c6_288 = arith.constant 6 : index
    %c1_289 = arith.constant 1 : index
    %c0_290 = arith.constant 0 : index
    %481 = vector.load %arg13[%c6_288, %c1_289, %c0_290] : memref<10x10x16xf32, #tpu.memory_space<vmem>>, vector<1x8x16xf32>
    %482 = vector.shape_cast %481 : vector<1x8x16xf32> to vector<8x16xf32>
    %483 = arith.truncf %482 : vector<8x16xf32> to vector<8x16xbf16>
    %484 = vector.extract_strided_slice %45 {offsets = [0, 1, 0, 0], sizes = [1, 1, 16, 32], strides = [1, 1, 1, 1]} : vector<3x3x16x32xbf16> to vector<1x1x16x32xbf16>
    %485 = vector.shape_cast %484 : vector<1x1x16x32xbf16> to vector<16x32xbf16>
    %cst_291 = arith.constant dense<0.000000e+00> : vector<8x32xf32>
    %486 = tpu.matmul %483, %485, %cst_291 {dimension_numbers = #tpu.dot_dimension_numbers<[1], [0], [0], [1], [0, 0, 1, 1], [], []>} : vector<8x16xbf16>, vector<16x32xbf16>, vector<8x32xf32> -> vector<8x32xf32>
    %487 = arith.addf %480, %486 : vector<8x32xf32>
    %c6_292 = arith.constant 6 : index
    %c2_293 = arith.constant 2 : index
    %c0_294 = arith.constant 0 : index
    %488 = vector.load %arg13[%c6_292, %c2_293, %c0_294] : memref<10x10x16xf32, #tpu.memory_space<vmem>>, vector<1x8x16xf32>
    %489 = vector.shape_cast %488 : vector<1x8x16xf32> to vector<8x16xf32>
    %490 = arith.truncf %489 : vector<8x16xf32> to vector<8x16xbf16>
    %491 = vector.extract_strided_slice %45 {offsets = [0, 2, 0, 0], sizes = [1, 1, 16, 32], strides = [1, 1, 1, 1]} : vector<3x3x16x32xbf16> to vector<1x1x16x32xbf16>
    %492 = vector.shape_cast %491 : vector<1x1x16x32xbf16> to vector<16x32xbf16>
    %cst_295 = arith.constant dense<0.000000e+00> : vector<8x32xf32>
    %493 = tpu.matmul %490, %492, %cst_295 {dimension_numbers = #tpu.dot_dimension_numbers<[1], [0], [0], [1], [0, 0, 1, 1], [], []>} : vector<8x16xbf16>, vector<16x32xbf16>, vector<8x32xf32> -> vector<8x32xf32>
    %494 = arith.addf %487, %493 : vector<8x32xf32>
    %c7_296 = arith.constant 7 : index
    %c0_297 = arith.constant 0 : index
    %c0_298 = arith.constant 0 : index
    %495 = vector.load %arg13[%c7_296, %c0_297, %c0_298] : memref<10x10x16xf32, #tpu.memory_space<vmem>>, vector<1x8x16xf32>
    %496 = vector.shape_cast %495 : vector<1x8x16xf32> to vector<8x16xf32>
    %497 = arith.truncf %496 : vector<8x16xf32> to vector<8x16xbf16>
    %498 = vector.extract_strided_slice %45 {offsets = [1, 0, 0, 0], sizes = [1, 1, 16, 32], strides = [1, 1, 1, 1]} : vector<3x3x16x32xbf16> to vector<1x1x16x32xbf16>
    %499 = vector.shape_cast %498 : vector<1x1x16x32xbf16> to vector<16x32xbf16>
    %cst_299 = arith.constant dense<0.000000e+00> : vector<8x32xf32>
    %500 = tpu.matmul %497, %499, %cst_299 {dimension_numbers = #tpu.dot_dimension_numbers<[1], [0], [0], [1], [0, 0, 1, 1], [], []>} : vector<8x16xbf16>, vector<16x32xbf16>, vector<8x32xf32> -> vector<8x32xf32>
    %501 = arith.addf %494, %500 : vector<8x32xf32>
    %c7_300 = arith.constant 7 : index
    %c1_301 = arith.constant 1 : index
    %c0_302 = arith.constant 0 : index
    %502 = vector.load %arg13[%c7_300, %c1_301, %c0_302] : memref<10x10x16xf32, #tpu.memory_space<vmem>>, vector<1x8x16xf32>
    %503 = vector.shape_cast %502 : vector<1x8x16xf32> to vector<8x16xf32>
    %504 = arith.truncf %503 : vector<8x16xf32> to vector<8x16xbf16>
    %505 = vector.extract_strided_slice %45 {offsets = [1, 1, 0, 0], sizes = [1, 1, 16, 32], strides = [1, 1, 1, 1]} : vector<3x3x16x32xbf16> to vector<1x1x16x32xbf16>
    %506 = vector.shape_cast %505 : vector<1x1x16x32xbf16> to vector<16x32xbf16>
    %cst_303 = arith.constant dense<0.000000e+00> : vector<8x32xf32>
    %507 = tpu.matmul %504, %506, %cst_303 {dimension_numbers = #tpu.dot_dimension_numbers<[1], [0], [0], [1], [0, 0, 1, 1], [], []>} : vector<8x16xbf16>, vector<16x32xbf16>, vector<8x32xf32> -> vector<8x32xf32>
    %508 = arith.addf %501, %507 : vector<8x32xf32>
    %c7_304 = arith.constant 7 : index
    %c2_305 = arith.constant 2 : index
    %c0_306 = arith.constant 0 : index
    %509 = vector.load %arg13[%c7_304, %c2_305, %c0_306] : memref<10x10x16xf32, #tpu.memory_space<vmem>>, vector<1x8x16xf32>
    %510 = vector.shape_cast %509 : vector<1x8x16xf32> to vector<8x16xf32>
    %511 = arith.truncf %510 : vector<8x16xf32> to vector<8x16xbf16>
    %512 = vector.extract_strided_slice %45 {offsets = [1, 2, 0, 0], sizes = [1, 1, 16, 32], strides = [1, 1, 1, 1]} : vector<3x3x16x32xbf16> to vector<1x1x16x32xbf16>
    %513 = vector.shape_cast %512 : vector<1x1x16x32xbf16> to vector<16x32xbf16>
    %cst_307 = arith.constant dense<0.000000e+00> : vector<8x32xf32>
    %514 = tpu.matmul %511, %513, %cst_307 {dimension_numbers = #tpu.dot_dimension_numbers<[1], [0], [0], [1], [0, 0, 1, 1], [], []>} : vector<8x16xbf16>, vector<16x32xbf16>, vector<8x32xf32> -> vector<8x32xf32>
    %515 = arith.addf %508, %514 : vector<8x32xf32>
    %c8_308 = arith.constant 8 : index
    %c0_309 = arith.constant 0 : index
    %c0_310 = arith.constant 0 : index
    %516 = vector.load %arg13[%c8_308, %c0_309, %c0_310] : memref<10x10x16xf32, #tpu.memory_space<vmem>>, vector<1x8x16xf32>
    %517 = vector.shape_cast %516 : vector<1x8x16xf32> to vector<8x16xf32>
    %518 = arith.truncf %517 : vector<8x16xf32> to vector<8x16xbf16>
    %519 = vector.extract_strided_slice %45 {offsets = [2, 0, 0, 0], sizes = [1, 1, 16, 32], strides = [1, 1, 1, 1]} : vector<3x3x16x32xbf16> to vector<1x1x16x32xbf16>
    %520 = vector.shape_cast %519 : vector<1x1x16x32xbf16> to vector<16x32xbf16>
    %cst_311 = arith.constant dense<0.000000e+00> : vector<8x32xf32>
    %521 = tpu.matmul %518, %520, %cst_311 {dimension_numbers = #tpu.dot_dimension_numbers<[1], [0], [0], [1], [0, 0, 1, 1], [], []>} : vector<8x16xbf16>, vector<16x32xbf16>, vector<8x32xf32> -> vector<8x32xf32>
    %522 = arith.addf %515, %521 : vector<8x32xf32>
    %c8_312 = arith.constant 8 : index
    %c1_313 = arith.constant 1 : index
    %c0_314 = arith.constant 0 : index
    %523 = vector.load %arg13[%c8_312, %c1_313, %c0_314] : memref<10x10x16xf32, #tpu.memory_space<vmem>>, vector<1x8x16xf32>
    %524 = vector.shape_cast %523 : vector<1x8x16xf32> to vector<8x16xf32>
    %525 = arith.truncf %524 : vector<8x16xf32> to vector<8x16xbf16>
    %526 = vector.extract_strided_slice %45 {offsets = [2, 1, 0, 0], sizes = [1, 1, 16, 32], strides = [1, 1, 1, 1]} : vector<3x3x16x32xbf16> to vector<1x1x16x32xbf16>
    %527 = vector.shape_cast %526 : vector<1x1x16x32xbf16> to vector<16x32xbf16>
    %cst_315 = arith.constant dense<0.000000e+00> : vector<8x32xf32>
    %528 = tpu.matmul %525, %527, %cst_315 {dimension_numbers = #tpu.dot_dimension_numbers<[1], [0], [0], [1], [0, 0, 1, 1], [], []>} : vector<8x16xbf16>, vector<16x32xbf16>, vector<8x32xf32> -> vector<8x32xf32>
    %529 = arith.addf %522, %528 : vector<8x32xf32>
    %c8_316 = arith.constant 8 : index
    %c2_317 = arith.constant 2 : index
    %c0_318 = arith.constant 0 : index
    %530 = vector.load %arg13[%c8_316, %c2_317, %c0_318] : memref<10x10x16xf32, #tpu.memory_space<vmem>>, vector<1x8x16xf32>
    %531 = vector.shape_cast %530 : vector<1x8x16xf32> to vector<8x16xf32>
    %532 = arith.truncf %531 : vector<8x16xf32> to vector<8x16xbf16>
    %533 = vector.extract_strided_slice %45 {offsets = [2, 2, 0, 0], sizes = [1, 1, 16, 32], strides = [1, 1, 1, 1]} : vector<3x3x16x32xbf16> to vector<1x1x16x32xbf16>
    %534 = vector.shape_cast %533 : vector<1x1x16x32xbf16> to vector<16x32xbf16>
    %cst_319 = arith.constant dense<0.000000e+00> : vector<8x32xf32>
    %535 = tpu.matmul %532, %534, %cst_319 {dimension_numbers = #tpu.dot_dimension_numbers<[1], [0], [0], [1], [0, 0, 1, 1], [], []>} : vector<8x16xbf16>, vector<16x32xbf16>, vector<8x32xf32> -> vector<8x32xf32>
    %536 = arith.addf %529, %535 : vector<8x32xf32>
    %537 = vector.broadcast %46 : vector<1x32xf32> to vector<8x32xf32>
    %538 = arith.addf %536, %537 : vector<8x32xf32>
    %cst_320 = arith.constant 0.000000e+00 : f32
    %539 = vector.broadcast %cst_320 : f32 to vector<8x32xf32>
    %540 = arith.maximumf %538, %539 : vector<8x32xf32>
    %c7_321 = arith.constant 7 : index
    %c1_322 = arith.constant 1 : index
    %c0_323 = arith.constant 0 : index
    %541 = vector.load %arg14[%c7_321, %c1_322, %c0_323] : memref<10x10x32xf32, #tpu.memory_space<vmem>>, vector<1x8x32xf32>
    %542 = vector.shape_cast %541 : vector<1x8x32xf32> to vector<8x32xf32>
    %543 = vector.shape_cast %540 : vector<8x32xf32> to vector<1x8x32xf32>
    tpu.vector_store %arg14[%c7_321, %c1_322, %c0_323], %543 {strides = array<i32>} : memref<10x10x32xf32, #tpu.memory_space<vmem>>, vector<1x8x32xf32>,
    %cst_324 = arith.constant 0.000000e+00 : f32
    %544 = vector.broadcast %cst_324 : f32 to vector<8x32xf32>
    %c7_325 = arith.constant 7 : index
    %c0_326 = arith.constant 0 : index
    %c0_327 = arith.constant 0 : index
    %545 = vector.load %arg13[%c7_325, %c0_326, %c0_327] : memref<10x10x16xf32, #tpu.memory_space<vmem>>, vector<1x8x16xf32>
    %546 = vector.shape_cast %545 : vector<1x8x16xf32> to vector<8x16xf32>
    %547 = arith.truncf %546 : vector<8x16xf32> to vector<8x16xbf16>
    %548 = vector.extract_strided_slice %45 {offsets = [0, 0, 0, 0], sizes = [1, 1, 16, 32], strides = [1, 1, 1, 1]} : vector<3x3x16x32xbf16> to vector<1x1x16x32xbf16>
    %549 = vector.shape_cast %548 : vector<1x1x16x32xbf16> to vector<16x32xbf16>
    %cst_328 = arith.constant dense<0.000000e+00> : vector<8x32xf32>
    %550 = tpu.matmul %547, %549, %cst_328 {dimension_numbers = #tpu.dot_dimension_numbers<[1], [0], [0], [1], [0, 0, 1, 1], [], []>} : vector<8x16xbf16>, vector<16x32xbf16>, vector<8x32xf32> -> vector<8x32xf32>
    %551 = arith.addf %544, %550 : vector<8x32xf32>
    %c7_329 = arith.constant 7 : index
    %c1_330 = arith.constant 1 : index
    %c0_331 = arith.constant 0 : index
    %552 = vector.load %arg13[%c7_329, %c1_330, %c0_331] : memref<10x10x16xf32, #tpu.memory_space<vmem>>, vector<1x8x16xf32>
    %553 = vector.shape_cast %552 : vector<1x8x16xf32> to vector<8x16xf32>
    %554 = arith.truncf %553 : vector<8x16xf32> to vector<8x16xbf16>
    %555 = vector.extract_strided_slice %45 {offsets = [0, 1, 0, 0], sizes = [1, 1, 16, 32], strides = [1, 1, 1, 1]} : vector<3x3x16x32xbf16> to vector<1x1x16x32xbf16>
    %556 = vector.shape_cast %555 : vector<1x1x16x32xbf16> to vector<16x32xbf16>
    %cst_332 = arith.constant dense<0.000000e+00> : vector<8x32xf32>
    %557 = tpu.matmul %554, %556, %cst_332 {dimension_numbers = #tpu.dot_dimension_numbers<[1], [0], [0], [1], [0, 0, 1, 1], [], []>} : vector<8x16xbf16>, vector<16x32xbf16>, vector<8x32xf32> -> vector<8x32xf32>
    %558 = arith.addf %551, %557 : vector<8x32xf32>
    %c7_333 = arith.constant 7 : index
    %c2_334 = arith.constant 2 : index
    %c0_335 = arith.constant 0 : index
    %559 = vector.load %arg13[%c7_333, %c2_334, %c0_335] : memref<10x10x16xf32, #tpu.memory_space<vmem>>, vector<1x8x16xf32>
    %560 = vector.shape_cast %559 : vector<1x8x16xf32> to vector<8x16xf32>
    %561 = arith.truncf %560 : vector<8x16xf32> to vector<8x16xbf16>
    %562 = vector.extract_strided_slice %45 {offsets = [0, 2, 0, 0], sizes = [1, 1, 16, 32], strides = [1, 1, 1, 1]} : vector<3x3x16x32xbf16> to vector<1x1x16x32xbf16>
    %563 = vector.shape_cast %562 : vector<1x1x16x32xbf16> to vector<16x32xbf16>
    %cst_336 = arith.constant dense<0.000000e+00> : vector<8x32xf32>
    %564 = tpu.matmul %561, %563, %cst_336 {dimension_numbers = #tpu.dot_dimension_numbers<[1], [0], [0], [1], [0, 0, 1, 1], [], []>} : vector<8x16xbf16>, vector<16x32xbf16>, vector<8x32xf32> -> vector<8x32xf32>
    %565 = arith.addf %558, %564 : vector<8x32xf32>
    %c8_337 = arith.constant 8 : index
    %c0_338 = arith.constant 0 : index
    %c0_339 = arith.constant 0 : index
    %566 = vector.load %arg13[%c8_337, %c0_338, %c0_339] : memref<10x10x16xf32, #tpu.memory_space<vmem>>, vector<1x8x16xf32>
    %567 = vector.shape_cast %566 : vector<1x8x16xf32> to vector<8x16xf32>
    %568 = arith.truncf %567 : vector<8x16xf32> to vector<8x16xbf16>
    %569 = vector.extract_strided_slice %45 {offsets = [1, 0, 0, 0], sizes = [1, 1, 16, 32], strides = [1, 1, 1, 1]} : vector<3x3x16x32xbf16> to vector<1x1x16x32xbf16>
    %570 = vector.shape_cast %569 : vector<1x1x16x32xbf16> to vector<16x32xbf16>
    %cst_340 = arith.constant dense<0.000000e+00> : vector<8x32xf32>
    %571 = tpu.matmul %568, %570, %cst_340 {dimension_numbers = #tpu.dot_dimension_numbers<[1], [0], [0], [1], [0, 0, 1, 1], [], []>} : vector<8x16xbf16>, vector<16x32xbf16>, vector<8x32xf32> -> vector<8x32xf32>
    %572 = arith.addf %565, %571 : vector<8x32xf32>
    %c8_341 = arith.constant 8 : index
    %c1_342 = arith.constant 1 : index
    %c0_343 = arith.constant 0 : index
    %573 = vector.load %arg13[%c8_341, %c1_342, %c0_343] : memref<10x10x16xf32, #tpu.memory_space<vmem>>, vector<1x8x16xf32>
    %574 = vector.shape_cast %573 : vector<1x8x16xf32> to vector<8x16xf32>
    %575 = arith.truncf %574 : vector<8x16xf32> to vector<8x16xbf16>
    %576 = vector.extract_strided_slice %45 {offsets = [1, 1, 0, 0], sizes = [1, 1, 16, 32], strides = [1, 1, 1, 1]} : vector<3x3x16x32xbf16> to vector<1x1x16x32xbf16>
    %577 = vector.shape_cast %576 : vector<1x1x16x32xbf16> to vector<16x32xbf16>
    %cst_344 = arith.constant dense<0.000000e+00> : vector<8x32xf32>
    %578 = tpu.matmul %575, %577, %cst_344 {dimension_numbers = #tpu.dot_dimension_numbers<[1], [0], [0], [1], [0, 0, 1, 1], [], []>} : vector<8x16xbf16>, vector<16x32xbf16>, vector<8x32xf32> -> vector<8x32xf32>
    %579 = arith.addf %572, %578 : vector<8x32xf32>
    %c8_345 = arith.constant 8 : index
    %c2_346 = arith.constant 2 : index
    %c0_347 = arith.constant 0 : index
    %580 = vector.load %arg13[%c8_345, %c2_346, %c0_347] : memref<10x10x16xf32, #tpu.memory_space<vmem>>, vector<1x8x16xf32>
    %581 = vector.shape_cast %580 : vector<1x8x16xf32> to vector<8x16xf32>
    %582 = arith.truncf %581 : vector<8x16xf32> to vector<8x16xbf16>
    %583 = vector.extract_strided_slice %45 {offsets = [1, 2, 0, 0], sizes = [1, 1, 16, 32], strides = [1, 1, 1, 1]} : vector<3x3x16x32xbf16> to vector<1x1x16x32xbf16>
    %584 = vector.shape_cast %583 : vector<1x1x16x32xbf16> to vector<16x32xbf16>
    %cst_348 = arith.constant dense<0.000000e+00> : vector<8x32xf32>
    %585 = tpu.matmul %582, %584, %cst_348 {dimension_numbers = #tpu.dot_dimension_numbers<[1], [0], [0], [1], [0, 0, 1, 1], [], []>} : vector<8x16xbf16>, vector<16x32xbf16>, vector<8x32xf32> -> vector<8x32xf32>
    %586 = arith.addf %579, %585 : vector<8x32xf32>
    %c9 = arith.constant 9 : index
    %c0_349 = arith.constant 0 : index
    %c0_350 = arith.constant 0 : index
    %587 = vector.load %arg13[%c9, %c0_349, %c0_350] : memref<10x10x16xf32, #tpu.memory_space<vmem>>, vector<1x8x16xf32>
    %588 = vector.shape_cast %587 : vector<1x8x16xf32> to vector<8x16xf32>
    %589 = arith.truncf %588 : vector<8x16xf32> to vector<8x16xbf16>
    %590 = vector.extract_strided_slice %45 {offsets = [2, 0, 0, 0], sizes = [1, 1, 16, 32], strides = [1, 1, 1, 1]} : vector<3x3x16x32xbf16> to vector<1x1x16x32xbf16>
    %591 = vector.shape_cast %590 : vector<1x1x16x32xbf16> to vector<16x32xbf16>
    %cst_351 = arith.constant dense<0.000000e+00> : vector<8x32xf32>
    %592 = tpu.matmul %589, %591, %cst_351 {dimension_numbers = #tpu.dot_dimension_numbers<[1], [0], [0], [1], [0, 0, 1, 1], [], []>} : vector<8x16xbf16>, vector<16x32xbf16>, vector<8x32xf32> -> vector<8x32xf32>
    %593 = arith.addf %586, %592 : vector<8x32xf32>
    %c9_352 = arith.constant 9 : index
    %c1_353 = arith.constant 1 : index
    %c0_354 = arith.constant 0 : index
    %594 = vector.load %arg13[%c9_352, %c1_353, %c0_354] : memref<10x10x16xf32, #tpu.memory_space<vmem>>, vector<1x8x16xf32>
    %595 = vector.shape_cast %594 : vector<1x8x16xf32> to vector<8x16xf32>
    %596 = arith.truncf %595 : vector<8x16xf32> to vector<8x16xbf16>
    %597 = vector.extract_strided_slice %45 {offsets = [2, 1, 0, 0], sizes = [1, 1, 16, 32], strides = [1, 1, 1, 1]} : vector<3x3x16x32xbf16> to vector<1x1x16x32xbf16>
    %598 = vector.shape_cast %597 : vector<1x1x16x32xbf16> to vector<16x32xbf16>
    %cst_355 = arith.constant dense<0.000000e+00> : vector<8x32xf32>
    %599 = tpu.matmul %596, %598, %cst_355 {dimension_numbers = #tpu.dot_dimension_numbers<[1], [0], [0], [1], [0, 0, 1, 1], [], []>} : vector<8x16xbf16>, vector<16x32xbf16>, vector<8x32xf32> -> vector<8x32xf32>
    %600 = arith.addf %593, %599 : vector<8x32xf32>
    %c9_356 = arith.constant 9 : index
    %c2_357 = arith.constant 2 : index
    %c0_358 = arith.constant 0 : index
    %601 = vector.load %arg13[%c9_356, %c2_357, %c0_358] : memref<10x10x16xf32, #tpu.memory_space<vmem>>, vector<1x8x16xf32>
    %602 = vector.shape_cast %601 : vector<1x8x16xf32> to vector<8x16xf32>
    %603 = arith.truncf %602 : vector<8x16xf32> to vector<8x16xbf16>
    %604 = vector.extract_strided_slice %45 {offsets = [2, 2, 0, 0], sizes = [1, 1, 16, 32], strides = [1, 1, 1, 1]} : vector<3x3x16x32xbf16> to vector<1x1x16x32xbf16>
    %605 = vector.shape_cast %604 : vector<1x1x16x32xbf16> to vector<16x32xbf16>
    %cst_359 = arith.constant dense<0.000000e+00> : vector<8x32xf32>
    %606 = tpu.matmul %603, %605, %cst_359 {dimension_numbers = #tpu.dot_dimension_numbers<[1], [0], [0], [1], [0, 0, 1, 1], [], []>} : vector<8x16xbf16>, vector<16x32xbf16>, vector<8x32xf32> -> vector<8x32xf32>
    %607 = arith.addf %600, %606 : vector<8x32xf32>
    %608 = vector.broadcast %46 : vector<1x32xf32> to vector<8x32xf32>
    %609 = arith.addf %607, %608 : vector<8x32xf32>
    %cst_360 = arith.constant 0.000000e+00 : f32
    %610 = vector.broadcast %cst_360 : f32 to vector<8x32xf32>
    %611 = arith.maximumf %609, %610 : vector<8x32xf32>
    %c8_361 = arith.constant 8 : index
    %c1_362 = arith.constant 1 : index
    %c0_363 = arith.constant 0 : index
    %612 = vector.load %arg14[%c8_361, %c1_362, %c0_363] : memref<10x10x32xf32, #tpu.memory_space<vmem>>, vector<1x8x32xf32>
    %613 = vector.shape_cast %612 : vector<1x8x32xf32> to vector<8x32xf32>
    %614 = vector.shape_cast %611 : vector<8x32xf32> to vector<1x8x32xf32>
    tpu.vector_store %arg14[%c8_361, %c1_362, %c0_363], %614 {strides = array<i32>} : memref<10x10x32xf32, #tpu.memory_space<vmem>>, vector<1x8x32xf32>,
    %c0_364 = arith.constant 0 : index
    %c0_365 = arith.constant 0 : index
    %c0_366 = arith.constant 0 : index
    %615 = vector.load %arg14[%c0_364, %c0_365, %c0_366] : memref<10x10x32xf32, #tpu.memory_space<vmem>>, vector<10x10x32xf32>
    %c0_367 = arith.constant 0 : index
    %c0_368 = arith.constant 0 : index
    %c0_369 = arith.constant 0 : index
    %616 = vector.load %arg6[%c0_367, %c0_368, %c0_369] : memref<3x3x32xf32, #tpu.memory_space<vmem>>, vector<3x3x32xf32>
    %cst_370 = arith.constant 0.000000e+00 : f32
    %617 = vector.broadcast %cst_370 : f32 to vector<8x8x32xf32>
    %618 = vector.extract_strided_slice %615 {offsets = [0, 0, 0], sizes = [8, 8, 32], strides = [1, 1, 1]} : vector<10x10x32xf32> to vector<8x8x32xf32>
    %619 = vector.extract_strided_slice %616 {offsets = [0, 0, 0], sizes = [1, 1, 32], strides = [1, 1, 1]} : vector<3x3x32xf32> to vector<1x1x32xf32>
    %620 = vector.shape_cast %619 : vector<1x1x32xf32> to vector<1x32xf32>
    %621 = vector.shape_cast %620 : vector<1x32xf32> to vector<1x1x32xf32>
    %622 = vector.broadcast %621 : vector<1x1x32xf32> to vector<8x8x32xf32>
    %623 = arith.mulf %618, %622 : vector<8x8x32xf32>
    %624 = arith.addf %617, %623 : vector<8x8x32xf32>
    %625 = vector.extract_strided_slice %615 {offsets = [0, 1, 0], sizes = [8, 8, 32], strides = [1, 1, 1]} : vector<10x10x32xf32> to vector<8x8x32xf32>
    %626 = vector.extract_strided_slice %616 {offsets = [0, 1, 0], sizes = [1, 1, 32], strides = [1, 1, 1]} : vector<3x3x32xf32> to vector<1x1x32xf32>
    %627 = vector.shape_cast %626 : vector<1x1x32xf32> to vector<1x32xf32>
    %628 = vector.shape_cast %627 : vector<1x32xf32> to vector<1x1x32xf32>
    %629 = vector.broadcast %628 : vector<1x1x32xf32> to vector<8x8x32xf32>
    %630 = arith.mulf %625, %629 : vector<8x8x32xf32>
    %631 = arith.addf %624, %630 : vector<8x8x32xf32>
    %632 = vector.extract_strided_slice %615 {offsets = [0, 2, 0], sizes = [8, 8, 32], strides = [1, 1, 1]} : vector<10x10x32xf32> to vector<8x8x32xf32>
    %633 = vector.extract_strided_slice %616 {offsets = [0, 2, 0], sizes = [1, 1, 32], strides = [1, 1, 1]} : vector<3x3x32xf32> to vector<1x1x32xf32>
    %634 = vector.shape_cast %633 : vector<1x1x32xf32> to vector<1x32xf32>
    %635 = vector.shape_cast %634 : vector<1x32xf32> to vector<1x1x32xf32>
    %636 = vector.broadcast %635 : vector<1x1x32xf32> to vector<8x8x32xf32>
    %637 = arith.mulf %632, %636 : vector<8x8x32xf32>
    %638 = arith.addf %631, %637 : vector<8x8x32xf32>
    %639 = vector.extract_strided_slice %615 {offsets = [1, 0, 0], sizes = [8, 8, 32], strides = [1, 1, 1]} : vector<10x10x32xf32> to vector<8x8x32xf32>
    %640 = vector.extract_strided_slice %616 {offsets = [1, 0, 0], sizes = [1, 1, 32], strides = [1, 1, 1]} : vector<3x3x32xf32> to vector<1x1x32xf32>
    %641 = vector.shape_cast %640 : vector<1x1x32xf32> to vector<1x32xf32>
    %642 = vector.shape_cast %641 : vector<1x32xf32> to vector<1x1x32xf32>
    %643 = vector.broadcast %642 : vector<1x1x32xf32> to vector<8x8x32xf32>
    %644 = arith.mulf %639, %643 : vector<8x8x32xf32>
    %645 = arith.addf %638, %644 : vector<8x8x32xf32>
    %646 = vector.extract_strided_slice %615 {offsets = [1, 1, 0], sizes = [8, 8, 32], strides = [1, 1, 1]} : vector<10x10x32xf32> to vector<8x8x32xf32>
    %647 = vector.extract_strided_slice %616 {offsets = [1, 1, 0], sizes = [1, 1, 32], strides = [1, 1, 1]} : vector<3x3x32xf32> to vector<1x1x32xf32>
    %648 = vector.shape_cast %647 : vector<1x1x32xf32> to vector<1x32xf32>
    %649 = vector.shape_cast %648 : vector<1x32xf32> to vector<1x1x32xf32>
    %650 = vector.broadcast %649 : vector<1x1x32xf32> to vector<8x8x32xf32>
    %651 = arith.mulf %646, %650 : vector<8x8x32xf32>
    %652 = arith.addf %645, %651 : vector<8x8x32xf32>
    %653 = vector.extract_strided_slice %615 {offsets = [1, 2, 0], sizes = [8, 8, 32], strides = [1, 1, 1]} : vector<10x10x32xf32> to vector<8x8x32xf32>
    %654 = vector.extract_strided_slice %616 {offsets = [1, 2, 0], sizes = [1, 1, 32], strides = [1, 1, 1]} : vector<3x3x32xf32> to vector<1x1x32xf32>
    %655 = vector.shape_cast %654 : vector<1x1x32xf32> to vector<1x32xf32>
    %656 = vector.shape_cast %655 : vector<1x32xf32> to vector<1x1x32xf32>
    %657 = vector.broadcast %656 : vector<1x1x32xf32> to vector<8x8x32xf32>
    %658 = arith.mulf %653, %657 : vector<8x8x32xf32>
    %659 = arith.addf %652, %658 : vector<8x8x32xf32>
    %660 = vector.extract_strided_slice %615 {offsets = [2, 0, 0], sizes = [8, 8, 32], strides = [1, 1, 1]} : vector<10x10x32xf32> to vector<8x8x32xf32>
    %661 = vector.extract_strided_slice %616 {offsets = [2, 0, 0], sizes = [1, 1, 32], strides = [1, 1, 1]} : vector<3x3x32xf32> to vector<1x1x32xf32>
    %662 = vector.shape_cast %661 : vector<1x1x32xf32> to vector<1x32xf32>
    %663 = vector.shape_cast %662 : vector<1x32xf32> to vector<1x1x32xf32>
    %664 = vector.broadcast %663 : vector<1x1x32xf32> to vector<8x8x32xf32>
    %665 = arith.mulf %660, %664 : vector<8x8x32xf32>
    %666 = arith.addf %659, %665 : vector<8x8x32xf32>
    %667 = vector.extract_strided_slice %615 {offsets = [2, 1, 0], sizes = [8, 8, 32], strides = [1, 1, 1]} : vector<10x10x32xf32> to vector<8x8x32xf32>
    %668 = vector.extract_strided_slice %616 {offsets = [2, 1, 0], sizes = [1, 1, 32], strides = [1, 1, 1]} : vector<3x3x32xf32> to vector<1x1x32xf32>
    %669 = vector.shape_cast %668 : vector<1x1x32xf32> to vector<1x32xf32>
    %670 = vector.shape_cast %669 : vector<1x32xf32> to vector<1x1x32xf32>
    %671 = vector.broadcast %670 : vector<1x1x32xf32> to vector<8x8x32xf32>
    %672 = arith.mulf %667, %671 : vector<8x8x32xf32>
    %673 = arith.addf %666, %672 : vector<8x8x32xf32>
    %674 = vector.extract_strided_slice %615 {offsets = [2, 2, 0], sizes = [8, 8, 32], strides = [1, 1, 1]} : vector<10x10x32xf32> to vector<8x8x32xf32>
    %675 = vector.extract_strided_slice %616 {offsets = [2, 2, 0], sizes = [1, 1, 32], strides = [1, 1, 1]} : vector<3x3x32xf32> to vector<1x1x32xf32>
    %676 = vector.shape_cast %675 : vector<1x1x32xf32> to vector<1x32xf32>
    %677 = vector.shape_cast %676 : vector<1x32xf32> to vector<1x1x32xf32>
    %678 = vector.broadcast %677 : vector<1x1x32xf32> to vector<8x8x32xf32>
    %679 = arith.mulf %674, %678 : vector<8x8x32xf32>
    %680 = arith.addf %673, %679 : vector<8x8x32xf32>
    %c0_371 = arith.constant 0 : index
    %c0_372 = arith.constant 0 : index
    %681 = vector.load %arg7[%c0_371, %c0_372] : memref<1x32xf32, #tpu.memory_space<vmem>>, vector<1x32xf32>
    %682 = vector.shape_cast %681 : vector<1x32xf32> to vector<1x1x32xf32>
    %683 = vector.broadcast %682 : vector<1x1x32xf32> to vector<8x8x32xf32>
    %684 = arith.addf %680, %683 : vector<8x8x32xf32>
    %cst_373 = arith.constant dense<0.000000e+00> : vector<8x32xf32>
    %685 = vector.multi_reduction <add>, %684, %cst_373 [0] : vector<8x8x32xf32> to vector<8x32xf32>
    %cst_374 = arith.constant dense<0.000000e+00> : vector<32xf32>
    %686 = vector.multi_reduction <add>, %685, %cst_374 [0] : vector<8x32xf32> to vector<32xf32>
    %687 = vector.shape_cast %686 : vector<32xf32> to vector<1x32xf32>
    %cst_375 = arith.constant 1.562500e-02 : f32
    %688 = vector.broadcast %cst_375 : f32 to vector<1x32xf32>
    %689 = arith.mulf %687, %688 : vector<1x32xf32>
    %cst_376 = arith.constant dense<0.000000e+00> : vector<10x32xf32>
    %690 = vector.multi_reduction <add>, %615, %cst_376 [0] : vector<10x10x32xf32> to vector<10x32xf32>
    %cst_377 = arith.constant dense<0.000000e+00> : vector<32xf32>
    %691 = vector.multi_reduction <add>, %690, %cst_377 [0] : vector<10x32xf32> to vector<32xf32>
    %692 = vector.shape_cast %691 : vector<32xf32> to vector<1x32xf32>
    %cst_378 = arith.constant 1.562500e-02 : f32
    %693 = vector.broadcast %cst_378 : f32 to vector<1x32xf32>
    %694 = arith.mulf %692, %693 : vector<1x32xf32>
    %695 = arith.truncf %689 : vector<1x32xf32> to vector<1x32xbf16>
    %c0_379 = arith.constant 0 : index
    %c0_380 = arith.constant 0 : index
    %696 = vector.load %arg8[%c0_379, %c0_380] : memref<32x32xbf16, #tpu.memory_space<vmem>>, vector<32x32xbf16>
    %cst_381 = arith.constant dense<0.000000e+00> : vector<1x32xf32>
    %697 = tpu.matmul %695, %696, %cst_381 {dimension_numbers = #tpu.dot_dimension_numbers<[1], [0], [0], [1], [0, 0, 1, 1], [], []>} : vector<1x32xbf16>, vector<32x32xbf16>, vector<1x32xf32> -> vector<1x32xf32>
    %c0_382 = arith.constant 0 : index
    %c0_383 = arith.constant 0 : index
    %698 = vector.load %arg9[%c0_382, %c0_383] : memref<1x32xf32, #tpu.memory_space<vmem>>, vector<1x32xf32>
    %699 = arith.addf %697, %698 : vector<1x32xf32>
    %700 = arith.addf %699, %694 : vector<1x32xf32>
    %701 = arith.truncf %700 : vector<1x32xf32> to vector<1x32xbf16>
    %c0_384 = arith.constant 0 : index
    %c0_385 = arith.constant 0 : index
    %702 = vector.load %arg10[%c0_384, %c0_385] : memref<32x768xbf16, #tpu.memory_space<vmem>>, vector<32x768xbf16>
    %cst_386 = arith.constant dense<0.000000e+00> : vector<1x768xf32>
    %703 = tpu.matmul %701, %702, %cst_386 {dimension_numbers = #tpu.dot_dimension_numbers<[1], [0], [0], [1], [0, 0, 1, 1], [], []>} : vector<1x32xbf16>, vector<32x768xbf16>, vector<1x768xf32> -> vector<1x768xf32>
    %c0_387 = arith.constant 0 : index
    %c0_388 = arith.constant 0 : index
    %704 = vector.load %arg11[%c0_387, %c0_388] : memref<1x768xf32, #tpu.memory_space<vmem>>, vector<1x768xf32>
    %705 = arith.addf %703, %704 : vector<1x768xf32>
    %c0_389 = arith.constant 0 : index
    %c0_390 = arith.constant 0 : index
    %c0_391 = arith.constant 0 : index
    %706 = vector.load %arg12[%c0_389, %c0_390, %c0_391] : memref<1x1x768xf32, #tpu.memory_space<vmem>>, vector<1x1x768xf32>
    %707 = vector.shape_cast %706 : vector<1x1x768xf32> to vector<1x768xf32>
    %708 = vector.shape_cast %705 : vector<1x768xf32> to vector<1x1x768xf32>
    tpu.vector_store %arg12[%c0_389, %c0_390, %c0_391], %708 {strides = array<i32>} : memref<1x1x768xf32, #tpu.memory_space<vmem>>, vector<1x1x768xf32>,
    return
  }
  func.func @transform_0(%arg0: i32) -> (i32, i32, i32) {
    %c0_i32 = arith.constant 0 : i32
    %c0_i32_0 = arith.constant 0 : i32
    %c0_i32_1 = arith.constant 0 : i32
    return %arg0, %c0_i32, %c0_i32_0 : i32, i32, i32
  }
  func.func @transform_1(%arg0: i32) -> (i32, i32) {
    %c0_i32 = arith.constant 0 : i32
    %c0_i32_0 = arith.constant 0 : i32
    %c0_i32_1 = arith.constant 0 : i32
    return %c0_i32, %c0_i32_0 : i32, i32
  }
  func.func @transform_2(%arg0: i32) -> (i32, i32) {
    %c0_i32 = arith.constant 0 : i32
    %c0_i32_0 = arith.constant 0 : i32
    %c0_i32_1 = arith.constant 0 : i32
    return %c0_i32, %c0_i32_0 : i32, i32
  }
  func.func @transform_3(%arg0: i32) -> (i32, i32, i32, i32) {
    %c0_i32 = arith.constant 0 : i32
    %c0_i32_0 = arith.constant 0 : i32
    %c0_i32_1 = arith.constant 0 : i32
    %c0_i32_2 = arith.constant 0 : i32
    %c0_i32_3 = arith.constant 0 : i32
    return %c0_i32, %c0_i32_0, %c0_i32_1, %c0_i32_2 : i32, i32, i32, i32
  }
  func.func @transform_4(%arg0: i32) -> (i32, i32) {
    %c0_i32 = arith.constant 0 : i32
    %c0_i32_0 = arith.constant 0 : i32
    %c0_i32_1 = arith.constant 0 : i32
    return %c0_i32, %c0_i32_0 : i32, i32
  }
  func.func @transform_5(%arg0: i32) -> (i32, i32, i32) {
    %c0_i32 = arith.constant 0 : i32
    %c0_i32_0 = arith.constant 0 : i32
    %c0_i32_1 = arith.constant 0 : i32
    %c0_i32_2 = arith.constant 0 : i32
    return %c0_i32, %c0_i32_0, %c0_i32_1 : i32, i32, i32
  }
  func.func @transform_6(%arg0: i32) -> (i32, i32) {
    %c0_i32 = arith.constant 0 : i32
    %c0_i32_0 = arith.constant 0 : i32
    %c0_i32_1 = arith.constant 0 : i32
    return %c0_i32, %c0_i32_0 : i32, i32
  }
  func.func @transform_7(%arg0: i32) -> (i32, i32) {
    %c0_i32 = arith.constant 0 : i32
    %c0_i32_0 = arith.constant 0 : i32
    %c0_i32_1 = arith.constant 0 : i32
    return %c0_i32, %c0_i32_0 : i32, i32
  }
  func.func @transform_8(%arg0: i32) -> (i32, i32) {
    %c0_i32 = arith.constant 0 : i32
    %c0_i32_0 = arith.constant 0 : i32
    %c0_i32_1 = arith.constant 0 : i32
    return %c0_i32, %c0_i32_0 : i32, i32
  }
  func.func @transform_9(%arg0: i32) -> (i32, i32) {
    %c0_i32 = arith.constant 0 : i32
    %c0_i32_0 = arith.constant 0 : i32
    %c0_i32_1 = arith.constant 0 : i32
    return %c0_i32, %c0_i32_0 : i32, i32
  }
  func.func @transform_10(%arg0: i32) -> (i32, i32) {
    %c0_i32 = arith.constant 0 : i32
    %c0_i32_0 = arith.constant 0 : i32
    %c0_i32_1 = arith.constant 0 : i32
    return %c0_i32, %c0_i32_0 : i32, i32
  }
  func.func @transform_11(%arg0: i32) -> (i32, i32, i32) {
    %c0_i32 = arith.constant 0 : i32
    %c0_i32_0 = arith.constant 0 : i32
    %c0_i32_1 = arith.constant 0 : i32
    return %arg0, %c0_i32, %c0_i32_0 : i32, i32, i32
  }
}

</mosaic_0001>

<bundles_post_ra>
// kernel: xception_feature_extractor_forward.1
= control target key start
LH: loop header
LB: loop body
LE: loop exit
PB: predicated region body
PF: predicated region fallthrough
CT: control target
= control target key end

     0   :  { %s5871_s17 = smov 0   ;;  %s7036_s0 = inlined_call_operand.vmem [shape: bf16[2,64,27], index: 0, kind: input, shape index: {}]   ;;  %s7037_s1 = inlined_call_operand.vmem [shape: bf16[27,16], index: 1, kind: input, shape index: {}]   ;;  %s7038_s2 = inlined_call_operand.vmem [shape: f32[1,16], index: 2, kind: input, shape index: {}]   ;;  %s7039_s3 = inlined_call_operand.vmem [shape: bf16[3,3,16,32], index: 3, kind: input, shape index: {}]   ;;  %s7040_s4 = inlined_call_operand.vmem [shape: f32[1,32], index: 4, kind: input, shape index: {}]   ;;  %s7041_s5 = inlined_call_operand.vmem [shape: f32[3,3,32], index: 5, kind: input, shape index: {}]   ;;  %s7042_s6 = inlined_call_operand.vmem [shape: f32[1,32], index: 6, kind: input, shape index: {}]   ;;  %s7043_s7 = inlined_call_operand.vmem [shape: bf16[32,32], index: 7, kind: input, shape index: {}]   ;;  %s7044_s8 = inlined_call_operand.vmem [shape: f32[1,32], index: 8, kind: input, shape index: {}]   ;;  %s7045_s9 = inlined_call_operand.vmem [shape: bf16[32,768], index: 9, kind: input, shape index: {}]   ;;  %s7046_s10 = inlined_call_operand.vmem [shape: f32[1,768], index: 10, kind: input, shape index: {}]   ;;  %s7047_s11 = inlined_call_operand.vmem [shape: f32[2,1,768], index: 11, kind: output, shape index: {}]  }
   0x1 LB: > { %s5021_s18 = sadd.s32 4294967295, %s5804_s17   ;;  %p5025_p0 = scmp.ge.s32.totalorder %s5804_s17, 1  ;;  %s5804_s17 = sphi %s5871_s17, %s21_s17  }
   0x2   : > { %p337_p1 = scmp.lt.s32.totalorder %s5804_s17, 3 }
   0x4   : > { %p338_p2 = pnand %p5025_p0, %p337_p1 }
   0x5   : > { %v5762_v0 = vld [vmem:[%s7037_s1] sm:$0xff] (!%p338_p2)   ;;  %vm493_vm0 = vcmask (!%p338_p2), 1044480   ;;  %v5763_v1 = vld [vmem:[%s7037_s1 + $0x8] sm:$0x3f] (!%p338_p2)   ;;  %vm494_vm1 = vcmask (!%p338_p2), 1045504   ;;  %p376_p3 = scmp.lt.s32.totalorder (!%p338_p2), %s5021_s18, 1 }
   0x6   : > { %341 = sbr.rel (%p338_p2) target bundleno = 1230 (0x4ce), region = 64  ;;  %5296 = vmatprep.subr.bf16.mxu0 (!%p338_p2), %v5762_v0  ;;  %v5888_v2 = vld [vmem:[%s7039_s3 + $0x8] sm:$0xff] (!%p338_p2)   ;;  %v5806_v3 = vmov (!%p338_p2), 65535   ;;  %v5807_v5 = vmov (!%p338_p2), 0.0   ;;  %vm5808_vm2 = vmmov (!%p338_p2), 0   ;;  %vm386_vm3 = vcmask (!%p338_p2), 130048  }
   0x7   : > { %5297 = vmatpush3.bf16.msra.mxu0 (!%p338_p2), %v5762_v0  ;;  %v495_v4 = vsel (!%p338_p2), %vm493_vm0, 4294967295, %v5806_v3  ;;  %5308 = vmatprep.subr.bf16.mxu1 (!%p338_p2), %v5807_v5  ;;  %vm388_vm4 = vcmask (!%p338_p2), 123904   ;;  %387 = vst.msk [vmem:[#allocation2] sm:$0xff] (!%p338_p2), %vm386_vm3, %v5807_v5  ;;  %390 = vst.msk [vmem:[#allocation2 + $0x10] sm:$0xff] (!%p338_p2), %vm386_vm3, %v5807_v5  ;;  %vm480_vm5 = vcmask (!%p338_p2), 220160   ;;  %v5949_v12 = vld [vmem:[%s7039_s3] sm:$0xff] (!%p338_p2)  }
   0x8   : > { %v496_v6 = vsel (!%p338_p2), %vm494_vm1, %v495_v4, 0  ;;  %5309 = vmatpush3.bf16.msra.mxu1 (!%p338_p2), %v5888_v2  ;;  %5310 = vmatprep.mubr.msk.bf16.mxu1 (!%p338_p2), %vm5808_vm2, %v5807_v5  ;;  %389 = vst.msk [vmem:[#allocation2 + $0x8] sm:$0x3] (!%p338_p2), %vm388_vm4, %v5807_v5  ;;  %391 = vst.msk [vmem:[#allocation2 + $0x18] sm:$0x3] (!%p338_p2), %vm388_vm4, %v5807_v5  ;;  %v5960_v17 = vld [vmem:[%s7039_s3 + $0x10] sm:$0xff] (!%p338_p2)  }
   0x9   : > { %v498_v7 = vand.u32 (!%p338_p2), %v5763_v1, %v496_v6  ;;  %392 = vst.msk [vmem:[#allocation2 + $0x20] sm:$0xff] (!%p338_p2), %vm386_vm3, %v5807_v5  ;;  %394 = vst.msk [vmem:[#allocation2 + $0x30] sm:$0xff] (!%p338_p2), %vm386_vm3, %v5807_v5  ;;  %5314 = vmatprep.subr.bf16.mxu1 (!%p338_p2), %v5807_v5  ;;  %v5975_v20 = vld [vmem:[%s7039_s3 + $0x18] sm:$0xff] (!%p338_p2)   ;;  %v5981_v21 = vld [vmem:[%s7039_s3 + $0x20] sm:$0xff] (!%p338_p2)   ;;  %vm408_vm6 = vcmask (!%p338_p2), 261120   ;;  %vm410_vm7 = vcmask (!%p338_p2), 254976  }
   0xa   : > { %393 = vst.msk [vmem:[#allocation2 + $0x28] sm:$0x3] (!%p338_p2), %vm388_vm4, %v5807_v5  ;;  %395 = vst.msk [vmem:[#allocation2 + $0x38] sm:$0x3] (!%p338_p2), %vm388_vm4, %v5807_v5  ;;  %v5028_v22 = vld [vmem:[%s7038_s2] ss:$0 sm:$0xff] (!%p338_p2) }
   0xb   : > { %396 = vst.msk [vmem:[#allocation2 + $0x40] sm:$0xff] (!%p338_p2), %vm386_vm3, %v5807_v5  ;;  %398 = vst.msk [vmem:[#allocation2 + $0x50] sm:$0xff] (!%p338_p2), %vm386_vm3, %v5807_v5  ;;  %5298 = vmatprep.subr.bf16.mxu0 (!%p338_p2), %v498_v7  ;;  %v5996_v43 = vld [vmem:[%s7039_s3 + $0x28] sm:$0xff] (!%p338_p2)   ;;  %v6001_v48 = vld [vmem:[%s7039_s3 + $0x30] sm:$0xff] (!%p338_p2)   ;;  %vm4076_vm8 = vcmask (!%p338_p2), 1046528  }
   0xc   : > { %397 = vst.msk [vmem:[#allocation2 + $0x48] sm:$0x3] (!%p338_p2), %vm388_vm4, %v5807_v5  ;;  %399 = vst.msk [vmem:[#allocation2 + $0x58] sm:$0x3] (!%p338_p2), %vm388_vm4, %v5807_v5  ;;  %5299 = vmatpush3.bf16.msra.mxu0 (!%p338_p2), %v498_v7  ;;  %v6020_v55 = vld [vmem:[%s7039_s3 + $0x38] sm:$0xff] (!%p338_p2)   ;;  %v6025_v56 = vld [vmem:[%s7039_s3 + $0x40] sm:$0xff] (!%p338_p2)  }
   0xd   : > { %s7049_s18 = smov (!%p376_p3, %s5021_s18), 1  ;;  %400 = vst.msk [vmem:[#allocation2 + $0x60] sm:$0xff] %vm386_vm3, %v5807_v5  ;;  %402 = vst.msk [vmem:[#allocation2 + $0x70] sm:$0xff] %vm386_vm3, %v5807_v5  ;;  %5326 = vmatprep.subr.bf16.mxu0 %v5807_v5 }
   0xe   : > { %401 = vst.msk [vmem:[#allocation2 + $0x68] sm:$0x3] %vm388_vm4, %v5807_v5  ;;  %403 = vst.msk [vmem:[#allocation2 + $0x78] sm:$0x3] %vm388_vm4, %v5807_v5  ;;  %s5142_s25 = sshll.u32 %s7049_s18, 5  ;;  %v608_v15 = vld [vmem:[#allocation2] sm:$0xff] }
   0xf   : > { %404 = vst.msk [vmem:[#allocation2 + $0x80] sm:$0xff] %vm386_vm3, %v5807_v5  ;;  %406 = vst.msk [vmem:[#allocation2 + $0x90] sm:$0xff] %vm386_vm3, %v5807_v5  ;;  %s380_s28 = scalar_lea.vmem %s7036_s0, %s5142_s25  ;;  %v610_v11 = vld [vmem:[#allocation2 + $0x1] sm:$0xff]  ;;  %v609_v16 = vpack.c.bf16 %v608_v15, %v608_v15  ;;  %s5748_s23 = smul.u32 6, %s7049_s18 }
  0x10   : > { %405 = vst.msk [vmem:[#allocation2 + $0x88] sm:$0x3] %vm388_vm4, %v5807_v5  ;;  %407 = vst.msk [vmem:[#allocation2 + $0x98] sm:$0x3] %vm388_vm4, %v5807_v5  ;;  %v5764_v8 = vld [vmem:[%s380_s28] sm:$0xff]   ;;  %v5765_v9 = vld [vmem:[%s380_s28 + $0x8] sm:$0xff]   ;;  %v611_v14 = vpack.c.bf16 %v610_v11, %v610_v11 }
  0x11   : > { %5300 = vmatprep.mubr.msk.bf16.mxu0 %vm480_vm5, %v5764_v8  ;;  %v5766_v10 = vld [vmem:[%s380_s28 + $0x10] sm:$0xff]   ;;  %v5767_v13 = vld [vmem:[%s380_s28 + $0x18] sm:$0xff]   ;;  %v710_v18 = vld [vmem:[#allocation2 + $0x2] sm:$0xff]  ;;  %412 = vst.msk [vmem:[#allocation3 + $0x10] sm:$0xff] %vm408_vm6, %v5807_v5  ;;  %s384_s26 = scalar_lea.vmem %s7047_s11, %s5748_s23 }
  0x12   : > { %5301 = vmatmul.mubr.msk.bf16.vlgmr.msra.gmra.mrb[0].mxu0 %vm480_vm5, %v5765_v9  ;;  %5311 = vmatmul.mubr.msk.bf16.vlgmr.msra.gmra.mrb[0].mxu1 %vm386_vm3, %v611_v14  ;;  %v711_v19 = vpack.c.bf16 %v710_v18, %v710_v18  ;;  %413 = vst.msk [vmem:[#allocation3 + $0x18] sm:$0x3] %vm410_vm7, %v5807_v5  ;;  %411 = vst.msk [vmem:[#allocation3 + $0x8] sm:$0x3] %vm410_vm7, %v5807_v5 }
  0x13   : > { %5304 = vmatprep.mubr.msk.bf16.mxu0 %vm480_vm5, %v5766_v10  ;;  %5315 = vmatpush3.bf16.msra.mxu1 %v5949_v12  ;;  %409 = vst.msk [vmem:[#allocation3] sm:$0xff] %vm408_vm6, %v5807_v5  ;;  %414 = vst.msk [vmem:[#allocation3 + $0x20] sm:$0xff] %vm408_vm6, %v5807_v5 }
  0x14   : > { %5316 = vmatprep.mubr.msk.bf16.mxu1 %vm5808_vm2, %v5807_v5  ;;  %5320 = vmatprep.subr.bf16.mxu1 %v5807_v5  ;;  %415 = vst.msk [vmem:[#allocation3 + $0x28] sm:$0x3] %vm410_vm7, %v5807_v5  ;;  %417 = vst.msk [vmem:[#allocation3 + $0x38] sm:$0x3] %vm410_vm7, %v5807_v5 }
  0x15   : > { %5327 = vmatpush3.bf16.msra.mxu0 %v5975_v20  ;;  %416 = vst.msk [vmem:[#allocation3 + $0x30] sm:$0xff] %vm408_vm6, %v5807_v5  ;;  %418 = vst.msk [vmem:[#allocation3 + $0x40] sm:$0xff] %vm408_vm6, %v5807_v5 }
  0x16   : > { %5338 = vmatprep.subr.bf16.mxu0 %v5807_v5  ;;  %419 = vst.msk [vmem:[#allocation3 + $0x48] sm:$0x3] %vm410_vm7, %v5807_v5  ;;  %421 = vst.msk [vmem:[#allocation3 + $0x58] sm:$0x3] %vm410_vm7, %v5807_v5 }
  0x17   : > { %420 = vst.msk [vmem:[#allocation3 + $0x50] sm:$0xff] %vm408_vm6, %v5807_v5  ;;  %422 = vst.msk [vmem:[#allocation3 + $0x60] sm:$0xff] %vm408_vm6, %v5807_v5 }
  0x18   : > { %423 = vst.msk [vmem:[#allocation3 + $0x68] sm:$0x3] %vm410_vm7, %v5807_v5  ;;  %425 = vst.msk [vmem:[#allocation3 + $0x78] sm:$0x3] %vm410_vm7, %v5807_v5 }
  0x19   : > { %424 = vst.msk [vmem:[#allocation3 + $0x70] sm:$0xff] %vm408_vm6, %v5807_v5  ;;  %426 = vst.msk [vmem:[#allocation3 + $0x80] sm:$0xff] %vm408_vm6, %v5807_v5 }
  0x1a   : > { %5305 = vmatmul.mubr.msk.bf16.gmra.mrb[4].mxu0 %vm480_vm5, %v5767_v13  ;;  %5317 = vmatmul.mubr.msk.bf16.vlgmr.msra.gmra.mrb[4].mxu1 %vm386_vm3, %v609_v16  ;;  %427 = vst.msk [vmem:[#allocation3 + $0x88] sm:$0x3] %vm410_vm7, %v5807_v5  ;;  %429 = vst.msk [vmem:[#allocation3 + $0x98] sm:$0x3] %vm410_vm7, %v5807_v5 }
  0x1b   : > { %5328 = vmatprep.mubr.msk.bf16.mxu0 %vm5808_vm2, %v5807_v5  ;;  %5321 = vmatpush3.bf16.msra.mxu1 %v5960_v17  ;;  %428 = vst.msk [vmem:[#allocation3 + $0x90] sm:$0xff] %vm408_vm6, %v5807_v5 }
  0x1c   : > { %5322 = vmatprep.mubr.msk.bf16.mxu1 %vm5808_vm2, %v5807_v5  ;;  %5332 = vmatprep.subr.bf16.mxu1 %v5807_v5 }
  0x22   : > { %5323 = vmatmul.mubr.msk.bf16.vlgmr.msra.gmra.mrb[8].mxu1 %vm386_vm3, %v711_v19 }
  0x23   : > { %5334 = vmatprep.mubr.msk.bf16.mxu1 %vm5808_vm2, %v5807_v5  ;;  %5333 = vmatpush3.bf16.msra.mxu1 %v5981_v21 }
  0x24   : > { %5344 = vmatprep.subr.bf16.mxu1 %v5807_v5 }
  0xe5   : > { %v5302_v23 = vpop.f32.mrb[0].mxu0  ;;  %v655_v7 = vpop.f32.mrb[0].mxu1 }
  0xe6   : > { %v543_v24 = vadd.f32 %v5302_v23, %v5028_v22  ;;  %v534_v25 = vpop.f32.mrb[1].mxu0  ;;  %v5312_v8 = vpop.f32.mrb[1].mxu1 }
  0xe7   : > { %v535_v26 = vadd.f32 %v5028_v22, %v534_v25  ;;  %v5303_v27 = vpop.f32.mrb[2].mxu0  ;;  %v658_v9 = vpop.f32.mrb[2].mxu1 }
  0xe8   : > { %v567_v28 = vmax.f32 %v543_v24, 0.0  ;;  %v546_v29 = vadd.f32 %v5303_v27, %v5028_v22  ;;  %v537_v30 = vpop.f32.mrb[3].mxu0  ;;  %v5313_v10 = vpop.f32.mrb[3].mxu1 }
  0xe9   : > { %v565_v31 = vmax.f32 %v535_v26, 0.0  ;;  %v538_v32 = vadd.f32 %v5028_v22, %v537_v30 }
  0xea   : > { %578 = vst.msk [vmem:[#allocation2 + $0x31] sm:$0xff] %vm386_vm3, %v567_v28  ;;  %v568_v33 = vmax.f32 %v546_v29, 0.0 }
  0xeb   : > { %574 = vst.msk [vmem:[#allocation2 + $0x11] sm:$0xff] %vm386_vm3, %v565_v31  ;;  %v566_v34 = vmax.f32 %v538_v32, 0.0 }
  0xec   : > { %580 = vst.msk [vmem:[#allocation2 + $0x41] sm:$0xff] %vm386_vm3, %v568_v33 }
  0xed   : > { %576 = vst.msk [vmem:[#allocation2 + $0x21] sm:$0xff] %vm386_vm3, %v566_v34  ;;  %v5306_v35 = vpop.f32.mrb[4].mxu0  ;;  %v704_v11 = vpop.f32.mrb[4].mxu1 }
  0xee   : > { %v559_v36 = vadd.f32 %v5306_v35, %v5028_v22  ;;  %v550_v37 = vpop.f32.mrb[5].mxu0  ;;  %v705_v13 = vadd.f32 %v704_v11, %v655_v7  ;;  %v5318_v14 = vpop.f32.mrb[5].mxu1 }
  0xef   : > { %v551_v38 = vadd.f32 %v5028_v22, %v550_v37  ;;  %v5307_v39 = vpop.f32.mrb[6].mxu0  ;;  %v707_v15 = vpop.f32.mrb[6].mxu1 }
  0xf0   : > { %v571_v40 = vmax.f32 %v559_v36, 0.0  ;;  %v562_v41 = vadd.f32 %v5307_v39, %v5028_v22  ;;  %v553_v42 = vpop.f32.mrb[7].mxu0  ;;  %v5319_v16 = vpop.f32.mrb[7].mxu1 }
  0xf1   : > { %v569_v44 = vmax.f32 %v551_v38, 0.0  ;;  %v554_v45 = vadd.f32 %v5028_v22, %v553_v42  ;;  %v1358_v63 = vld [vmem:[#allocation2 + $0x30] sm:$0xff] }
  0xf2   : > { %v762_v46 = vld [vmem:[#allocation2 + $0x10] sm:$0xff]  ;;  %586 = vst.msk [vmem:[#allocation2 + $0x71] sm:$0xff] %vm386_vm3, %v571_v40  ;;  %v572_v49 = vmax.f32 %v562_v41, 0.0  ;;  %v6085_v1 = vpack.c.bf16 %v1358_v63, %v1358_v63 }
  0xf3   : > { %v814_v47 = vld [vmem:[#allocation2 + $0x11] sm:$0xff]  ;;  %v763_v50 = vpack.c.bf16 %v762_v46, %v762_v46  ;;  %582 = vst.msk [vmem:[#allocation2 + $0x51] sm:$0xff] %vm386_vm3, %v569_v44  ;;  %v570_v52 = vmax.f32 %v554_v45, 0.0  ;;  %v1774_v25 = vld [vmem:[#allocation2 + $0x40] sm:$0xff] }
  0xf4   : > { %v815_v51 = vpack.c.bf16 %v814_v47, %v814_v47  ;;  %588 = vst.msk [vmem:[#allocation2 + $0x81] sm:$0xff] %vm386_vm3, %v572_v49  ;;  %v866_v53 = vld [vmem:[#allocation2 + $0x12] sm:$0xff]  ;;  %v918_v54 = vld [vmem:[#allocation2 + $0x20] sm:$0xff]  ;;  %v6140_v26 = vpack.c.bf16 %v1774_v25, %v1774_v25 }
  0xf5   : > { %5329 = vmatmul.mubr.msk.bf16.vlgmr.msra.gmra.mrb[8].mxu0 %vm386_vm3, %v763_v50  ;;  %584 = vst.msk [vmem:[#allocation2 + $0x61] sm:$0xff] %vm386_vm3, %v570_v52  ;;  %v867_v57 = vpack.c.bf16 %v866_v53, %v866_v53  ;;  %v6027_v58 = vpack.c.bf16 %v918_v54, %v918_v54  ;;  %v970_v59 = vld [vmem:[#allocation2 + $0x21] sm:$0xff]  ;;  %v1404_v0 = vld [vmem:[#allocation2 + $0x31] sm:$0xff]  ;;  %v755_v18 = vpop.f32.mrb[8].mxu1 }
  0xf6   : > { %5335 = vmatmul.mubr.msk.bf16.vlgmr.msra.gmra.mrb[12].mxu1 %vm386_vm3, %v815_v51  ;;  %5339 = vmatpush3.bf16.msra.mxu0 %v5996_v43  ;;  %v1022_v60 = vld [vmem:[#allocation2 + $0x22] sm:$0xff]  ;;  %v971_v61 = vpack.c.bf16 %v970_v59, %v970_v59  ;;  %v6087_v3 = vpack.c.bf16 %v1404_v0, %v1404_v0  ;;  %v1450_v4 = vld [vmem:[#allocation2 + $0x32] sm:$0xff]  ;;  %v6126_v19 = vadd.f32 %v755_v18, %v705_v13  ;;  %v5324_v22 = vpop.f32.mrb[9].mxu1 }
  0xf7   : > { %5345 = vmatpush3.bf16.msra.mxu1 %v6001_v48  ;;  %5340 = vmatprep.mubr.msk.bf16.mxu0 %vm5808_vm2, %v5807_v5  ;;  %v6040_v62 = vpack.c.bf16 %v1022_v60, %v1022_v60  ;;  %v6101_v6 = vpack.c.bf16 %v1450_v4, %v1450_v4  ;;  %v758_v23 = vpop.f32.mrb[10].mxu1  ;;  %v1820_v27 = vld [vmem:[#allocation2 + $0x41] sm:$0xff] }
  0xf8   : > { %5346 = vmatprep.mubr.msk.bf16.mxu1 %vm5808_vm2, %v5807_v5  ;;  %5350 = vmatprep.subr.bf16.mxu0 %v5807_v5  ;;  %v5325_v24 = vpop.f32.mrb[11].mxu1  ;;  %v1866_v28 = vld [vmem:[#allocation2 + $0x42] sm:$0xff]  ;;  %v6154_v29 = vpack.c.bf16 %v1820_v27, %v1820_v27 }
  0xf9   : > { %5356 = vmatprep.subr.bf16.mxu1 %v5807_v5  ;;  %v6156_v30 = vpack.c.bf16 %v1866_v28, %v1866_v28  ;;  %v3022_v44 = vld [vmem:[#allocation2 + $0x70] sm:$0xff]  ;;  %v6413_v24 = vld [vmem:[%s7040_s4] ss:$0 sm:$0xff] }
  0xfa   : > { %v2190_v31 = vld [vmem:[#allocation2 + $0x50] sm:$0xff]  ;;  %v6343_v46 = vpack.c.bf16 %v3022_v44, %v3022_v44 }
  0xfb   : > { %v2236_v32 = vld [vmem:[#allocation2 + $0x51] sm:$0xff]  ;;  %v2191_v33 = vpack.c.bf16 %v2190_v31, %v2190_v31  ;;  %v3484_v16 = vld [vmem:[#allocation2 + $0x81] sm:$0xff] }
  0xfc   : > { %v2237_v34 = vpack.c.bf16 %v2236_v32, %v2236_v32  ;;  %v2282_v35 = vld [vmem:[#allocation2 + $0x52] sm:$0xff]  ;;  %v2606_v37 = vld [vmem:[#allocation2 + $0x60] sm:$0xff] }
  0xfd   : > { %5341 = vmatmul.mubr.msk.bf16.vlgmr.msra.gmra.mrb[12].mxu0 %vm386_vm3, %v867_v57  ;;  %v2283_v36 = vpack.c.bf16 %v2282_v35, %v2282_v35  ;;  %v6289_v38 = vpack.c.bf16 %v2606_v37, %v2606_v37  ;;  %v2652_v39 = vld [vmem:[#allocation2 + $0x61] sm:$0xff]  ;;  %v3068_v45 = vld [vmem:[#allocation2 + $0x71] sm:$0xff] }
  0xfe   : > { %5347 = vmatmul.mubr.msk.bf16.vlgmr.msra.gmra.mrb[16].mxu1 %vm386_vm3, %v6027_v58  ;;  %5351 = vmatpush3.bf16.msra.mxu0 %v6020_v55  ;;  %v2698_v40 = vld [vmem:[#allocation2 + $0x62] sm:$0xff]  ;;  %v2653_v41 = vpack.c.bf16 %v2652_v39, %v2652_v39  ;;  %v6345_v47 = vpack.c.bf16 %v3068_v45, %v3068_v45  ;;  %v3114_v49 = vld [vmem:[#allocation2 + $0x72] sm:$0xff] }
  0xff   : > { %5357 = vmatpush3.bf16.msra.mxu1 %v6025_v56  ;;  %5352 = vmatprep.mubr.msk.bf16.mxu0 %vm5808_vm2, %v5807_v5  ;;  %v2699_v42 = vpack.c.bf16 %v2698_v40, %v2698_v40  ;;  %v3530_v18 = vld [vmem:[#allocation2 + $0x82] sm:$0xff] }
 0x100   : > { %5358 = vmatprep.mubr.msk.bf16.mxu1 %vm5808_vm2, %v5807_v5  ;;  %5362 = vmatprep.subr.bf16.mxu0 %v5807_v5  ;;  %v6417_v31 = vpack.c.bf16 %v3530_v18, %v3530_v18 }
 0x101   : > { %5368 = vmatprep.subr.bf16.mxu1 %v5807_v5 }
 0x105   : > { %5353 = vmatmul.mubr.msk.bf16.vlgmr.msra.gmra.mrb[16].mxu0 %vm386_vm3, %v971_v61 }
 0x106   : > { %5359 = vmatmul.mubr.msk.bf16.vlgmr.msra.gmra.mrb[20].mxu1 %vm386_vm3, %v6040_v62  ;;  %5363 = vmatpush3.bf16.msra.mxu0 %v5888_v2 }
 0x107   : > { %5369 = vmatpush3.bf16.msra.mxu1 %v5949_v12  ;;  %5364 = vmatprep.mubr.msk.bf16.mxu0 %vm5808_vm2, %v5807_v5 }
 0x108   : > { %5370 = vmatprep.mubr.msk.bf16.mxu1 %vm5808_vm2, %v5807_v5  ;;  %5374 = vmatprep.subr.bf16.mxu0 %v5807_v5 }
 0x109   : > { %5380 = vmatprep.subr.bf16.mxu1 %v5807_v5 }
 0x10d   : > { %5365 = vmatmul.mubr.msk.bf16.vlgmr.msra.gmra.mrb[20].mxu0 %vm386_vm3, %v815_v51 }
 0x10e   : > { %5371 = vmatmul.mubr.msk.bf16.vlgmr.msra.gmra.mrb[24].mxu1 %vm386_vm3, %v763_v50  ;;  %5375 = vmatpush3.bf16.msra.mxu0 %v5960_v17  ;;  %v6359_v50 = vpack.c.bf16 %v3114_v49, %v3114_v49 }
 0x10f   : > { %5381 = vmatpush3.bf16.msra.mxu1 %v5975_v20  ;;  %5376 = vmatprep.mubr.msk.bf16.mxu0 %vm5808_vm2, %v5807_v5 }
 0x110   : > { %5382 = vmatprep.mubr.msk.bf16.mxu1 %vm5808_vm2, %v5807_v5  ;;  %5386 = vmatprep.subr.bf16.mxu0 %v5807_v5 }
 0x111   : > { %5392 = vmatprep.subr.bf16.mxu1 %v5807_v5 }
 0x115   : > { %5377 = vmatmul.mubr.msk.bf16.vlgmr.msra.gmra.mrb[24].mxu0 %vm386_vm3, %v867_v57 }
 0x116   : > { %5383 = vmatmul.mubr.msk.bf16.vlgmr.msra.gmra.mrb[28].mxu1 %vm386_vm3, %v6027_v58  ;;  %5387 = vmatpush3.bf16.msra.mxu0 %v5981_v21 }
 0x117   : > { %5393 = vmatpush3.bf16.msra.mxu1 %v5996_v43  ;;  %5388 = vmatprep.mubr.msk.bf16.mxu0 %vm5808_vm2, %v5807_v5 }
 0x118   : > { %5394 = vmatprep.mubr.msk.bf16.mxu1 %vm5808_vm2, %v5807_v5  ;;  %5398 = vmatprep.subr.bf16.mxu0 %v5807_v5 }
 0x119   : > { %5404 = vmatprep.subr.bf16.mxu1 %v5807_v5 }
 0x11d   : > { %5389 = vmatmul.mubr.msk.bf16.vlgmr.msra.gmra.mrb[28].mxu0 %vm386_vm3, %v971_v61 }
 0x11e   : > { %5395 = vmatmul.mubr.msk.bf16.vlgmr.msra.gmra.mrb[32].mxu1 %vm386_vm3, %v6040_v62  ;;  %5399 = vmatpush3.bf16.msra.mxu0 %v6001_v48 }
 0x11f   : > { %5405 = vmatpush3.bf16.msra.mxu1 %v6020_v55  ;;  %5400 = vmatprep.mubr.msk.bf16.mxu0 %vm5808_vm2, %v5807_v5 }
 0x120   : > { %5406 = vmatprep.mubr.msk.bf16.mxu1 %vm5808_vm2, %v5807_v5  ;;  %5410 = vmatprep.subr.bf16.mxu0 %v5807_v5 }
 0x121   : > { %5416 = vmatprep.subr.bf16.mxu1 %v5807_v5 }
 0x125   : > { %5401 = vmatmul.mubr.msk.bf16.vlgmr.msra.gmra.mrb[32].mxu0 %vm386_vm3, %v6085_v1 }
 0x126   : > { %5407 = vmatmul.mubr.msk.bf16.vlgmr.msra.gmra.mrb[36].mxu1 %vm386_vm3, %v6087_v3  ;;  %5411 = vmatpush3.bf16.msra.mxu0 %v6025_v56 }
 0x127   : > { %5417 = vmatpush3.bf16.msra.mxu1 %v5888_v2  ;;  %5412 = vmatprep.mubr.msk.bf16.mxu0 %vm5808_vm2, %v5807_v5 }
 0x128   : > { %5418 = vmatprep.mubr.msk.bf16.mxu1 %vm5808_vm2, %v5807_v5  ;;  %5422 = vmatprep.subr.bf16.mxu0 %v5807_v5 }
 0x129   : > { %5428 = vmatprep.subr.bf16.mxu1 %v5807_v5 }
 0x12d   : > { %5413 = vmatmul.mubr.msk.bf16.vlgmr.msra.gmra.mrb[36].mxu0 %vm386_vm3, %v6101_v6 }
 0x12e   : > { %5419 = vmatmul.mubr.msk.bf16.vlgmr.msra.gmra.mrb[40].mxu1 %vm386_vm3, %v971_v61  ;;  %5423 = vmatpush3.bf16.msra.mxu0 %v5949_v12 }
 0x12f   : > { %5429 = vmatpush3.bf16.msra.mxu1 %v5960_v17  ;;  %5424 = vmatprep.mubr.msk.bf16.mxu0 %vm5808_vm2, %v5807_v5 }
 0x130   : > { %5430 = vmatprep.mubr.msk.bf16.mxu1 %vm5808_vm2, %v5807_v5  ;;  %5434 = vmatprep.subr.bf16.mxu0 %v5807_v5 }
 0x131   : > { %5440 = vmatprep.subr.bf16.mxu1 %v5807_v5 }
 0x135   : > { %5425 = vmatmul.mubr.msk.bf16.vlgmr.msra.gmra.mrb[40].mxu0 %vm386_vm3, %v6027_v58 }
 0x136   : > { %5431 = vmatmul.mubr.msk.bf16.vlgmr.msra.gmra.mrb[44].mxu1 %vm386_vm3, %v6040_v62  ;;  %5435 = vmatpush3.bf16.msra.mxu0 %v5975_v20 }
 0x137   : > { %5441 = vmatpush3.bf16.msra.mxu1 %v5981_v21  ;;  %5436 = vmatprep.mubr.msk.bf16.mxu0 %vm5808_vm2, %v5807_v5 }
 0x138   : > { %5442 = vmatprep.mubr.msk.bf16.mxu1 %vm5808_vm2, %v5807_v5  ;;  %5446 = vmatprep.subr.bf16.mxu0 %v5807_v5 }
 0x139   : > { %5452 = vmatprep.subr.bf16.mxu1 %v5807_v5 }
 0x13d   : > { %5437 = vmatmul.mubr.msk.bf16.vlgmr.msra.gmra.mrb[44].mxu0 %vm386_vm3, %v6085_v1 }
 0x13e   : > { %5443 = vmatmul.mubr.msk.bf16.vlgmr.msra.gmra.mrb[48].mxu1 %vm386_vm3, %v6087_v3  ;;  %5447 = vmatpush3.bf16.msra.mxu0 %v5996_v43 }
 0x13f   : > { %5453 = vmatpush3.bf16.msra.mxu1 %v6001_v48  ;;  %5448 = vmatprep.mubr.msk.bf16.mxu0 %vm5808_vm2, %v5807_v5 }
 0x140   : > { %5454 = vmatprep.mubr.msk.bf16.mxu1 %vm5808_vm2, %v5807_v5  ;;  %5458 = vmatprep.subr.bf16.mxu0 %v5807_v5 }
 0x141   : > { %5464 = vmatprep.subr.bf16.mxu1 %v5807_v5 }
 0x145   : > { %5449 = vmatmul.mubr.msk.bf16.vlgmr.msra.gmra.mrb[48].mxu0 %vm386_vm3, %v6101_v6 }
 0x146   : > { %5455 = vmatmul.mubr.msk.bf16.vlgmr.msra.gmra.mrb[52].mxu1 %vm386_vm3, %v6140_v26  ;;  %5459 = vmatpush3.bf16.msra.mxu0 %v6020_v55 }
 0x147   : > { %5465 = vmatpush3.bf16.msra.mxu1 %v6025_v56  ;;  %5460 = vmatprep.mubr.msk.bf16.mxu0 %vm5808_vm2, %v5807_v5 }
 0x148   : > { %5466 = vmatprep.mubr.msk.bf16.mxu1 %vm5808_vm2, %v5807_v5  ;;  %5470 = vmatprep.subr.bf16.mxu0 %v5807_v5 }
 0x149   : > { %5476 = vmatprep.subr.bf16.mxu1 %v5807_v5 }
 0x14d   : > { %5461 = vmatmul.mubr.msk.bf16.vlgmr.msra.gmra.mrb[52].mxu0 %vm386_vm3, %v6154_v29 }
 0x14e   : > { %5467 = vmatmul.mubr.msk.bf16.vlgmr.msra.gmra.mrb[56].mxu1 %vm386_vm3, %v6156_v30  ;;  %5471 = vmatpush3.bf16.msra.mxu0 %v5888_v2 }
 0x14f   : > { %5477 = vmatpush3.bf16.msra.mxu1 %v5949_v12  ;;  %5472 = vmatprep.mubr.msk.bf16.mxu0 %vm5808_vm2, %v5807_v5 }
 0x150   : > { %5478 = vmatprep.mubr.msk.bf16.mxu1 %vm5808_vm2, %v5807_v5  ;;  %5482 = vmatprep.subr.bf16.mxu0 %v5807_v5 }
 0x151   : > { %5488 = vmatprep.subr.bf16.mxu1 %v5807_v5 }
 0x155   : > { %5473 = vmatmul.mubr.msk.bf16.vlgmr.msra.gmra.mrb[56].mxu0 %vm386_vm3, %v6087_v3 }
 0x156   : > { %5479 = vmatmul.mubr.msk.bf16.vlgmr.msra.gmra.mrb[60].mxu1 %vm386_vm3, %v6085_v1  ;;  %5483 = vmatpush3.bf16.msra.mxu0 %v5960_v17  ;;  %v3438_v1 = vld [vmem:[#allocation2 + $0x80] sm:$0xff] }
 0x157   : > { %5489 = vmatpush3.bf16.msra.mxu1 %v5975_v20  ;;  %5484 = vmatprep.mubr.msk.bf16.mxu0 %vm5808_vm2, %v5807_v5  ;;  %v6396_v13 = vpack.c.bf16 %v3438_v1, %v3438_v1 }
 0x158   : > { %5490 = vmatprep.mubr.msk.bf16.mxu1 %vm5808_vm2, %v5807_v5  ;;  %5494 = vmatprep.subr.bf16.mxu0 %v5807_v5 }
 0x159   : > { %5500 = vmatprep.subr.bf16.mxu1 %v5807_v5 }
 0x15d   : > { %5485 = vmatmul.mubr.msk.bf16.vlgmr.msra.gmra.mrb[60].mxu0 %vm386_vm3, %v6101_v6 }
 0x15e   : > { %5491 = vmatmul.mubr.msk.bf16.vlgmr.msra.gmra.mrb[64].mxu1 %vm386_vm3, %v6140_v26  ;;  %5495 = vmatpush3.bf16.msra.mxu0 %v5981_v21 }
 0x15f   : > { %5501 = vmatpush3.bf16.msra.mxu1 %v5996_v43  ;;  %5496 = vmatprep.mubr.msk.bf16.mxu0 %vm5808_vm2, %v5807_v5 }
 0x160   : > { %5502 = vmatprep.mubr.msk.bf16.mxu1 %vm5808_vm2, %v5807_v5  ;;  %5506 = vmatprep.subr.bf16.mxu0 %v5807_v5 }
 0x161   : > { %5512 = vmatprep.subr.bf16.mxu1 %v5807_v5 }
 0x165   : > { %5497 = vmatmul.mubr.msk.bf16.vlgmr.msra.gmra.mrb[64].mxu0 %vm386_vm3, %v6154_v29 }
 0x166   : > { %5503 = vmatmul.mubr.msk.bf16.vlgmr.msra.gmra.mrb[68].mxu1 %vm386_vm3, %v6156_v30  ;;  %5507 = vmatpush3.bf16.msra.mxu0 %v6001_v48 }
 0x167   : > { %5513 = vmatpush3.bf16.msra.mxu1 %v6020_v55  ;;  %5508 = vmatprep.mubr.msk.bf16.mxu0 %vm5808_vm2, %v5807_v5 }
 0x168   : > { %5514 = vmatprep.mubr.msk.bf16.mxu1 %vm5808_vm2, %v5807_v5  ;;  %5518 = vmatprep.subr.bf16.mxu0 %v5807_v5 }
 0x169   : > { %5524 = vmatprep.subr.bf16.mxu1 %v5807_v5 }
 0x16d   : > { %5509 = vmatmul.mubr.msk.bf16.vlgmr.msra.gmra.mrb[68].mxu0 %vm386_vm3, %v2191_v33 }
 0x16e   : > { %5515 = vmatmul.mubr.msk.bf16.vlgmr.msra.gmra.mrb[72].mxu1 %vm386_vm3, %v2237_v34  ;;  %5519 = vmatpush3.bf16.msra.mxu0 %v6025_v56 }
 0x16f   : > { %5525 = vmatpush3.bf16.msra.mxu1 %v5888_v2  ;;  %5520 = vmatprep.mubr.msk.bf16.mxu0 %vm5808_vm2, %v5807_v5 }
 0x170   : > { %5526 = vmatprep.mubr.msk.bf16.mxu1 %vm5808_vm2, %v5807_v5  ;;  %5530 = vmatprep.subr.bf16.mxu0 %v5807_v5 }
 0x171   : > { %5536 = vmatprep.subr.bf16.mxu1 %v5807_v5 }
 0x175   : > { %5521 = vmatmul.mubr.msk.bf16.vlgmr.msra.gmra.mrb[72].mxu0 %vm386_vm3, %v2283_v36 }
 0x176   : > { %5527 = vmatmul.mubr.msk.bf16.vlgmr.msra.gmra.mrb[76].mxu1 %vm386_vm3, %v6154_v29  ;;  %5531 = vmatpush3.bf16.msra.mxu0 %v5949_v12 }
 0x177   : > { %5537 = vmatpush3.bf16.msra.mxu1 %v5960_v17  ;;  %5532 = vmatprep.mubr.msk.bf16.mxu0 %vm5808_vm2, %v5807_v5 }
 0x178   : > { %5538 = vmatprep.mubr.msk.bf16.mxu1 %vm5808_vm2, %v5807_v5  ;;  %5542 = vmatprep.subr.bf16.mxu0 %v5807_v5 }
 0x179   : > { %5548 = vmatprep.subr.bf16.mxu1 %v5807_v5 }
 0x17d   : > { %5533 = vmatmul.mubr.msk.bf16.vlgmr.msra.gmra.mrb[76].mxu0 %vm386_vm3, %v6140_v26 }
 0x17e   : > { %5539 = vmatmul.mubr.msk.bf16.vlgmr.msra.gmra.mrb[80].mxu1 %vm386_vm3, %v6156_v30  ;;  %5543 = vmatpush3.bf16.msra.mxu0 %v5975_v20  ;;  %v6415_v30 = vpack.c.bf16 %v3484_v16, %v3484_v16 }
 0x17f   : > { %5549 = vmatpush3.bf16.msra.mxu1 %v5981_v21  ;;  %5544 = vmatprep.mubr.msk.bf16.mxu0 %vm5808_vm2, %v5807_v5 }
 0x180   : > { %5550 = vmatprep.mubr.msk.bf16.mxu1 %vm5808_vm2, %v5807_v5  ;;  %5554 = vmatprep.subr.bf16.mxu0 %v5807_v5 }
 0x181   : > { %5560 = vmatprep.subr.bf16.mxu1 %v5807_v5 }
 0x185   : > { %5545 = vmatmul.mubr.msk.bf16.vlgmr.msra.gmra.mrb[80].mxu0 %vm386_vm3, %v2191_v33 }
 0x186   : > { %5551 = vmatmul.mubr.msk.bf16.vlgmr.msra.gmra.mrb[84].mxu1 %vm386_vm3, %v2237_v34  ;;  %5555 = vmatpush3.bf16.msra.mxu0 %v5996_v43 }
 0x187   : > { %5561 = vmatpush3.bf16.msra.mxu1 %v6001_v48  ;;  %5556 = vmatprep.mubr.msk.bf16.mxu0 %vm5808_vm2, %v5807_v5 }
 0x188   : > { %5562 = vmatprep.mubr.msk.bf16.mxu1 %vm5808_vm2, %v5807_v5  ;;  %5566 = vmatprep.subr.bf16.mxu0 %v5807_v5 }
 0x189   : > { %5572 = vmatprep.subr.bf16.mxu1 %v5807_v5 }
 0x18d   : > { %5557 = vmatmul.mubr.msk.bf16.vlgmr.msra.gmra.mrb[84].mxu0 %vm386_vm3, %v2283_v36 }
 0x18e   : > { %5563 = vmatmul.mubr.msk.bf16.vlgmr.msra.gmra.mrb[88].mxu1 %vm386_vm3, %v6289_v38  ;;  %5567 = vmatpush3.bf16.msra.mxu0 %v6020_v55 }
 0x18f   : > { %5573 = vmatpush3.bf16.msra.mxu1 %v6025_v56  ;;  %5568 = vmatprep.mubr.msk.bf16.mxu0 %vm5808_vm2, %v5807_v5 }
 0x190   : > { %5574 = vmatprep.mubr.msk.bf16.mxu1 %vm5808_vm2, %v5807_v5  ;;  %5578 = vmatprep.subr.bf16.mxu0 %v5807_v5 }
 0x191   : > { %5584 = vmatprep.subr.bf16.mxu1 %v5807_v5 }
 0x195   : > { %5569 = vmatmul.mubr.msk.bf16.vlgmr.msra.gmra.mrb[88].mxu0 %vm386_vm3, %v2653_v41 }
 0x196   : > { %5575 = vmatmul.mubr.msk.bf16.vlgmr.msra.gmra.mrb[92].mxu1 %vm386_vm3, %v2699_v42  ;;  %5579 = vmatpush3.bf16.msra.mxu0 %v5888_v2 }
 0x197   : > { %5585 = vmatpush3.bf16.msra.mxu1 %v5949_v12  ;;  %5580 = vmatprep.mubr.msk.bf16.mxu0 %vm5808_vm2, %v5807_v5 }
 0x198   : > { %5586 = vmatprep.mubr.msk.bf16.mxu1 %vm5808_vm2, %v5807_v5  ;;  %5590 = vmatprep.subr.bf16.mxu0 %v5807_v5 }
 0x199   : > { %5596 = vmatprep.subr.bf16.mxu1 %v5807_v5 }
 0x19d   : > { %5581 = vmatmul.mubr.msk.bf16.vlgmr.msra.gmra.mrb[92].mxu0 %vm386_vm3, %v2237_v34 }
 0x19e   : > { %5587 = vmatmul.mubr.msk.bf16.vlgmr.msra.gmra.mrb[96].mxu1 %vm386_vm3, %v2191_v33  ;;  %5591 = vmatpush3.bf16.msra.mxu0 %v5960_v17 }
 0x19f   : > { %5597 = vmatpush3.bf16.msra.mxu1 %v5975_v20  ;;  %5592 = vmatprep.mubr.msk.bf16.mxu0 %vm5808_vm2, %v5807_v5 }
 0x1a0   : > { %5598 = vmatprep.mubr.msk.bf16.mxu1 %vm5808_vm2, %v5807_v5  ;;  %5602 = vmatprep.subr.bf16.mxu0 %v5807_v5 }
 0x1a1   : > { %5608 = vmatprep.subr.bf16.mxu1 %v5807_v5 }
 0x1a5   : > { %5593 = vmatmul.mubr.msk.bf16.vlgmr.msra.gmra.mrb[96].mxu0 %vm386_vm3, %v2283_v36 }
 0x1a6   : > { %5599 = vmatmul.mubr.msk.bf16.vlgmr.msra.gmra.mrb[100].mxu1 %vm386_vm3, %v6289_v38  ;;  %5603 = vmatpush3.bf16.msra.mxu0 %v5981_v21 }
 0x1a7   : > { %5609 = vmatpush3.bf16.msra.mxu1 %v5996_v43  ;;  %5604 = vmatprep.mubr.msk.bf16.mxu0 %vm5808_vm2, %v5807_v5 }
 0x1a8   : > { %5610 = vmatprep.mubr.msk.bf16.mxu1 %vm5808_vm2, %v5807_v5  ;;  %5614 = vmatprep.subr.bf16.mxu0 %v5807_v5 }
 0x1a9   : > { %5620 = vmatprep.subr.bf16.mxu1 %v5807_v5 }
 0x1ad   : > { %5605 = vmatmul.mubr.msk.bf16.vlgmr.msra.gmra.mrb[100].mxu0 %vm386_vm3, %v2653_v41 }
 0x1ae   : > { %5611 = vmatmul.mubr.msk.bf16.vlgmr.msra.gmra.mrb[104].mxu1 %vm386_vm3, %v2699_v42  ;;  %5615 = vmatpush3.bf16.msra.mxu0 %v6001_v48 }
 0x1af   : > { %5621 = vmatpush3.bf16.msra.mxu1 %v6020_v55  ;;  %5616 = vmatprep.mubr.msk.bf16.mxu0 %vm5808_vm2, %v5807_v5 }
 0x1b0   : > { %5622 = vmatprep.mubr.msk.bf16.mxu1 %vm5808_vm2, %v5807_v5  ;;  %5626 = vmatprep.subr.bf16.mxu0 %v5807_v5 }
 0x1b1   : > { %5632 = vmatprep.subr.bf16.mxu1 %v5807_v5 }
 0x1b5   : > { %5617 = vmatmul.mubr.msk.bf16.vlgmr.msra.gmra.mrb[104].mxu0 %vm386_vm3, %v6343_v46 }
 0x1b6   : > { %5623 = vmatmul.mubr.msk.bf16.vlgmr.msra.gmra.mrb[108].mxu1 %vm386_vm3, %v6345_v47  ;;  %5627 = vmatpush3.bf16.msra.mxu0 %v6025_v56 }
 0x1b7   : > { %5633 = vmatpush3.bf16.msra.mxu1 %v5888_v2  ;;  %5628 = vmatprep.mubr.msk.bf16.mxu0 %vm5808_vm2, %v5807_v5 }
 0x1b8   : > { %5634 = vmatprep.mubr.msk.bf16.mxu1 %vm5808_vm2, %v5807_v5  ;;  %5638 = vmatprep.subr.bf16.mxu0 %v5807_v5 }
 0x1b9   : > { %5644 = vmatprep.subr.bf16.mxu1 %v5807_v5 }
 0x1bd   : > { %5629 = vmatmul.mubr.msk.bf16.vlgmr.msra.gmra.mrb[108].mxu0 %vm386_vm3, %v6359_v50 }
 0x1be   : > { %5635 = vmatmul.mubr.msk.bf16.vlgmr.msra.gmra.mrb[112].mxu1 %vm386_vm3, %v2653_v41  ;;  %5639 = vmatpush3.bf16.msra.mxu0 %v5949_v12 }
 0x1bf   : > { %5645 = vmatpush3.bf16.msra.mxu1 %v5960_v17  ;;  %5640 = vmatprep.mubr.msk.bf16.mxu0 %vm5808_vm2, %v5807_v5 }
 0x1c0   : > { %5646 = vmatprep.mubr.msk.bf16.mxu1 %vm5808_vm2, %v5807_v5  ;;  %5650 = vmatprep.subr.bf16.mxu0 %v5807_v5 }
 0x1c1   : > { %5656 = vmatprep.subr.bf16.mxu1 %v5807_v5 }
 0x1c5   : > { %5641 = vmatmul.mubr.msk.bf16.vlgmr.msra.gmra.mrb[112].mxu0 %vm386_vm3, %v6289_v38 }
 0x1c6   : > { %5647 = vmatmul.mubr.msk.bf16.vlgmr.msra.gmra.mrb[116].mxu1 %vm386_vm3, %v2699_v42  ;;  %5651 = vmatpush3.bf16.msra.mxu0 %v5975_v20 }
 0x1c7   : > { %5657 = vmatpush3.bf16.msra.mxu1 %v5981_v21  ;;  %5652 = vmatprep.mubr.msk.bf16.mxu0 %vm5808_vm2, %v5807_v5 }
 0x1c8   : > { %5658 = vmatprep.mubr.msk.bf16.mxu1 %vm5808_vm2, %v5807_v5  ;;  %v807_v51 = vpop.f32.mrb[8].mxu0  ;;  %5662 = vmatprep.subr.bf16.mxu0 %v5807_v5 }
 0x1c9   : > { %v859_v52 = vpop.f32.mrb[12].mxu1  ;;  %5668 = vmatprep.subr.bf16.mxu1 %v5807_v5  ;;  %v813_v53 = vadd.f32 %v807_v51, %v6126_v19  ;;  %v5330_v54 = vpop.f32.mrb[9].mxu0 }
 0x1ca   : > { %v5336_v57 = vpop.f32.mrb[13].mxu1  ;;  %v810_v58 = vpop.f32.mrb[10].mxu0 }
 0x1cb   : > { %v862_v59 = vpop.f32.mrb[14].mxu1  ;;  %v865_v60 = vadd.f32 %v859_v52, %v813_v53  ;;  %v5331_v61 = vpop.f32.mrb[11].mxu0  ;;  %v6453_v58 = vld [vmem:[#allocation3 + $0x8] sm:$0x3] }
 0x1cc   : > { %v5337_v62 = vpop.f32.mrb[15].mxu1 }
 0x1cd   : > { %5653 = vmatmul.mubr.msk.bf16.vlgmr.msra.gmra.mrb[116].mxu0 %vm386_vm3, %v6343_v46 }
 0x1ce   : > { %5659 = vmatmul.mubr.msk.bf16.vlgmr.msra.gmra.mrb[120].mxu1 %vm386_vm3, %v6345_v47  ;;  %5663 = vmatpush3.bf16.msra.mxu0 %v5996_v43 }
 0x1cf   : > { %5669 = vmatpush3.bf16.msra.mxu1 %v6001_v48  ;;  %5664 = vmatprep.mubr.msk.bf16.mxu0 %vm5808_vm2, %v5807_v5 }
 0x1d0   : > { %5670 = vmatprep.mubr.msk.bf16.mxu1 %vm5808_vm2, %v5807_v5  ;;  %v911_v63 = vpop.f32.mrb[12].mxu0  ;;  %5674 = vmatprep.subr.bf16.mxu0 %v5807_v5 }
 0x1d1   : > { %v963_v0 = vpop.f32.mrb[16].mxu1  ;;  %5680 = vmatprep.subr.bf16.mxu1 %v5807_v5  ;;  %v917_v3 = vadd.f32 %v911_v63, %v865_v60  ;;  %v5342_v4 = vpop.f32.mrb[13].mxu0  ;;  %v4594_v60 = vsel %vm410_vm7, %v6453_v58, 0.0 }
 0x1d2   : > { %v5348_v6 = vpop.f32.mrb[17].mxu1  ;;  %v914_v7 = vpop.f32.mrb[14].mxu0 }
 0x1d3   : > { %v966_v8 = vpop.f32.mrb[18].mxu1  ;;  %v969_v9 = vadd.f32 %v963_v0, %v917_v3  ;;  %v5343_v10 = vpop.f32.mrb[15].mxu0 }
 0x1d4   : > { %v5349_v11 = vpop.f32.mrb[19].mxu1  ;;  %v3901_v10 = vld [vmem:[#allocation2 + $0x91] sm:$0xff] }
 0x1d5   : > { %5665 = vmatmul.mubr.msk.bf16.vlgmr.msra.gmra.mrb[120].mxu0 %vm386_vm3, %v6359_v50  ;;  %v3902_v18 = vpack.c.bf16 %v3901_v10, %v3901_v10 }
 0x1d6   : > { %5671 = vmatmul.mubr.msk.bf16.vlgmr.msra.gmra.mrb[124].mxu1 %vm386_vm3, %v6396_v13  ;;  %5675 = vmatpush3.bf16.msra.mxu0 %v6020_v55 }
 0x1d7   : > { %5681 = vmatpush3.bf16.msra.mxu1 %v6025_v56  ;;  %5676 = vmatprep.mubr.msk.bf16.mxu0 %vm5808_vm2, %v5807_v5 }
 0x1d8   : > { %5682 = vmatprep.mubr.msk.bf16.mxu1 %vm5808_vm2, %v5807_v5  ;;  %v1015_v14 = vpop.f32.mrb[16].mxu0  ;;  %5686 = vmatprep.subr.bf16.mxu0 %v5807_v5 }
 0x1d9   : > { %v1067_v15 = vpop.f32.mrb[20].mxu1  ;;  %5692 = vmatprep.subr.bf16.mxu1 %v5807_v5  ;;  %v1021_v19 = vadd.f32 %v1015_v14, %v969_v9  ;;  %v5354_v22 = vpop.f32.mrb[17].mxu0  ;;  %v3855_v9 = vld [vmem:[#allocation2 + $0x90] sm:$0xff] }
 0x1da   : > { %v5360_v23 = vpop.f32.mrb[21].mxu1  ;;  %v1018_v25 = vpop.f32.mrb[18].mxu0 }
 0x1db   : > { %v1070_v26 = vpop.f32.mrb[22].mxu1  ;;  %v1073_v27 = vadd.f32 %v1067_v15, %v1021_v19  ;;  %v5355_v28 = vpop.f32.mrb[19].mxu0 }
 0x1dc   : > { %v5361_v29 = vpop.f32.mrb[23].mxu1  ;;  %v3947_v26 = vld [vmem:[#allocation2 + $0x92] sm:$0xff] }
 0x1dd   : > { %v1080_v32 = vadd.f32 %v6413_v24, %v1073_v27  ;;  %5677 = vmatmul.mubr.msk.bf16.vlgmr.msra.gmra.mrb[124].mxu0 %vm386_vm3, %v6415_v30 }
 0x1de   : > { %5683 = vmatmul.mubr.msk.bf16.vlgmr.msra.gmra.mrb[128].mxu1 %vm386_vm3, %v6417_v31  ;;  %5687 = vmatpush3.bf16.msra.mxu0 %v5888_v2 }
 0x1df   : > { %5693 = vmatpush3.bf16.msra.mxu1 %v5949_v12  ;;  %v1081_v33 = vmax.f32 %v1080_v32, 0.0  ;;  %5688 = vmatprep.mubr.msk.bf16.mxu0 %vm5808_vm2, %v5807_v5  ;;  %v3948_v32 = vpack.c.bf16 %v3947_v26, %v3947_v26 }
 0x1e0   : > { %5694 = vmatprep.mubr.msk.bf16.mxu1 %vm5808_vm2, %v5807_v5  ;;  %v1125_v34 = vpop.f32.mrb[20].mxu0  ;;  %5698 = vmatprep.subr.bf16.mxu0 %v5807_v5 }
 0x1e1   : > { %v1168_v35 = vpop.f32.mrb[24].mxu1  ;;  %5704 = vmatprep.subr.bf16.mxu1 %v5807_v5  ;;  %1083 = vst.msk [vmem:[#allocation3 + $0x11] sm:$0xff] %vm408_vm6, %v1081_v33  ;;  %v5366_v37 = vpop.f32.mrb[21].mxu0 }
 0x1e2   : > { %v1169_v36 = vadd.f32 %v1168_v35, %v1125_v34  ;;  %v5372_v2 = vpop.f32.mrb[25].mxu1  ;;  %v1128_v38 = vpop.f32.mrb[22].mxu0 }
 0x1e3   : > { %v1171_v12 = vpop.f32.mrb[26].mxu1  ;;  %v5367_v39 = vpop.f32.mrb[23].mxu0 }
 0x1e4   : > { %v5373_v40 = vpop.f32.mrb[27].mxu1 }
 0x1e5   : > { %5689 = vmatmul.mubr.msk.bf16.vlgmr.msra.gmra.mrb[128].mxu0 %vm386_vm3, %v6345_v47 }
 0x1e6   : > { %5695 = vmatmul.mubr.msk.bf16.vlgmr.msra.gmra.mrb[132].mxu1 %vm386_vm3, %v6343_v46  ;;  %5699 = vmatpush3.bf16.msra.mxu0 %v5960_v17 }
 0x1e7   : > { %5705 = vmatpush3.bf16.msra.mxu1 %v5975_v20  ;;  %5700 = vmatprep.mubr.msk.bf16.mxu0 %vm5808_vm2, %v5807_v5  ;;  %v6447_v20 = vld [vmem:[#allocation3] sm:$0xff] }
 0x1e8   : > { %5706 = vmatprep.mubr.msk.bf16.mxu1 %vm5808_vm2, %v5807_v5  ;;  %v1213_v41 = vpop.f32.mrb[24].mxu0  ;;  %5710 = vmatprep.subr.bf16.mxu0 %v5807_v5  ;;  %v6445_v47 = vld [vmem:[#allocation3 + $0x10] sm:$0xff]  ;;  %v4575_v53 = vsel %vm408_vm6, %v6447_v20, 0.0  ;;  %v6451_v54 = vld [vmem:[#allocation3 + $0x18] sm:$0x3] }
 0x1e9   : > { %v1259_v42 = vpop.f32.mrb[28].mxu1  ;;  %5716 = vmatprep.subr.bf16.mxu1 %v5807_v5  ;;  %v5378_v44 = vpop.f32.mrb[25].mxu0  ;;  %v1219_v46 = vadd.f32 %v1213_v41, %v1169_v36  ;;  %v4576_v59 = vsel %vm408_vm6, %v6445_v47, 0.0 }
 0x1ea   : > { %v5384_v45 = vpop.f32.mrb[29].mxu1  ;;  %v1216_v17 = vpop.f32.mrb[26].mxu0  ;;  %v6465_v61 = vadd.f32 %v4576_v59, %v4575_v53 }
 0x1eb   : > { %v1262_v49 = vpop.f32.mrb[30].mxu1  ;;  %v5379_v51 = vpop.f32.mrb[27].mxu0  ;;  %v1265_v57 = vadd.f32 %v1259_v42, %v1219_v46 }
 0x1ec   : > { %v5385_v52 = vpop.f32.mrb[31].mxu1 }
 0x1ed   : > { %5701 = vmatmul.mubr.msk.bf16.vlgmr.msra.gmra.mrb[132].mxu0 %vm386_vm3, %v6359_v50  ;;  %v4595_v50 = vsel %vm410_vm7, %v6451_v54, 0.0 }
 0x1ee   : > { %5707 = vmatmul.mubr.msk.bf16.vlgmr.msra.gmra.mrb[136].mxu1 %vm386_vm3, %v6396_v13  ;;  %5711 = vmatpush3.bf16.msra.mxu0 %v5981_v21  ;;  %v6475_v21 = vadd.f32 %v4595_v50, %v4594_v60 }
 0x1ef   : > { %5717 = vmatpush3.bf16.msra.mxu1 %v5996_v43  ;;  %5712 = vmatprep.mubr.msk.bf16.mxu0 %vm5808_vm2, %v5807_v5 }
 0x1f0   : > { %5718 = vmatprep.mubr.msk.bf16.mxu1 %vm5808_vm2, %v5807_v5  ;;  %v1305_v62 = vpop.f32.mrb[28].mxu0  ;;  %5722 = vmatprep.subr.bf16.mxu0 %v5807_v5 }
 0x1f1   : > { %v1351_v63 = vpop.f32.mrb[32].mxu1  ;;  %5728 = vmatprep.subr.bf16.mxu1 %v5807_v5  ;;  %v1311_v43 = vadd.f32 %v1305_v62, %v1265_v57  ;;  %v5390_v0 = vpop.f32.mrb[29].mxu0 }
 0x1f2   : > { %v5396_v1 = vpop.f32.mrb[33].mxu1  ;;  %v1308_v3 = vpop.f32.mrb[30].mxu0 }
 0x1f3   : > { %v1354_v4 = vpop.f32.mrb[34].mxu1  ;;  %v1357_v6 = vadd.f32 %v1351_v63, %v1311_v43  ;;  %v5391_v7 = vpop.f32.mrb[31].mxu0 }
 0x1f4   : > { %v5397_v8 = vpop.f32.mrb[35].mxu1 }
 0x1f5   : > { %5713 = vmatmul.mubr.msk.bf16.vlgmr.msra.gmra.mrb[136].mxu0 %vm386_vm3, %v6415_v30 }
 0x1f6   : > { %5719 = vmatmul.mubr.msk.bf16.vlgmr.msra.gmra.mrb[140].mxu1 %vm386_vm3, %v6417_v31  ;;  %5723 = vmatpush3.bf16.msra.mxu0 %v6001_v48  ;;  %v3856_v48 = vpack.c.bf16 %v3855_v9, %v3855_v9 }
 0x1f7   : > { %5729 = vmatpush3.bf16.msra.mxu1 %v6020_v55  ;;  %5724 = vmatprep.mubr.msk.bf16.mxu0 %vm5808_vm2, %v5807_v5 }
 0x1f8   : > { %5734 = vmatprep.subr.bf16.mxu0 %v5807_v5  ;;  %v1397_v11 = vpop.f32.mrb[32].mxu0  ;;  %5730 = vmatprep.mubr.msk.bf16.mxu1 %vm5808_vm2, %v5807_v5 }
 0x1f9   : > { %v1443_v13 = vpop.f32.mrb[36].mxu1  ;;  %5740 = vmatprep.subr.bf16.mxu1 %v5807_v5  ;;  %v1403_v14 = vadd.f32 %v1397_v11, %v1357_v6  ;;  %v5402_v15 = vpop.f32.mrb[33].mxu0 }
 0x1fa   : > { %v5408_v16 = vpop.f32.mrb[37].mxu1  ;;  %v1400_v55 = vpop.f32.mrb[34].mxu0 }
 0x1fb   : > { %v1446_v19 = vpop.f32.mrb[38].mxu1  ;;  %v1449_v22 = vadd.f32 %v1443_v13, %v1403_v14  ;;  %v5403_v23 = vpop.f32.mrb[35].mxu0 }
 0x1fc   : > { %v5409_v25 = vpop.f32.mrb[39].mxu1 }
 0x1fd   : > { %5725 = vmatmul.mubr.msk.bf16.vlgmr.msra.gmra.mrb[140].mxu0 %vm386_vm3, %v3856_v48 }
 0x1fe   : > { %5731 = vmatmul.mubr.msk.bf16.vlgmr.msra.gmra.mrb[144].mxu1 %vm386_vm3, %v3902_v18  ;;  %5735 = vmatpush3.bf16.msra.mxu0 %v6025_v56 }
 0x1ff   : > { %5736 = vmatprep.mubr.msk.bf16.mxu0 %vm5808_vm2, %v5807_v5  ;;  %5744 = vmatprep.mubr.msk.bf16.mxu1 %vm5808_vm2, %v5807_v5 }
 0x200   : > { %v1489_v27 = vpop.f32.mrb[36].mxu0 }
 0x201   : > { %v1541_v28 = vpop.f32.mrb[40].mxu1  ;;  %v1495_v29 = vadd.f32 %v1489_v27, %v1449_v22  ;;  %v5414_v30 = vpop.f32.mrb[37].mxu0 }
 0x202   : > { %v5420_v31 = vpop.f32.mrb[41].mxu1  ;;  %v1492_v33 = vpop.f32.mrb[38].mxu0 }
 0x203   : > { %v1544_v34 = vpop.f32.mrb[42].mxu1  ;;  %v1496_v35 = vadd.f32 %v6413_v24, %v1495_v29  ;;  %v5415_v36 = vpop.f32.mrb[39].mxu0 }
 0x204   : > { %v5421_v37 = vpop.f32.mrb[43].mxu1 }
 0x205   : > { %v1497_v56 = vmax.f32 %v1496_v35, 0.0  ;;  %5737 = vmatmul.mubr.msk.bf16.vlgmr.msra.gmra.mrb[144].mxu0 %vm386_vm3, %v3948_v32 }
 0x207   : > { %1499 = vst.msk [vmem:[#allocation3 + $0x21] sm:$0xff] %vm408_vm6, %v1497_v56 }
 0x208   : > { %v1584_v2 = vpop.f32.mrb[40].mxu0 }
 0x209   : > { %v1629_v38 = vpop.f32.mrb[44].mxu1  ;;  %v1585_v12 = vadd.f32 %v1584_v2, %v1541_v28  ;;  %v5426_v39 = vpop.f32.mrb[41].mxu0 }
 0x20a   : > { %v5432_v40 = vpop.f32.mrb[45].mxu1  ;;  %v1587_v41 = vpop.f32.mrb[42].mxu0 }
 0x20b   : > { %v1632_v42 = vpop.f32.mrb[46].mxu1  ;;  %v1635_v44 = vadd.f32 %v1629_v38, %v1585_v12  ;;  %v5427_v45 = vpop.f32.mrb[43].mxu0 }
 0x20c   : > { %v5433_v46 = vpop.f32.mrb[47].mxu1 }
 0x20e   : > { %v6499_v63 = vld [vmem:[#allocation3 + $0x20] sm:$0xff]  ;;  %v6501_v43 = vld [vmem:[#allocation3 + $0x28] sm:$0x3] }
 0x20f   : > { %v4578_v0 = vsel %vm408_vm6, %v6499_v63, 0.0  ;;  %v4597_v9 = vsel %vm410_vm7, %v6501_v43, 0.0 }
 0x210   : > { %v1675_v17 = vpop.f32.mrb[44].mxu0  ;;  %v4579_v4 = vadd.f32 %v4578_v0, %v6465_v61  ;;  %v4598_v13 = vadd.f32 %v4597_v9, %v6475_v21 }
 0x211   : > { %v1721_v49 = vpop.f32.mrb[48].mxu1  ;;  %v1681_v51 = vadd.f32 %v1675_v17, %v1635_v44  ;;  %v5438_v52 = vpop.f32.mrb[45].mxu0 }
 0x212   : > { %v5444_v53 = vpop.f32.mrb[49].mxu1  ;;  %v1678_v57 = vpop.f32.mrb[46].mxu0 }
 0x213   : > { %v1724_v59 = vpop.f32.mrb[50].mxu1  ;;  %v1727_v60 = vadd.f32 %v1721_v49, %v1681_v51  ;;  %v5439_v50 = vpop.f32.mrb[47].mxu0 }
 0x214   : > { %v5445_v62 = vpop.f32.mrb[51].mxu1 }
 0x218   : > { %v1767_v1 = vpop.f32.mrb[48].mxu0 }
 0x219   : > { %v1813_v3 = vpop.f32.mrb[52].mxu1  ;;  %v1773_v6 = vadd.f32 %v1767_v1, %v1727_v60  ;;  %v5450_v7 = vpop.f32.mrb[49].mxu0 }
 0x21a   : > { %v5456_v8 = vpop.f32.mrb[53].mxu1  ;;  %v1770_v10 = vpop.f32.mrb[50].mxu0 }
 0x21b   : > { %v1816_v11 = vpop.f32.mrb[54].mxu1  ;;  %v1819_v14 = vadd.f32 %v1813_v3, %v1773_v6  ;;  %v5451_v15 = vpop.f32.mrb[51].mxu0 }
 0x21c   : > { %v5457_v16 = vpop.f32.mrb[55].mxu1 }
 0x220   : > { %v1859_v48 = vpop.f32.mrb[52].mxu0 }
 0x221   : > { %v1905_v18 = vpop.f32.mrb[56].mxu1  ;;  %v1865_v55 = vadd.f32 %v1859_v48, %v1819_v14  ;;  %v5462_v19 = vpop.f32.mrb[53].mxu0 }
 0x222   : > { %v5468_v22 = vpop.f32.mrb[57].mxu1  ;;  %v1862_v23 = vpop.f32.mrb[54].mxu0 }
 0x223   : > { %v1908_v61 = vpop.f32.mrb[58].mxu1  ;;  %v1911_v25 = vadd.f32 %v1905_v18, %v1865_v55  ;;  %v5463_v26 = vpop.f32.mrb[55].mxu0 }
 0x224   : > { %v5469_v27 = vpop.f32.mrb[59].mxu1 }
 0x225   : > { %v1912_v28 = vadd.f32 %v6413_v24, %v1911_v25 }
 0x227   : > { %v1913_v29 = vmax.f32 %v1912_v28, 0.0 }
 0x228   : > { %v1957_v30 = vpop.f32.mrb[56].mxu0 }
 0x229   : > { %v2000_v31 = vpop.f32.mrb[60].mxu1  ;;  %1915 = vst.msk [vmem:[#allocation3 + $0x31] sm:$0xff] %vm408_vm6, %v1913_v29  ;;  %v5474_v32 = vpop.f32.mrb[57].mxu0 }
 0x22a   : > { %v2001_v21 = vadd.f32 %v2000_v31, %v1957_v30  ;;  %v5480_v33 = vpop.f32.mrb[61].mxu1  ;;  %v1960_v34 = vpop.f32.mrb[58].mxu0 }
 0x22b   : > { %v2003_v35 = vpop.f32.mrb[62].mxu1  ;;  %v5475_v36 = vpop.f32.mrb[59].mxu0 }
 0x22c   : > { %v5481_v37 = vpop.f32.mrb[63].mxu1 }
 0x230   : > { %v2045_v56 = vpop.f32.mrb[60].mxu0  ;;  %v6511_v46 = vld [vmem:[#allocation3 + $0x30] sm:$0xff]  ;;  %v6513_v17 = vld [vmem:[#allocation3 + $0x38] sm:$0x3] }
 0x231   : > { %v2091_v2 = vpop.f32.mrb[64].mxu1  ;;  %v2051_v38 = vadd.f32 %v2045_v56, %v2001_v21  ;;  %v5486_v12 = vpop.f32.mrb[61].mxu0  ;;  %v4580_v50 = vsel %vm408_vm6, %v6511_v46, 0.0  ;;  %v4599_v62 = vsel %vm410_vm7, %v6513_v17, 0.0 }
 0x232   : > { %v5492_v39 = vpop.f32.mrb[65].mxu1  ;;  %v2048_v40 = vpop.f32.mrb[62].mxu0  ;;  %v4581_v6 = vadd.f32 %v4580_v50, %v4579_v4  ;;  %v4600_v7 = vadd.f32 %v4599_v62, %v4598_v13 }
 0x233   : > { %v2094_v41 = vpop.f32.mrb[66].mxu1  ;;  %v2097_v42 = vadd.f32 %v2091_v2, %v2051_v38  ;;  %v5487_v44 = vpop.f32.mrb[63].mxu0 }
 0x234   : > { %v5493_v45 = vpop.f32.mrb[67].mxu1 }
 0x238   : > { %v2137_v49 = vpop.f32.mrb[64].mxu0 }
 0x239   : > { %v2183_v51 = vpop.f32.mrb[68].mxu1  ;;  %v2143_v52 = vadd.f32 %v2137_v49, %v2097_v42  ;;  %v5498_v53 = vpop.f32.mrb[65].mxu0 }
 0x23a   : > { %v5504_v57 = vpop.f32.mrb[69].mxu1  ;;  %v2140_v59 = vpop.f32.mrb[66].mxu0 }
 0x23b   : > { %v2186_v60 = vpop.f32.mrb[70].mxu1  ;;  %v2189_v0 = vadd.f32 %v2183_v51, %v2143_v52  ;;  %v5499_v1 = vpop.f32.mrb[67].mxu0 }
 0x23c   : > { %v5505_v3 = vpop.f32.mrb[71].mxu1 }
 0x240   : > { %v2229_v8 = vpop.f32.mrb[68].mxu0 }
 0x241   : > { %v2275_v9 = vpop.f32.mrb[72].mxu1  ;;  %v2235_v10 = vadd.f32 %v2229_v8, %v2189_v0  ;;  %v5510_v11 = vpop.f32.mrb[69].mxu0 }
 0x242   : > { %v5516_v14 = vpop.f32.mrb[73].mxu1  ;;  %v2232_v15 = vpop.f32.mrb[70].mxu0 }
 0x243   : > { %v2278_v16 = vpop.f32.mrb[74].mxu1  ;;  %v2281_v48 = vadd.f32 %v2275_v9, %v2235_v10  ;;  %v5511_v18 = vpop.f32.mrb[71].mxu0  ;;  %v5777_v15 = vld [vmem:[%s7043_s7] sm:$0xff]  }
 0x244   : > { %v5517_v55 = vpop.f32.mrb[75].mxu1  ;;  %5741 = vmatpush3.bf16.msra.mxu1 %v5777_v15 }
 0x245   : > { %5742 = vmatprep.subr.bf16.mxu1 %v5807_v5 }
 0x248   : > { %v2321_v19 = vpop.f32.mrb[72].mxu0 }
 0x249   : > { %v2373_v22 = vpop.f32.mrb[76].mxu1  ;;  %v2327_v23 = vadd.f32 %v2321_v19, %v2281_v48  ;;  %v5522_v61 = vpop.f32.mrb[73].mxu0  ;;  %v5778_v48 = vld [vmem:[%s7043_s7 + $0x8] sm:$0xff]  }
 0x24a   : > { %v5528_v25 = vpop.f32.mrb[77].mxu1  ;;  %v2324_v26 = vpop.f32.mrb[74].mxu0  ;;  %5743 = vmatpush3.bf16.msra.mxu1 %v5778_v48 }
 0x24b   : > { %v2376_v27 = vpop.f32.mrb[78].mxu1  ;;  %v2328_v4 = vadd.f32 %v6413_v24, %v2327_v23  ;;  %v5523_v13 = vpop.f32.mrb[75].mxu0 }
 0x24c   : > { %v5529_v28 = vpop.f32.mrb[79].mxu1 }
 0x24d   : > { %v2329_v29 = vmax.f32 %v2328_v4, 0.0 }
 0x24f   : > { %2331 = vst.msk [vmem:[#allocation3 + $0x41] sm:$0xff] %vm408_vm6, %v2329_v29 }
 0x250   : > { %v2416_v30 = vpop.f32.mrb[76].mxu0 }
 0x251   : > { %v2461_v31 = vpop.f32.mrb[80].mxu1  ;;  %v2417_v21 = vadd.f32 %v2416_v30, %v2373_v22  ;;  %v5534_v32 = vpop.f32.mrb[77].mxu0 }
 0x252   : > { %v5540_v33 = vpop.f32.mrb[81].mxu1  ;;  %v2419_v34 = vpop.f32.mrb[78].mxu0 }
 0x253   : > { %v2464_v35 = vpop.f32.mrb[82].mxu1  ;;  %v2467_v36 = vadd.f32 %v2461_v31, %v2417_v21  ;;  %v5535_v37 = vpop.f32.mrb[79].mxu0  ;;  %v4020_v33 = vlaneseq }
 0x254   : > { %v5541_v56 = vpop.f32.mrb[83].mxu1 }
 0x255   : > { %v6543_v34 = vshrl.u32 %v4020_v33, 7  ;;  %vm4965_vm9 = vcmp.lt.s32.totalorder %v4020_v33, 768 }
 0x256   : > { %v6521_v51 = vld [vmem:[#allocation3 + $0x40] sm:$0xff]  ;;  %v6523_v52 = vld [vmem:[#allocation3 + $0x48] sm:$0x3] }
 0x257   : > { %v4582_v53 = vsel %vm408_vm6, %v6521_v51, 0.0  ;;  %v4601_v1 = vsel %vm410_vm7, %v6523_v52, 0.0  ;;  %v6569_v48 = vsub.s32 0, %v6543_v34 }
 0x258   : > { %v2507_v2 = vpop.f32.mrb[80].mxu0  ;;  %v6527_v60 = vadd.f32 %v4582_v53, %v4581_v6  ;;  %v6531_v9 = vadd.f32 %v4601_v1, %v4600_v7 }
 0x259   : > { %v2553_v38 = vpop.f32.mrb[84].mxu1  ;;  %v2513_v12 = vadd.f32 %v2507_v2, %v2467_v36  ;;  %v5546_v39 = vpop.f32.mrb[81].mxu0 }
 0x25a   : > { %v5552_v40 = vpop.f32.mrb[85].mxu1  ;;  %v2510_v41 = vpop.f32.mrb[82].mxu0 }
 0x25b   : > { %v2556_v42 = vpop.f32.mrb[86].mxu1  ;;  %v2559_v44 = vadd.f32 %v2553_v38, %v2513_v12  ;;  %v5547_v45 = vpop.f32.mrb[83].mxu0 }
 0x25c   : > { %v5553_v49 = vpop.f32.mrb[87].mxu1  ;;  %v6546_v42 = vsub.s32 1, %v6543_v34 }
 0x260   : > { %v2599_v57 = vpop.f32.mrb[84].mxu0 }
 0x261   : > { %v2645_v59 = vpop.f32.mrb[88].mxu1  ;;  %v2605_v50 = vadd.f32 %v2599_v57, %v2559_v44  ;;  %v5558_v62 = vpop.f32.mrb[85].mxu0  ;;  %v4017_v44 = vld [vmem:[%s7041_s5] sm:$0x7] }
 0x262   : > { %v5564_v0 = vpop.f32.mrb[89].mxu1  ;;  %v2602_v3 = vpop.f32.mrb[86].mxu0  ;;  %v6556_v53 = vrot.slane %v4017_v44, %v6546_v42 }
 0x263   : > { %v2648_v8 = vpop.f32.mrb[90].mxu1  ;;  %v2651_v10 = vadd.f32 %v2645_v59, %v2605_v50  ;;  %v5559_v11 = vpop.f32.mrb[87].mxu0  ;;  %v6559_v50 = vsub.s32 2, %v6543_v34 }
 0x264   : > { %v5565_v14 = vpop.f32.mrb[91].mxu1 }
 0x268   : > { %v2691_v16 = vpop.f32.mrb[88].mxu0 }
 0x269   : > { %v2737_v6 = vpop.f32.mrb[92].mxu1  ;;  %v2697_v18 = vadd.f32 %v2691_v16, %v2651_v10  ;;  %v5570_v55 = vpop.f32.mrb[89].mxu0 }
 0x26a   : > { %v5576_v19 = vpop.f32.mrb[93].mxu1  ;;  %v2694_v7 = vpop.f32.mrb[90].mxu0  ;;  %v4045_v55 = vmul.f32 %v6556_v53, %v6453_v58 }
 0x26b   : > { %v2740_v22 = vpop.f32.mrb[94].mxu1  ;;  %v2743_v23 = vadd.f32 %v2737_v6, %v2697_v18  ;;  %v5571_v61 = vpop.f32.mrb[91].mxu0  ;;  %v4044_v18 = vmul.f32 %v6556_v53, %v6447_v20  ;;  %v6579_v7 = vrot.slane %v4017_v44, %v6559_v50 }
 0x26c   : > { %v5577_v25 = vpop.f32.mrb[95].mxu1 }
 0x26d   : > { %v2744_v26 = vadd.f32 %v6413_v24, %v2743_v23  ;;  %v4077_v61 = vrot.slane %v4044_v18, 1  ;;  %v4078_v25 = vrot.slane %v4045_v55, 1 }
 0x26f   : > { %v2745_v27 = vmax.f32 %v2744_v26, 0.0 }
 0x270   : > { %v2789_v4 = vpop.f32.mrb[92].mxu0 }
 0x271   : > { %v2832_v13 = vpop.f32.mrb[96].mxu1  ;;  %2747 = vst.msk [vmem:[#allocation3 + $0x51] sm:$0xff] %vm408_vm6, %v2745_v27  ;;  %v5582_v29 = vpop.f32.mrb[93].mxu0 }
 0x272   : > { %v2833_v28 = vadd.f32 %v2832_v13, %v2789_v4  ;;  %v5588_v30 = vpop.f32.mrb[97].mxu1  ;;  %v2792_v31 = vpop.f32.mrb[94].mxu0  ;;  %v4121_v13 = vmul.f32 %v6579_v7, %v6447_v20 }
 0x273   : > { %v2835_v21 = vpop.f32.mrb[98].mxu1  ;;  %v5583_v32 = vpop.f32.mrb[95].mxu0  ;;  %v4018_v30 = vld [vmem:[%s7041_s5 + $0x4] sm:$0x7] }
 0x274   : > { %v5589_v5 = vpop.f32.mrb[99].mxu1 }
 0x278   : > { %v2877_v35 = vpop.f32.mrb[96].mxu0  ;;  %v6551_v45 = vld [vmem:[#allocation3 + $0x50] sm:$0xff]  ;;  %v6553_v49 = vld [vmem:[#allocation3 + $0x58] sm:$0x3] }
 0x279   : > { %v2923_v36 = vpop.f32.mrb[100].mxu1  ;;  %v2883_v37 = vadd.f32 %v2877_v35, %v2833_v28  ;;  %v5594_v56 = vpop.f32.mrb[97].mxu0  ;;  %v4584_v10 = vsel %vm408_vm6, %v6551_v45, 0.0  ;;  %v4603_v11 = vsel %vm410_vm7, %v6553_v49, 0.0  ;;  %v4079_v35 = vsel %vm4076_vm8, %v4077_v61, %v4078_v25 }
 0x27a   : > { %v5600_v2 = vpop.f32.mrb[101].mxu1  ;;  %v2880_v38 = vpop.f32.mrb[98].mxu0  ;;  %v6566_v6 = vadd.f32 %v4584_v10, %v6527_v60  ;;  %v6576_v19 = vadd.f32 %v4603_v11, %v6531_v9  ;;  %v6582_v60 = vrot.slane %v4017_v44, %v6569_v48  ;;  %v4122_v9 = vmul.f32 %v6579_v7, %v6453_v58  ;;  %v5781_v58 = vld [vmem:[%s7045_s9 + $0x4] ss:$24 sps:$4 sm:$0xff]  }
 0x27b   : > { %v2926_v12 = vpop.f32.mrb[102].mxu1  ;;  %v2929_v39 = vadd.f32 %v2923_v36, %v2883_v37  ;;  %v5595_v40 = vpop.f32.mrb[99].mxu0  ;;  %v5779_v36 = vld [vmem:[%s7045_s9] ss:$24 sps:$4 sm:$0xff]   ;;  %v4046_v37 = vmul.f32 %v6556_v53, %v6445_v47  ;;  %v4047_v56 = vmul.f32 %v6556_v53, %v6451_v54  ;;  %v4153_v2 = vrot.slane %v4121_v13, 2  ;;  %4793 = vmatprep.subr.bf16.mxu0 %v5781_v58 }
 0x27c   : > { %v5601_v41 = vpop.f32.mrb[103].mxu1  ;;  %v4024_v5 = vmul.f32 %v6582_v60, %v6447_v20  ;;  %v4154_v38 = vrot.slane %v4122_v9, 2  ;;  %v5784_v20 = vld [vmem:[%s7045_s9 + $0xc] ss:$24 sps:$4 sm:$0xff]   ;;  %v6608_v12 = vrot.slane %v4018_v30, %v6546_v42  ;;  %4794 = vmatpush1.bf16.msra.mxu0 %v5779_v36  ;;  %v6611_v44 = vrot.slane %v4018_v30, %v6569_v48 }
 0x27d   : > { %4834 = vmatprep.subr.bf16.mxu1 %v5784_v20  ;;  %v4049_v13 = vmul.f32 %v6556_v53, %v6501_v43 }
 0x27e   : > { %v4109_v41 = vadd.f32 %v4079_v35, %v4024_v5  ;;  %v4218_v10 = vmul.f32 %v6608_v12, %v6451_v54  ;;  %v4197_v25 = vmul.f32 %v6611_v44, %v6445_v47 }
 0x280   : > { %v2969_v57 = vpop.f32.mrb[100].mxu0 }
 0x281   : > { %v3015_v59 = vpop.f32.mrb[104].mxu1  ;;  %v2975_v62 = vadd.f32 %v2969_v57, %v2929_v39  ;;  %v5606_v0 = vpop.f32.mrb[101].mxu0  ;;  %v4080_v57 = vrot.slane %v4046_v37, 1 }
 0x282   : > { %v5612_v1 = vpop.f32.mrb[105].mxu1  ;;  %v2972_v3 = vpop.f32.mrb[102].mxu0 }
 0x283   : > { %v3018_v8 = vpop.f32.mrb[106].mxu1  ;;  %v3021_v14 = vadd.f32 %v3015_v59, %v2975_v62  ;;  %v5607_v15 = vpop.f32.mrb[103].mxu0  ;;  %v4081_v59 = vrot.slane %v4047_v56, 1  ;;  %v4155_v3 = vsel %vm494_vm1, %v4153_v2, %v4154_v38  ;;  %v4019_v38 = vld [vmem:[%s7041_s5 + $0x8] sm:$0x7] }
 0x284   : > { %v5613_v16 = vpop.f32.mrb[107].mxu1  ;;  %v4124_v8 = vmul.f32 %v6579_v7, %v6451_v54  ;;  %v4123_v15 = vmul.f32 %v6579_v7, %v6445_v47  ;;  %v4185_v61 = vadd.f32 %v4155_v3, %v4109_v41 }
 0x285   : > { %v4217_v16 = vmul.f32 %v6608_v12, %v6445_v47 }
 0x286   : > { %v4157_v9 = vrot.slane %v4124_v8, 2  ;;  %v4205_v41 = vadd.f32 %v4197_v25, %v4185_v61  ;;  %v4126_v8 = vmul.f32 %v6579_v7, %v6501_v43  ;;  %v6664_v61 = vrot.slane %v4019_v38, %v6546_v42 }
 0x287   : > { %v4026_v25 = vmul.f32 %v6582_v60, %v6499_v63 }
 0x288   : > { %v3061_v22 = vpop.f32.mrb[104].mxu0 }
 0x289   : > { %v3107_v23 = vpop.f32.mrb[108].mxu1  ;;  %v3067_v26 = vadd.f32 %v3061_v22, %v3021_v14  ;;  %v5618_v27 = vpop.f32.mrb[105].mxu0 }
 0x28a   : > { %v5624_v4 = vpop.f32.mrb[109].mxu1  ;;  %v3064_v28 = vpop.f32.mrb[106].mxu0 }
 0x28b   : > { %v3110_v29 = vpop.f32.mrb[110].mxu1  ;;  %v3113_v31 = vadd.f32 %v3107_v23, %v3067_v26  ;;  %v5619_v21 = vpop.f32.mrb[107].mxu0  ;;  %v4025_v23 = vmul.f32 %v6582_v60, %v6445_v47  ;;  %v6628_v26 = vrot.slane %v4018_v30, %v6559_v50  ;;  %v4048_v4 = vmul.f32 %v6556_v53, %v6499_v63 }
 0x28c   : > { %v5625_v32 = vpop.f32.mrb[111].mxu1  ;;  %v4250_v28 = vrot.slane %v4218_v10, 1  ;;  %v4156_v29 = vrot.slane %v4123_v15, 2  ;;  %v4219_v21 = vmul.f32 %v6608_v12, %v6499_v63  ;;  %v4220_v30 = vmul.f32 %v6608_v12, %v6501_v43 }
 0x28d   : > { %v4293_v36 = vmul.f32 %v6628_v26, %v6445_v47  ;;  %v4294_v58 = vmul.f32 %v6628_v26, %v6451_v54  ;;  %v4083_v20 = vrot.slane %v4048_v4, 1  ;;  %v4198_v54 = vmul.f32 %v6611_v44, %v6499_v63 }
 0x28e   : > { %v4158_v47 = vsel %vm494_vm1, %v4156_v29, %v4157_v9  ;;  %v4252_v10 = vrot.slane %v4219_v21, 1 }
 0x28f   : > { %v4325_v15 = vrot.slane %v4293_v36, 2 }
 0x290   : > { %v3153_v39 = vpop.f32.mrb[108].mxu0 }
 0x291   : > { %v3205_v40 = vpop.f32.mrb[112].mxu1  ;;  %v3159_v62 = vadd.f32 %v3153_v39, %v3113_v31  ;;  %v5630_v0 = vpop.f32.mrb[109].mxu0  ;;  %v4249_v31 = vrot.slane %v4217_v16, 1  ;;  %v4084_v39 = vrot.slane %v4049_v13, 1  ;;  %v4326_v16 = vrot.slane %v4294_v58, 2 }
 0x292   : > { %v5636_v1 = vpop.f32.mrb[113].mxu1  ;;  %v3156_v11 = vpop.f32.mrb[110].mxu0 }
 0x293   : > { %v3208_v14 = vpop.f32.mrb[114].mxu1  ;;  %v3160_v18 = vadd.f32 %v6413_v24, %v3159_v62  ;;  %v5631_v55 = vpop.f32.mrb[111].mxu0  ;;  %v4082_v24 = vsel %vm4076_vm8, %v4080_v57, %v4081_v59  ;;  %v4125_v62 = vmul.f32 %v6579_v7, %v6499_v63  ;;  %v4253_v11 = vrot.slane %v4220_v30, 1 }
 0x294   : > { %v5637_v22 = vpop.f32.mrb[115].mxu1  ;;  %v4110_v35 = vadd.f32 %v4082_v24, %v4025_v23  ;;  %v4085_v55 = vsel %vm4076_vm8, %v4083_v20, %v4084_v39  ;;  %v4296_v23 = vmul.f32 %v6628_v26, %v6501_v43  ;;  %v4160_v24 = vrot.slane %v4126_v8, 2 }
 0x295   : > { %v3161_v27 = vmax.f32 %v3160_v18, 0.0  ;;  %v6656_v18 = vrot.slane %v4019_v38, %v6569_v48  ;;  %v4295_v22 = vmul.f32 %v6628_v26, %v6499_v63  ;;  %v4159_v13 = vrot.slane %v4125_v62, 2 }
 0x296   : > { %v4186_v14 = vadd.f32 %v4158_v47, %v4110_v35  ;;  %v4254_v9 = vsel %vm4076_vm8, %v4252_v10, %v4253_v11  ;;  %v4327_v21 = vsel %vm494_vm1, %v4325_v15, %v4326_v16  ;;  %v4391_v11 = vmul.f32 %v6664_v61, %v6511_v46 }
 0x297   : > { %3163 = vst.msk [vmem:[#allocation3 + $0x61] sm:$0xff] %vm408_vm6, %v3161_v27  ;;  %v4369_v30 = vmul.f32 %v6656_v18, %v6499_v63  ;;  %v4328_v58 = vrot.slane %v4295_v22, 2 }
 0x298   : > { %v3248_v32 = vpop.f32.mrb[112].mxu0  ;;  %v4206_v27 = vadd.f32 %v4198_v54, %v4186_v14  ;;  %v4221_v54 = vmul.f32 %v6608_v12, %v6511_v46 }
 0x299   : > { %v3293_v5 = vpop.f32.mrb[116].mxu1  ;;  %v3249_v37 = vadd.f32 %v3248_v32, %v3205_v40  ;;  %v5642_v56 = vpop.f32.mrb[113].mxu0  ;;  %v4251_v40 = vsel %vm4076_vm8, %v4249_v31, %v4250_v28  ;;  %v4111_v31 = vadd.f32 %v4085_v55, %v4026_v25  ;;  %v6673_v32 = vrot.slane %v4019_v38, %v6559_v50 }
 0x29a   : > { %v5648_v2 = vpop.f32.mrb[117].mxu1  ;;  %v3251_v57 = vpop.f32.mrb[114].mxu0  ;;  %v4281_v4 = vadd.f32 %v4251_v40, %v4205_v41  ;;  %v4389_v56 = vmul.f32 %v6664_v61, %v6499_v63  ;;  %v4282_v39 = vadd.f32 %v4254_v9, %v4206_v27  ;;  %v4161_v38 = vsel %vm494_vm1, %v4159_v13, %v4160_v24 }
 0x29b   : > { %v3296_v59 = vpop.f32.mrb[118].mxu1  ;;  %v3299_v0 = vadd.f32 %v3293_v5, %v3249_v37  ;;  %v5643_v1 = vpop.f32.mrb[115].mxu0  ;;  %v4329_v37 = vrot.slane %v4296_v23, 2  ;;  %v4390_v57 = vmul.f32 %v6664_v61, %v6501_v43  ;;  %v4465_v8 = vmul.f32 %v6673_v32, %v6499_v63 }
 0x29c   : > { %v5649_v3 = vpop.f32.mrb[119].mxu1  ;;  %v4357_v41 = vadd.f32 %v4327_v21, %v4281_v4  ;;  %v4222_v1 = vmul.f32 %v6608_v12, %v6513_v17  ;;  %v4421_v14 = vrot.slane %v4389_v56, 1  ;;  %v4466_v15 = vmul.f32 %v6673_v32, %v6501_v43 }
 0x29d   : > { %v4330_v10 = vsel %vm494_vm1, %v4328_v58, %v4329_v37  ;;  %v4050_v55 = vmul.f32 %v6556_v53, %v6511_v46  ;;  %v4392_v23 = vmul.f32 %v6664_v61, %v6513_v17  ;;  %v4422_v25 = vrot.slane %v4390_v57, 1 }
 0x29e   : > { %v6682_v40 = vld [vmem:[#allocation3 + $0x60] sm:$0xff]  ;;  %v4377_v3 = vadd.f32 %v4369_v30, %v4357_v41  ;;  %v6693_v16 = vld [vmem:[#allocation3 + $0x68] sm:$0x3]  ;;  %v4358_v22 = vadd.f32 %v4330_v10, %v4282_v39  ;;  %v4051_v63 = vmul.f32 %v6556_v53, %v6513_v17  ;;  %v4199_v27 = vmul.f32 %v6611_v44, %v6511_v46 }
 0x29f   : > { %v4255_v4 = vrot.slane %v4221_v54, 1  ;;  %v4586_v43 = vsel %vm408_vm6, %v6682_v40, 0.0  ;;  %v4256_v9 = vrot.slane %v4222_v1, 1  ;;  %v4605_v58 = vsel %vm410_vm7, %v6693_v16, 0.0 }
 0x2a0   : > { %v3339_v28 = vpop.f32.mrb[116].mxu0  ;;  %v6721_v39 = vadd.f32 %v4605_v58, %v6576_v19  ;;  %v4127_v54 = vmul.f32 %v6579_v7, %v6511_v46  ;;  %v4128_v1 = vmul.f32 %v6579_v7, %v6513_v17  ;;  %v4423_v10 = vsel %vm4076_vm8, %v4421_v14, %v4422_v25 }
 0x2a1   : > { %v3385_v29 = vpop.f32.mrb[120].mxu1  ;;  %v3345_v5 = vadd.f32 %v3339_v28, %v3299_v0  ;;  %v5654_v35 = vpop.f32.mrb[117].mxu0  ;;  %v4187_v0 = vadd.f32 %v4161_v38, %v4111_v31  ;;  %v4297_v28 = vmul.f32 %v6628_v26, %v6511_v46  ;;  %v6710_v31 = vadd.f32 %v4586_v43, %v6566_v6 }
 0x2a2   : > { %v5660_v36 = vpop.f32.mrb[121].mxu1  ;;  %v3342_v2 = vpop.f32.mrb[118].mxu0  ;;  %v4370_v35 = vmul.f32 %v6656_v18, %v6511_v46  ;;  %v4468_v6 = vmul.f32 %v6673_v32, %v6513_v17  ;;  %v4497_v38 = vrot.slane %v4465_v8, 2  ;;  %v4257_v43 = vsel %vm4076_vm8, %v4255_v4, %v4256_v9 }
 0x2a3   : > { %v3388_v20 = vpop.f32.mrb[122].mxu1  ;;  %v3391_v59 = vadd.f32 %v3385_v29, %v3345_v5  ;;  %v5655_v62 = vpop.f32.mrb[119].mxu0  ;;  %v4298_v29 = vmul.f32 %v6628_v26, %v6513_v17  ;;  %v4424_v36 = vrot.slane %v4391_v11, 1  ;;  %v4425_v2 = vrot.slane %v4392_v23, 1 }
 0x2a4   : > { %v5661_v47 = vpop.f32.mrb[123].mxu1  ;;  %v4467_v20 = vmul.f32 %v6673_v32, %v6511_v46  ;;  %v4086_v62 = vrot.slane %v4050_v55, 1  ;;  %v4498_v11 = vrot.slane %v4466_v15, 2  ;;  %v4207_v23 = vadd.f32 %v4199_v27, %v4187_v0 }
 0x2a5   : > { %v4087_v47 = vrot.slane %v4051_v63, 1  ;;  %v4331_v19 = vrot.slane %v4297_v28, 2  ;;  %v4501_v63 = vrot.slane %v4468_v6, 2  ;;  %v4027_v17 = vmul.f32 %v6582_v60, %v6511_v46 }
 0x2a6   : > { %v4500_v55 = vrot.slane %v4467_v20, 2  ;;  %v4393_v0 = vmul.f32 %v6664_v61, %v6521_v51  ;;  %v4394_v14 = vmul.f32 %v6664_v61, %v6523_v52  ;;  %v4499_v15 = vsel %vm494_vm1, %v4497_v38, %v4498_v11 }
 0x2a7   : > { %v4088_v8 = vsel %vm4076_vm8, %v4086_v62, %v4087_v47  ;;  %v4162_v4 = vrot.slane %v4127_v54, 2  ;;  %v4283_v9 = vadd.f32 %v4257_v43, %v4207_v23  ;;  %v4052_v6 = vmul.f32 %v6556_v53, %v6521_v51  ;;  %v6753_v54 = vld [vmem:[%s7040_s4] ss:$0 sm:$0xff] }
 0x2a8   : > { %v3431_v13 = vpop.f32.mrb[120].mxu0  ;;  %v4224_v62 = vmul.f32 %v6608_v12, %v6523_v52  ;;  %v4427_v47 = vrot.slane %v4393_v0, 1  ;;  %v4428_v38 = vrot.slane %v4394_v14, 1 }
 0x2a9   : > { %v3477_v24 = vpop.f32.mrb[124].mxu1  ;;  %v3437_v21 = vadd.f32 %v3431_v13, %v3391_v59  ;;  %v5666_v30 = vpop.f32.mrb[121].mxu0  ;;  %v4378_v13 = vadd.f32 %v4370_v35, %v4358_v22  ;;  %v4112_v35 = vadd.f32 %v4088_v8, %v4027_v17 }
 0x2aa   : > { %v5672_v5 = vpop.f32.mrb[125].mxu1  ;;  %v3434_v37 = vpop.f32.mrb[122].mxu0  ;;  %v4453_v30 = vadd.f32 %v4423_v10, %v4377_v3  ;;  %v4259_v0 = vrot.slane %v4224_v62, 1  ;;  %v4429_v14 = vsel %vm4076_vm8, %v4427_v47, %v4428_v38  ;;  %v4054_v62 = vmul.f32 %v6556_v53, %v6551_v45 }
 0x2ab   : > { %v3480_v56 = vpop.f32.mrb[126].mxu1  ;;  %v3483_v41 = vadd.f32 %v3477_v24, %v3437_v21  ;;  %v5667_v57 = vpop.f32.mrb[123].mxu0  ;;  %v4332_v24 = vrot.slane %v4298_v29, 2  ;;  %v4426_v21 = vsel %vm4076_vm8, %v4424_v36, %v4425_v2  ;;  %v4163_v36 = vrot.slane %v4128_v1, 2 }
 0x2ac   : > { %v5673_v59 = vpop.f32.mrb[127].mxu1  ;;  %v4454_v28 = vadd.f32 %v4426_v21, %v4378_v13  ;;  %v4502_v37 = vsel %vm494_vm1, %v4500_v55, %v4501_v63  ;;  %v4371_v57 = vmul.f32 %v6656_v18, %v6521_v51  ;;  %v4529_v11 = vadd.f32 %v4499_v15, %v4453_v30  ;;  %v6767_v15 = vld [vmem:[%s7042_s6] ss:$0 sm:$0xff] }
 0x2ad   : > { %v4333_v46 = vsel %vm494_vm1, %v4331_v19, %v4332_v24  ;;  %v4223_v59 = vmul.f32 %v6608_v12, %v6521_v51  ;;  %v4164_v43 = vsel %vm494_vm1, %v4162_v4, %v4163_v36  ;;  %v4200_v19 = vmul.f32 %v6611_v44, %v6521_v51 }
 0x2ae   : > { %v4359_v10 = vadd.f32 %v4333_v46, %v4283_v9  ;;  %v4530_v23 = vadd.f32 %v4502_v37, %v4454_v28  ;;  %v4469_v13 = vmul.f32 %v6673_v32, %v6521_v51  ;;  %v4470_v24 = vmul.f32 %v6673_v32, %v6523_v52 }
 0x2af   : > { %v4089_v55 = vrot.slane %v4052_v6, 1  ;;  %v4188_v17 = vadd.f32 %v4164_v43, %v4112_v35  ;;  %v4258_v30 = vrot.slane %v4223_v59, 1  ;;  %v4129_v4 = vmul.f32 %v6579_v7, %v6521_v51 }
 0x2b0   : > { %v3523_v5 = vpop.f32.mrb[124].mxu0  ;;  %v4379_v8 = vadd.f32 %v4371_v57, %v4359_v10  ;;  %v4130_v9 = vmul.f32 %v6579_v7, %v6523_v52  ;;  %v4545_v28 = vadd.f32 %v6767_v15, %v4530_v23  ;;  %v4299_v35 = vmul.f32 %v6628_v26, %v6521_v51 }
 0x2b1   : > { %v3569_v58 = vpop.f32.mrb[128].mxu1  ;;  %v3529_v22 = vadd.f32 %v3523_v5, %v3483_v41  ;;  %v5678_v25 = vpop.f32.mrb[125].mxu0  ;;  %v4053_v41 = vmul.f32 %v6556_v53, %v6523_v52  ;;  %v4300_v36 = vmul.f32 %v6628_v26, %v6523_v52  ;;  %v4503_v46 = vrot.slane %v4469_v13, 2 }
 0x2b2   : > { %v5684_v27 = vpop.f32.mrb[129].mxu1  ;;  %v3526_v3 = vpop.f32.mrb[126].mxu0  ;;  %v4504_v37 = vrot.slane %v4470_v24, 2  ;;  %v4208_v6 = vadd.f32 %v4200_v19, %v4188_v17  ;;  %v4544_v57 = vadd.f32 %v6767_v15, %v4529_v11  ;;  %v4028_v59 = vmul.f32 %v6582_v60, %v6521_v51 }
 0x2b3   : > { %v3572_v29 = vpop.f32.mrb[130].mxu1  ;;  %v3575_v56 = vadd.f32 %v3569_v58, %v3529_v22  ;;  %v5679_v2 = vpop.f32.mrb[127].mxu0  ;;  %v4090_v63 = vrot.slane %v4053_v41, 1  ;;  %v4455_v41 = vadd.f32 %v4429_v14, %v4379_v8  ;;  %v4055_v47 = vmul.f32 %v6556_v53, %v6553_v49 }
 0x2b4   : > { %v5685_v20 = vpop.f32.mrb[131].mxu1  ;;  %v4260_v52 = vsel %vm4076_vm8, %v4258_v30, %v4259_v0  ;;  %v4165_v38 = vrot.slane %v4129_v4, 2  ;;  %v4553_v10 = vsel %vm408_vm6, %v4545_v28, 0.0  ;;  %v4334_v43 = vrot.slane %v4299_v35, 2 }
 0x2b5   : > { %v3576_v1 = vadd.f32 %v6753_v54, %v3575_v56  ;;  %v4091_v20 = vsel %vm4076_vm8, %v4089_v55, %v4090_v63  ;;  %v4335_v19 = vrot.slane %v4300_v36, 2  ;;  %v4505_v11 = vsel %vm494_vm1, %v4503_v46, %v4504_v37 }
 0x2b6   : > { %v4113_v23 = vadd.f32 %v4091_v20, %v4028_v59  ;;  %v4284_v13 = vadd.f32 %v4260_v52, %v4208_v6  ;;  %v4531_v24 = vadd.f32 %v4505_v11, %v4455_v41  ;;  %v4552_v51 = vsel %vm408_vm6, %v4544_v57, 0.0  ;;  %v6810_v20 = vld [vmem:[#allocation3 + $0x98] sm:$0x3] }
 0x2b7   : > { %v3577_v21 = vmax.f32 %v3576_v1, 0.0  ;;  %v4166_v1 = vrot.slane %v4130_v9, 2  ;;  %v4092_v63 = vrot.slane %v4054_v62, 1  ;;  %v4093_v8 = vrot.slane %v4055_v47, 1 }
 0x2b8   : > { %v3621_v5 = vpop.f32.mrb[128].mxu0  ;;  %v4225_v28 = vmul.f32 %v6608_v12, %v6551_v45  ;;  %v4201_v46 = vmul.f32 %v6611_v44, %v6551_v45  ;;  %v4395_v59 = vmul.f32 %v6664_v61, %v6551_v45  ;;  %v4029_v62 = vmul.f32 %v6582_v60, %v6551_v45 }
 0x2b9   : > { %v3664_v58 = vpop.f32.mrb[132].mxu1  ;;  %3579 = vst.msk [vmem:[#allocation3 + $0x71] sm:$0xff] %vm408_vm6, %v3577_v21  ;;  %v5690_v25 = vpop.f32.mrb[129].mxu0  ;;  %v4167_v14 = vsel %vm494_vm1, %v4165_v38, %v4166_v1  ;;  %v4094_v6 = vsel %vm4076_vm8, %v4092_v63, %v4093_v8  ;;  %v4396_v47 = vmul.f32 %v6664_v61, %v6553_v49  ;;  %v6825_v38 = vmul.f32 %v6664_v61, %v6810_v20 }
 0x2ba   : > { %v3665_v22 = vadd.f32 %v3664_v58, %v3621_v5  ;;  %v5696_v27 = vpop.f32.mrb[133].mxu1  ;;  %v3624_v3 = vpop.f32.mrb[130].mxu0  ;;  %v4131_v5 = vmul.f32 %v6579_v7, %v6551_v45  ;;  %v4132_v58 = vmul.f32 %v6579_v7, %v6553_v49  ;;  %v6796_v25 = vadd.f32 %v4553_v10, %v4552_v51 }
 0x2bb   : > { %v3667_v29 = vpop.f32.mrb[134].mxu1  ;;  %v5691_v56 = vpop.f32.mrb[131].mxu0  ;;  %v4189_v9 = vadd.f32 %v4167_v14, %v4113_v23  ;;  %v4226_v3 = vmul.f32 %v6608_v12, %v6553_v49  ;;  %v4261_v1 = vrot.slane %v4225_v28, 1  ;;  %v4372_v23 = vmul.f32 %v6656_v18, %v6551_v45 }
 0x2bc   : > { %v5697_v2 = vpop.f32.mrb[135].mxu1  ;;  %v4336_v29 = vsel %vm494_vm1, %v4334_v43, %v4335_v19  ;;  %v6806_v56 = vadd.f32 %v6767_v15, %v4531_v24  ;;  %v4168_v41 = vrot.slane %v4131_v5, 2  ;;  %v4169_v57 = vrot.slane %v4132_v58, 2 }
 0x2bd   : > { %v4360_v37 = vadd.f32 %v4336_v29, %v4284_v13  ;;  %v6808_v2 = vld [vmem:[#allocation3 + $0x90] sm:$0xff]  ;;  %v4262_v10 = vrot.slane %v4226_v3, 1  ;;  %v4114_v13 = vadd.f32 %v4094_v6, %v4029_v62  ;;  %v4209_v24 = vadd.f32 %v4201_v46, %v4189_v9 }
 0x2be   : > { %v6821_v52 = vmul.f32 %v6664_v61, %v6808_v2  ;;  %v6831_v43 = vmul.f32 %v6673_v32, %v6808_v2  ;;  %v4301_v51 = vmul.f32 %v6628_v26, %v6551_v45  ;;  %v4056_v8 = vmul.f32 %v6556_v53, %v6682_v40 }
 0x2bf   : > { %v4057_v5 = vmul.f32 %v6556_v53, %v6693_v16  ;;  %v4170_v58 = vsel %vm494_vm1, %v4168_v41, %v4169_v57  ;;  %v4431_v9 = vrot.slane %v4396_v47, 1  ;;  %v4263_v29 = vsel %vm4076_vm8, %v4261_v1, %v4262_v10 }
 0x2c0   : > { %v3709_v21 = vpop.f32.mrb[132].mxu0  ;;  %v6833_v19 = vld [vmem:[#allocation3 + $0x70] sm:$0xff]  ;;  %v6835_v11 = vld [vmem:[#allocation3 + $0x78] sm:$0x3]  ;;  %v4471_v57 = vmul.f32 %v6673_v32, %v6551_v45  ;;  %v4095_v47 = vrot.slane %v4056_v8, 1  ;;  %v4202_v1 = vmul.f32 %v6611_v44, %v6682_v40  ;;  %v4133_v45 = vmul.f32 %v6579_v7, %v6682_v40 }
 0x2c1   : > { %v3755_v55 = vpop.f32.mrb[136].mxu1  ;;  %v3715_v17 = vadd.f32 %v3709_v21, %v3665_v22  ;;  %v5702_v30 = vpop.f32.mrb[133].mxu0  ;;  %v4302_v21 = vmul.f32 %v6628_v26, %v6553_v49 }
 0x2c2   : > { %v5708_v0 = vpop.f32.mrb[137].mxu1  ;;  %v3712_v27 = vpop.f32.mrb[134].mxu0 }
 0x2c3   : > { %v3758_v4 = vpop.f32.mrb[138].mxu1  ;;  %v3761_v35 = vadd.f32 %v3755_v55, %v3715_v17  ;;  %v5703_v36 = vpop.f32.mrb[135].mxu0  ;;  %v4430_v17 = vrot.slane %v4395_v59, 1  ;;  %v4227_v27 = vmul.f32 %v6608_v12, %v6682_v40  ;;  %v4472_v59 = vmul.f32 %v6673_v32, %v6553_v49 }
 0x2c4   : > { %v5709_v22 = vpop.f32.mrb[139].mxu1  ;;  %v4228_v4 = vmul.f32 %v6608_v12, %v6693_v16  ;;  %v4380_v36 = vadd.f32 %v4372_v23, %v4360_v37  ;;  %v4096_v37 = vrot.slane %v4057_v5, 1  ;;  %v4134_v49 = vmul.f32 %v6579_v7, %v6693_v16 }
 0x2c5   : > { %v4588_v22 = vsel %vm408_vm6, %v6833_v19, 0.0  ;;  %v4264_v23 = vrot.slane %v4227_v27, 1  ;;  %v4338_v8 = vrot.slane %v4302_v21, 2  ;;  %v4285_v5 = vadd.f32 %v4263_v29, %v4209_v24 }
 0x2c6   : > { %v6860_v62 = vadd.f32 %v4588_v22, %v6710_v31  ;;  %v4190_v31 = vadd.f32 %v4170_v58, %v4114_v13  ;;  %v4397_v24 = vmul.f32 %v6664_v61, %v6682_v40  ;;  %v4398_v21 = vmul.f32 %v6664_v61, %v6693_v16 }
 0x2c8   : > { %v3801_v55 = vpop.f32.mrb[136].mxu0 }
 0x2c9   : > { %v3847_v63 = vpop.f32.mrb[140].mxu1  ;;  %v3807_v30 = vadd.f32 %v3801_v55, %v3761_v35  ;;  %v5714_v0 = vpop.f32.mrb[137].mxu0  ;;  %v4607_v35 = vsel %vm410_vm7, %v6835_v11, 0.0  ;;  %v4265_v55 = vrot.slane %v4228_v4, 1  ;;  %v4210_v4 = vadd.f32 %v4202_v1, %v4190_v31 }
 0x2ca   : > { %v5720_v14 = vpop.f32.mrb[141].mxu1  ;;  %v3804_v28 = vpop.f32.mrb[138].mxu0  ;;  %v6865_v10 = vadd.f32 %v4607_v35, %v6721_v39  ;;  %v4303_v0 = vmul.f32 %v6628_v26, %v6682_v40  ;;  %v4304_v39 = vmul.f32 %v6628_v26, %v6693_v16  ;;  %v4373_v31 = vmul.f32 %v6656_v18, %v6682_v40 }
 0x2cb   : > { %v3850_v3 = vpop.f32.mrb[142].mxu1  ;;  %v3853_v46 = vadd.f32 %v3847_v63, %v3807_v30  ;;  %v5715_v6 = vpop.f32.mrb[139].mxu0  ;;  %v4337_v63 = vrot.slane %v4301_v51, 2  ;;  %v4432_v30 = vsel %vm4076_vm8, %v4430_v17, %v4431_v9  ;;  %v4506_v14 = vrot.slane %v4471_v57, 2 }
 0x2cc   : > { %v5721_v41 = vpop.f32.mrb[143].mxu1  ;;  %v4097_v17 = vsel %vm4076_vm8, %v4095_v47, %v4096_v37  ;;  %v4456_v9 = vadd.f32 %v4432_v30, %v4380_v36  ;;  %v4507_v28 = vrot.slane %v4472_v59, 2  ;;  %v4266_v13 = vsel %vm4076_vm8, %v4264_v23, %v4265_v55 }
 0x2cd   : > { %v4030_v6 = vmul.f32 %v6582_v60, %v6682_v40  ;;  %v4171_v41 = vrot.slane %v4133_v45, 2  ;;  %v4172_v57 = vrot.slane %v4134_v49, 2  ;;  %v4339_v36 = vsel %vm494_vm1, %v4337_v63, %v4338_v8 }
 0x2ce   : > { %v4340_v37 = vrot.slane %v4303_v0, 2  ;;  %v4341_v1 = vrot.slane %v4304_v39, 2  ;;  %v4361_v23 = vadd.f32 %v4339_v36, %v4285_v5  ;;  %v4286_v30 = vadd.f32 %v4266_v13, %v4210_v4 }
 0x2cf   : > { %v4115_v55 = vadd.f32 %v4097_v17, %v4030_v6  ;;  %v4473_v45 = vmul.f32 %v6673_v32, %v6682_v40  ;;  %v4058_v63 = vmul.f32 %v6556_v53, %v6833_v19  ;;  %v4059_v8 = vmul.f32 %v6556_v53, %v6835_v11 }
 0x2d0   : > { %v3894_v27 = vpop.f32.mrb[140].mxu0  ;;  %v4173_v5 = vsel %vm494_vm1, %v4171_v41, %v4172_v57  ;;  %v4229_v0 = vmul.f32 %v6608_v12, %v6833_v19  ;;  %v4230_v39 = vmul.f32 %v6608_v12, %v6835_v11  ;;  %v4399_v40 = vmul.f32 %v6664_v61, %v6833_v19 }
 0x2d1   : > { %v3940_v51 = vpop.f32.mrb[144].mxu1  ;;  %v3900_v3 = vadd.f32 %v3894_v27, %v3853_v46  ;;  %v5726_v22 = vpop.f32.mrb[141].mxu0  ;;  %v4508_v27 = vsel %vm494_vm1, %v4506_v14, %v4507_v28  ;;  %v4342_v14 = vsel %vm494_vm1, %v4340_v37, %v4341_v1  ;;  %v4191_v4 = vadd.f32 %v4173_v5, %v4115_v55 }
 0x2d2   : > { %v5732_v35 = vpop.f32.mrb[145].mxu1  ;;  %v3897_v58 = vpop.f32.mrb[142].mxu0  ;;  %v4433_v22 = vrot.slane %v4397_v24, 1  ;;  %v4532_v49 = vadd.f32 %v4508_v27, %v4456_v9  ;;  %v4362_v9 = vadd.f32 %v4342_v14, %v4286_v30  ;;  %v4381_v53 = vadd.f32 %v4373_v31, %v4361_v23 }
 0x2d3   : > { %v3943_v29 = vpop.f32.mrb[146].mxu1  ;;  %v3946_v46 = vadd.f32 %v3940_v51, %v3900_v3  ;;  %v5727_v59 = vpop.f32.mrb[143].mxu0  ;;  %v4434_v35 = vrot.slane %v4398_v21, 1  ;;  %v4400_v51 = vmul.f32 %v6664_v61, %v6835_v11  ;;  %v4474_v28 = vmul.f32 %v6673_v32, %v6693_v16 }
 0x2d4   : > { %v5733_v47 = vpop.f32.mrb[147].mxu1  ;;  %v4203_v24 = vmul.f32 %v6611_v44, %v6833_v19  ;;  %v4509_v58 = vrot.slane %v4473_v45, 2  ;;  %v4098_v6 = vrot.slane %v4058_v63, 1  ;;  %v4099_v41 = vrot.slane %v4059_v8, 1 }
 0x2d5   : > { %v4435_v21 = vsel %vm4076_vm8, %v4433_v22, %v4434_v35  ;;  %v4267_v57 = vrot.slane %v4229_v0, 1  ;;  %v4374_v36 = vmul.f32 %v6656_v18, %v6833_v19  ;;  %v4268_v37 = vrot.slane %v4230_v39, 1 }
 0x2d6   : > { %v4436_v16 = vrot.slane %v4399_v40, 1  ;;  %v4135_v1 = vmul.f32 %v6579_v7, %v6833_v19  ;;  %v4136_v23 = vmul.f32 %v6579_v7, %v6835_v11  ;;  %v4305_v55 = vmul.f32 %v6628_v26, %v6833_v19 }
 0x2d7   : > { %v4510_v30 = vrot.slane %v4474_v28, 2  ;;  %v4306_v27 = vmul.f32 %v6628_v26, %v6835_v11  ;;  %v4476_v22 = vmul.f32 %v6673_v32, %v6835_v11  ;;  %v4211_v35 = vadd.f32 %v4203_v24, %v4191_v4 }
 0x2d8   : > { %v3986_v17 = vpop.f32.mrb[144].mxu0  ;;  %v4382_v45 = vadd.f32 %v4374_v36, %v4362_v9  ;;  %v4457_v63 = vadd.f32 %v4435_v21, %v4381_v53  ;;  %v6926_v7 = vmul.f32 %v6673_v32, %v6810_v20  ;;  %v4100_v8 = vsel %vm4076_vm8, %v4098_v6, %v4099_v41 }
 0x2d9   : > { %v3992_v3 = vadd.f32 %v3986_v17, %v3946_v46  ;;  %v5738_v13 = vpop.f32.mrb[145].mxu0  ;;  %v4437_v46 = vrot.slane %v4400_v51, 1  ;;  %v4269_v5 = vsel %vm4076_vm8, %v4267_v57, %v4268_v37  ;;  %v4547_v39 = vadd.f32 %v6767_v15, %v4532_v49 }
 0x2da   : > { %v3989_v29 = vpop.f32.mrb[146].mxu0  ;;  %v4031_v11 = vmul.f32 %v6582_v60, %v6833_v19  ;;  %v4174_v14 = vrot.slane %v4135_v1, 2  ;;  %v4175_v40 = vrot.slane %v4136_v23, 2  ;;  %v4511_v51 = vsel %vm494_vm1, %v4509_v58, %v4510_v30 }
 0x2db   : > { %v3993_v59 = vadd.f32 %v6753_v54, %v3992_v3  ;;  %v5739_v47 = vpop.f32.mrb[147].mxu0  ;;  %v4475_v54 = vmul.f32 %v6673_v32, %v6833_v19  ;;  %v4438_v0 = vsel %vm4076_vm8, %v4436_v16, %v4437_v46  ;;  %v4343_v17 = vrot.slane %v4305_v55, 2 }
 0x2dc   : > { %v4344_v4 = vrot.slane %v4306_v27, 2  ;;  %v4513_v53 = vrot.slane %v4476_v22, 2  ;;  %v4116_v28 = vadd.f32 %v4100_v8, %v4031_v11  ;;  %v4287_v3 = vadd.f32 %v4269_v5, %v4211_v35 }
 0x2dd   : > { %v3994_v31 = vmax.f32 %v3993_v59, 0.0  ;;  %v4512_v9 = vrot.slane %v4475_v54, 2  ;;  %v4458_v13 = vadd.f32 %v4438_v0, %v4382_v45  ;;  %v4533_v24 = vadd.f32 %v4511_v51, %v4457_v63 }
 0x2de   : > { %v4376_v21 = vmul.f32 %v6656_v18, %v6808_v2  ;;  %v4442_v49 = vrot.slane %v6821_v52, 1  ;;  %v4443_v29 = vrot.slane %v6825_v38, 1  ;;  %v4555_v60 = vsel %vm408_vm6, %v6806_v56, 0.0 }
 0x2df   : > { %3996 = vst.msk [vmem:[#allocation3 + $0x81] sm:$0xff] %vm408_vm6, %v3994_v31  ;;  %v4518_v19 = vrot.slane %v6831_v43, 2  ;;  %v4519_v58 = vrot.slane %v6926_v7, 2  ;;  %v4592_v6 = vsel %vm408_vm6, %v6808_v2, 0.0  ;;  %v4611_v41 = vsel %vm410_vm7, %v6810_v20, 0.0 }
 0x2e0   : > { %v4176_v57 = vsel %vm494_vm1, %v4174_v14, %v4175_v40  ;;  %v4345_v36 = vsel %vm494_vm1, %v4343_v17, %v4344_v4  ;;  %v4514_v52 = vsel %vm494_vm1, %v4512_v9, %v4513_v53  ;;  %v4557_v38 = vsel %vm408_vm6, %v4547_v39, 0.0 }
 0x2e1   : > { %v4192_v47 = vadd.f32 %v4176_v57, %v4116_v28  ;;  %v4363_v43 = vadd.f32 %v4345_v36, %v4287_v3  ;;  %v4534_v37 = vadd.f32 %v4514_v52, %v4458_v13  ;;  %v4548_v16 = vadd.f32 %v6767_v15, %v4533_v24 }
 0x2e2   : > { %v4444_v53 = vsel %vm4076_vm8, %v4442_v49, %v4443_v29  ;;  %v4556_v3 = vadd.f32 %v4555_v60, %v6796_v25  ;;  %v4520_v52 = vsel %vm494_vm1, %v4518_v19, %v4519_v58 }
 0x2e3   : > { %v4549_v4 = vadd.f32 %v6767_v15, %v4534_v37  ;;  %v4559_v13 = vsel %vm408_vm6, %v4548_v16, 0.0 }
 0x2e6   : > { %v4013_v59 = vld [vmem:[#allocation3 + $0x80] sm:$0xff]  ;;  %v4014_v56 = vld [vmem:[#allocation3 + $0x88] sm:$0x3] }
 0x2e7   : > { %v4204_v2 = vmul.f32 %v6611_v44, %v4013_v59  ;;  %v4231_v46 = vmul.f32 %v6608_v12, %v4013_v59  ;;  %v4232_v20 = vmul.f32 %v6608_v12, %v4014_v56  ;;  %v4307_v1 = vmul.f32 %v6628_v26, %v4013_v59 }
 0x2e8   : > { %v4308_v23 = vmul.f32 %v6628_v26, %v4014_v56  ;;  %v4375_v55 = vmul.f32 %v6656_v18, %v4013_v59  ;;  %v4401_v30 = vmul.f32 %v6664_v61, %v4013_v59  ;;  %v4402_v31 = vmul.f32 %v6664_v61, %v4014_v56 }
 0x2e9   : > { %v4212_v27 = vadd.f32 %v4204_v2, %v4192_v47  ;;  %v4270_v54 = vrot.slane %v4231_v46, 1  ;;  %v4271_v22 = vrot.slane %v4232_v20, 1  ;;  %v4346_v35 = vrot.slane %v4307_v1, 2 }
 0x2ea   : > { %v4347_v45 = vrot.slane %v4308_v23, 2  ;;  %v4383_v44 = vadd.f32 %v4375_v55, %v4363_v43  ;;  %v4439_v63 = vrot.slane %v4401_v30, 1  ;;  %v4440_v7 = vrot.slane %v4402_v31, 1  ;;  %v5782_v55 = vld [vmem:[%s7045_s9 + $0x8] ss:$24 sps:$4 sm:$0xff]  }
 0x2eb   : > { %v4272_v12 = vsel %vm4076_vm8, %v4270_v54, %v4271_v22  ;;  %v4477_v8 = vmul.f32 %v6673_v32, %v4013_v59  ;;  %v4478_v26 = vmul.f32 %v6673_v32, %v4014_v56  ;;  %v4590_v18 = vsel %vm408_vm6, %v4013_v59, 0.0  ;;  %v5787_v31 = vld [vmem:[%s7045_s9 + $0x34] ss:$24 sps:$4 sm:$0xff]  }
 0x2ec   : > { %v4288_v5 = vadd.f32 %v4272_v12, %v4212_v27  ;;  %v4348_v0 = vsel %vm494_vm1, %v4346_v35, %v4347_v45  ;;  %v4441_v61 = vsel %vm4076_vm8, %v4439_v63, %v4440_v7  ;;  %v4591_v39 = vadd.f32 %v4590_v18, %v6860_v62  ;;  %v5788_v27 = vld [vmem:[%s7045_s9 + $0x38] ss:$24 sps:$4 sm:$0xff]   ;;  %v5790_v54 = vld [vmem:[%s7045_s9 + $0x3c] ss:$24 sps:$4 sm:$0xff]   ;;  %4795 = vmatprep.subr.bf16.mxu0 %v5787_v31 }
 0x2ed   : > { %v4459_v11 = vadd.f32 %v4441_v61, %v4383_v44  ;;  %v4515_v14 = vrot.slane %v4477_v8, 2  ;;  %v4516_v40 = vrot.slane %v4478_v26, 2  ;;  %v4609_v51 = vsel %vm410_vm7, %v4014_v56, 0.0  ;;  %v5793_v35 = vld [vmem:[%s7045_s9 + $0x14] ss:$24 sps:$4 sm:$0xff]  }
 0x2ee   : > { %v4364_v17 = vadd.f32 %v4348_v0, %v4288_v5  ;;  %v4593_v9 = vadd.f32 %v4592_v6, %v4591_v39  ;;  %v4610_v32 = vadd.f32 %v4609_v51, %v6865_v10  ;;  %v4558_v59 = vadd.f32 %v4557_v38, %v4556_v3  ;;  %v4628_v26 = vld [vmem:[%s7044_s8] sm:$0x1] }
 0x2ef   : > { %v4517_v28 = vsel %vm494_vm1, %v4515_v14, %v4516_v40  ;;  %v4561_v10 = vsel %vm408_vm6, %v4549_v4, 0.0  ;;  %v5809_v22 = vmov 0   ;;  %v5791_v40 = vld [vmem:[%s7045_s9 + $0x10] ss:$24 sps:$4 sm:$0xff]   ;;  %v5794_v4 = vld [vmem:[%s7045_s9 + $0x40] ss:$24 sps:$4 sm:$0xff]  }
 0x2f0   : > { %v4384_v62 = vadd.f32 %v4376_v21, %v4364_v17  ;;  %v4535_v24 = vadd.f32 %v4517_v28, %v4459_v11  ;;  %v4612_v57 = vadd.f32 %v4611_v41, %v4610_v32  ;;  %v4613_v36 = vsel %vm408_vm6, %v4593_v9, 0.0  ;;  %4825 = vmatprep.mubr.bf16.mxu0 %v5809_v22  ;;  %v5796_v17 = vld [vmem:[%s7045_s9 + $0x44] ss:$24 sps:$4 sm:$0xff]  }
 0x2f1   : > { %v4560_v29 = vadd.f32 %v4559_v13, %v4558_v59  ;;  %v4698_v9 = vld [vmem:[%s7046_s10] sm:$0x3f]  ;;  %v5810_v32 = vmov 1966171168   ;;  %v4774_v28 = vsub.s32 3, %v6543_v34 }
 0x2f2   : > { %v4460_v56 = vadd.f32 %v4444_v53, %v4384_v62  ;;  %v4550_v6 = vadd.f32 %v6767_v15, %v4535_v24  ;;  %v4614_v49 = vsel %vm410_vm7, %v4612_v57, 0.0  ;;  %v4926_v53 = vunpack.c.l.s4 %v5810_v32 }
 0x2f3   : > { %v4615_v47 = vadd.f32 %v4614_v49, %v4613_v36  ;;  %v4562_v21 = vadd.f32 %v4561_v10, %v4560_v29  ;;  %v4763_v3 = vrot.slane %v4698_v9, %v6569_v48  ;;  %v4771_v13 = vrot.slane %v4698_v9, %v6559_v50 }
 0x2f4   : > { %v4536_v25 = vadd.f32 %v4520_v52, %v4460_v56  ;;  %v4563_v60 = vsel %vm408_vm6, %v4550_v6, 0.0  ;;  %v4767_v62 = vrot.slane %v4698_v9, %v6546_v42  ;;  %v4927_v24 = vunpack.c.0.s8 %v4926_v53 }
 0x2f5   : > { %v4564_v43 = vadd.f32 %v4563_v60, %v4562_v21  ;;  %v4616_v45 = vrot.slane %v4615_v47, 4  ;;  %v4775_v57 = vrot.slane %v4698_v9, %v4774_v28  ;;  %v4778_v49 = vsub.s32 4, %v6543_v34 }
 0x2f6   : > { %v4551_v41 = vadd.f32 %v6767_v15, %v4536_v25  ;;  %v5785_v15 = vld [vmem:[%s7045_s9 + $0x30] ss:$24 sps:$4 sm:$0xff]   ;;  %v4782_v50 = vsub.s32 5, %v6543_v34 }
 0x2f7   : > { %4796 = vmatpush1.bf16.msra.mxu0 %v5785_v15  ;;  %v4617_v44 = vadd.f32 %v4616_v45, %v4615_v47  ;;  %v4930_v47 = vsub.s32 %v4927_v24, %v6543_v34 }
 0x2f8   : > { %v4565_v37 = vsel %vm408_vm6, %v4551_v41, 0.0  ;;  %4875 = vmatprep.subr.bf16.mxu0 %v5793_v35 }
 0x2f9   : > { %v4566_v19 = vadd.f32 %v4565_v37, %v4564_v43  ;;  %v4618_v63 = vrot.slane %v4617_v44, 2  ;;  %v4779_v37 = vrot.slane %v4698_v9, %v4778_v49 }
 0x2fb   : > { %v4567_v58 = vsel %vm408_vm6, %v4566_v19, 0.0  ;;  %v4619_v7 = vadd.f32 %v4618_v63, %v4617_v44 }
 0x2fc   : > { %v4568_v38 = vrot.slane %v4567_v58, 4 }
 0x2fd   : > { %v4620_v12 = vrot.slane %v4619_v7, 1 }
 0x2fe   : > { %v4569_v16 = vadd.f32 %v4568_v38, %v4567_v58  ;;  %v4783_v38 = vrot.slane %v4698_v9, %v4782_v50 }
 0x2ff   : > { %v4621_v8 = vadd.f32 %v4620_v12, %v4619_v7 }
 0x300   : > { %v4570_v2 = vrot.slane %v4569_v16, 2 }
 0x301   : > { %v4622_v5 = vmul.f32 0.015625, %v4621_v8 }
 0x302   : > { %v4571_v46 = vadd.f32 %v4570_v2, %v4569_v16 }
 0x304   : > { %v4572_v20 = vrot.slane %v4571_v46, 1 }
 0x306   : > { %v4573_v1 = vadd.f32 %v4572_v20, %v4571_v46 }
 0x308   : > { %v4574_v23 = vmul.f32 0.015625, %v4573_v1 }
 0x30a   : > { %v4623_v30 = vpack.c.bf16 %v4574_v23, %v4574_v23 }
 0x30c   : > { %5745 = vmatmul.mubr.msk.bf16.vlgmr.msra.gmra.mrb[148].mxu1 %vm408_vm6, %v4623_v30 }
 0x30d   : > { %4835 = vmatpush1.bf16.msra.mxu1 %v5782_v55  ;;  %4866 = vmatprep.mubr.bf16.mxu1 %v5809_v22 }
 0x30e   : > { %4836 = vmatprep.subr.bf16.mxu1 %v5790_v54 }
 0x311   : > { %4837 = vmatpush1.bf16.msra.mxu1 %v5788_v27 }
 0x3df   : > { %v4678_v18 = vpop.f32.mrb[148].mxu1 }
 0x3e0   : > { %v4679_v0 = vadd.f32 %v4678_v18, %v4628_v26  ;;  %v5746_v61 = vpop.f32.mrb[149].mxu1 }
 0x3e1   : > { %v4681_v39 = vpop.f32.mrb[150].mxu1 }
 0x3e2   : > { %v4684_v11 = vadd.f32 %v4679_v0, %v4622_v5  ;;  %v5747_v14 = vpop.f32.mrb[151].mxu1 }
 0x3e4   : > { %v4685_v51 = vpack.c.bf16 %v4684_v11, %v4684_v11 }
 0x3e6   : > { %5137 = vmatmul.mubr.msk.bf16.vlgmr.msra.gmra.mrb[148].mxu0 %vm408_vm6, %v4685_v51  ;;  %5138 = vmatmul.mubr.msk.bf16.vlgmr.msra.gmra.mrb[152].mxu1 %vm408_vm6, %v4685_v51 }
 0x3e7   : > { %4876 = vmatpush1.bf16.msra.mxu0 %v5791_v40  ;;  %4907 = vmatprep.mubr.bf16.mxu0 %v5809_v22 }
 0x3e8   : > { %4877 = vmatprep.subr.bf16.mxu0 %v5796_v17 }
 0x3eb   : > { %4878 = vmatpush1.bf16.msra.mxu0 %v5794_v4 }
 0x3ee   : > { %5139 = vmatmul.mubr.msk.bf16.vlgmr.msra.gmra.mrb[152].mxu0 %vm408_vm6, %v4685_v51 }
 0x4b9   : > { %v4827_v36 = vpop.f32.mrb[148].mxu0  ;;  %v4868_v52 = vpop.f32.mrb[152].mxu1 }
 0x4ba   : > { %v4828_v59 = vadd.f32 %v4827_v36, %v4763_v3  ;;  %v4869_v56 = vadd.f32 %v4868_v52, %v4771_v13  ;;  %v4829_v6 = vpop.f32.mrb[149].mxu0  ;;  %v4870_v10 = vpop.f32.mrb[153].mxu1 }
 0x4bb   : > { %v4830_v29 = vadd.f32 %v4829_v6, %v4767_v62  ;;  %v4871_v25 = vadd.f32 %v4870_v10, %v4775_v57  ;;  %v4831_v60 = vpop.f32.mrb[150].mxu0  ;;  %v4872_v48 = vpop.f32.mrb[154].mxu1 }
 0x4bc   : > { %v4832_v21 = vpop.f32.mrb[151].mxu0  ;;  %v4873_v42 = vpop.f32.mrb[155].mxu1 }
 0x4bd   : > { %v4922_v41 = vcombine.low %v4828_v59, %v4830_v29  ;;  %v4923_v43 = vcombine.low %v4869_v56, %v4871_v25 }
 0x4bf   : > { %v4931_v19 = vrot.slane %v4922_v41, %v4930_v47  ;;  %v4938_v58 = vrot.slane %v4923_v43, %v4930_v47 }
 0x4c1   : > { %v4946_v16 = vcombine.low %v4931_v19, %v4938_v58  ;;  %v4909_v2 = vpop.f32.mrb[152].mxu0 }
 0x4c2   : > { %v4910_v46 = vadd.f32 %v4909_v2, %v4779_v37  ;;  %v4911_v20 = vpop.f32.mrb[153].mxu0 }
 0x4c3   : > { %v4912_v1 = vadd.f32 %v4911_v20, %v4783_v38  ;;  %v4913_v23 = vpop.f32.mrb[154].mxu0  ;;  %v4953_v34 = vrot.slane %v4946_v16, %v4930_v47 }
 0x4c4   : > { %v4914_v55 = vpop.f32.mrb[155].mxu0 }
 0x4c5   : > { %v4924_v30 = vcombine.low %v4910_v46, %v4912_v1 }
 0x4c7   : > { %v4945_v15 = vrot.slane %v4924_v30, %v4930_v47 }
 0x4c9   : > { %v4960_v31 = vrot.slane %v4945_v15, %v4930_v47 }
 0x4cb   : > { %v4961_v27 = vcombine.low %v4953_v34, %v4960_v31 }
 0x4cd   : > { %4967 = vst.msk [vmem:[%s384_s26] sm:$0x3f] %vm4965_vm9, %v4961_v27 }
 0x4ce PF: > { %s21_s17 = sadd.s32 1, %s5804_s17  }
 0x4cf   : > { %p18_p4 = scmp.ge.s32.totalorder %s21_s17, 4  }
 0x4d1   :  { %20 = sbr.rel (!%p18_p4) target bundleno = 1 (0x1), region = 111 }

</bundles_post_ra>
